<compile_context>
chip_gen: v5e
topology: v5e:2x2
jax: 0.10.0
libtpu: 0.0.40
codegen_flags: <defaults>
</compile_context>

<pallas_src>
import functools

import jax
import jax.numpy as jnp
import numpy as np
from jax.experimental import pallas as pl
from jax.experimental.pallas import tpu as pltpu


def _activeben(x):
    # x<=-1 -> x+1/3 ; -1<x<1 -> x*(x^2+3)/6 ; x>=1 -> x-1/3  (continuous at +-1)
    return jnp.where(
        x <= -1.0,
        x + 1.0 / 3.0,
        jnp.where(x >= 1.0, x - 1.0 / 3.0, x * (x * x + 3.0) * (1.0 / 6.0)),
    )


def _inception_aux_kernel(x_ref, kpool_ref, wc_ref, bc_ref, w1_ref, b1_ref,
                          w2_ref, b2_ref, o_ref, z_ref, h1_ref):
    k = pl.program_id(1)                  # fc1 K-chunk index (pipelined axis)
    NK = z_ref.shape[0]                   # number of fc1 chunks
    S = kpool_ref.shape[0]                # pooling windows (2*2*2 = 8)
    OC = wc_ref.shape[1]                  # conv output channels (128)
    WPC = S // NK                         # windows per chunk

    # ---- chunk 0 only: AvgPool3d + 1x1 Conv3d + BN + ActiveBen, staged to VMEM
    @pl.when(k == 0)
    def _():
        h1_ref[...] = jnp.zeros_like(h1_ref)
        x = x_ref[...]                                   # (TB, Cp, DHW) f32
        kp = kpool_ref[...]                              # (S, DHW): 1/125 masks
        # All pooled windows up front so x dies before any matmul is issued.
        pooled = [jnp.sum(x * kp[s:s + 1, :], axis=-1) for s in range(S)]
        wc = wc_ref[...]                                 # (Cp, OC), BN folded
        bc = bc_ref[...]                                 # (1, OC)
        for s in range(S):
            # 1x1x1 Conv3d + BatchNorm3d + ActiveBen (scale/bias pre-folded).
            z = jnp.dot(pooled[s], wc, preferred_element_type=jnp.float32) + bc
            c, l = s // WPC, (s % WPC) * OC
            z_ref[c, :, l:l + OC] = _activeben(z).astype(z_ref.dtype)

    # ---- every chunk: fc1 partial sum against the pipelined w1 block (bf16) --
    h1_ref[...] += jnp.dot(z_ref[k], w1_ref[...],
                           preferred_element_type=jnp.float32)

    # ---- last chunk: fc1 bias + ActiveBen, dropout (inference id), fc2, store
    @pl.when(k == NK - 1)
    def _():
        h1 = _activeben(h1_ref[...] + b1_ref[...])
        # TODO(synk): nn.Dropout(p=0.7) is an inference-mode identity here
        # (training-mode RNG not reproduced).
        out = jnp.dot(h1.astype(w2_ref.dtype), w2_ref[...],
                      preferred_element_type=jnp.float32) + b2_ref[...]
        o_ref[...] = out.astype(o_ref.dtype)             # (TB, 128) lane-dense


def _pool_matrix(n, kernel=5, stride=3):
    out = (n - kernel) // stride + 1
    P = np.zeros((out, n), np.float32)
    for o in range(out):
        P[o, o * stride:o * stride + kernel] = 1.0 / kernel
    return P


def prepare_params(p, spatial, eps=1e-5):
    """One-time host-side weight folding / permutation / padding / bf16 cast."""
    D, H, W = spatial
    Pd, Ph, Pw = _pool_matrix(D), _pool_matrix(H), _pool_matrix(W)
    S = Pd.shape[0] * Ph.shape[0] * Pw.shape[0]
    # Combined pooling weights per window: kpool[s, dhw] = 1/125 inside window s.
    kpool = np.einsum("ad,bh,cw->abcdhw", Pd, Ph, Pw).reshape(S, D * H * W)

    conv_w = np.asarray(p["conv_w"], np.float32)        # (OC, C)
    OC, C = conv_w.shape
    scale = np.asarray(p["bn_gamma"], np.float32) / np.sqrt(
        np.asarray(p["bn_var"], np.float32) + eps)
    wc_t = (conv_w * scale[:, None]).T                  # (C, OC), BN scale folded
    Cp = ((C + 7) // 8) * 8
    wc_t = np.pad(wc_t, ((0, Cp - C), (0, 0)))
    bc = ((np.asarray(p["conv_b"], np.float32) - np.asarray(p["bn_mean"], np.float32))
          * scale + np.asarray(p["bn_beta"], np.float32)).reshape(1, OC)

    fc1_w = np.asarray(p["fc1_w"], np.float32)          # (N1, OC*S), torch order oc*S+s
    N1 = fc1_w.shape[0]
    assert fc1_w.shape[1] == OC * S, "fc1 input dim must equal conv_channels * pooled voxels"
    # Permute fc1 input dim to s-major (row = s*OC + oc): makes the torch flatten free.
    w1_t = fc1_w.T.reshape(OC, S, N1).transpose(1, 0, 2).reshape(OC * S, N1)
    b1 = np.asarray(p["fc1_b"], np.float32).reshape(1, N1)

    fc2_w = np.asarray(p["fc2_w"], np.float32)          # (num_classes, N1)
    NC = fc2_w.shape[0]
    NCp = ((NC + 127) // 128) * 128                     # lane-dense output padding
    w2_t = np.pad(fc2_w.T, ((0, 0), (0, NCp - NC)))
    b2 = np.pad(np.asarray(p["fc2_b"], np.float32), (0, NCp - NC)).reshape(1, NCp)

    return {
        "kpool": jnp.asarray(kpool),
        "wc_t": jnp.asarray(wc_t),
        "bc": jnp.asarray(bc),
        "w1_t": jnp.asarray(w1_t, dtype=jnp.bfloat16),  # dominant HBM stream, bf16
        "b1": jnp.asarray(b1),
        "w2_t": jnp.asarray(w2_t, dtype=jnp.bfloat16),
        "b2": jnp.asarray(b2),
    }


@functools.partial(jax.jit, static_argnames=("num_classes", "num_chunks"))
def inception_aux_forward(x, prep, *, num_classes, num_chunks=2):
    B, C, D, H, W = x.shape
    DHW = D * H * W
    Cp, OC = prep["wc_t"].shape
    S = prep["kpool"].shape[0]
    N1 = prep["w1_t"].shape[1]
    NCp = prep["w2_t"].shape[1]
    assert prep["kpool"].shape[1] == DHW

    NK = num_chunks if (num_chunks > 0 and S % num_chunks == 0) else 1
    CW = (S // NK) * OC                      # fc1 rows (lanes of z) per chunk

    # Batch tiling: bounds the per-step x block / VMEM use and lets the batch
    # axis shard across TensorCores ("parallel") when batch grows.
    Bp = ((B + 7) // 8) * 8
    TB = Bp if Bp <= 128 else 128
    Bp = ((Bp + TB - 1) // TB) * TB
    nb = Bp // TB

    x3 = x.reshape(B, C, DHW).astype(jnp.float32)
    x3 = jnp.pad(x3, ((0, Bp - B), (0, Cp - C), (0, 0)))

    cost = pl.CostEstimate(
        flops=int(2 * Bp * (Cp * DHW * S + Cp * OC * S + S * OC * N1 + N1 * NCp)),
        transcendentals=0,
        bytes_accessed=int(
            x3.size * 4
            + prep["kpool"].size * 4 + prep["wc_t"].size * 4 + prep["bc"].size * 4
            + prep["w1_t"].size * 2 + prep["b1"].size * 4
            + prep["w2_t"].size * 2 + prep["b2"].size * 4
            + Bp * NCp * 4),
    )

    out = pl.pallas_call(
        _inception_aux_kernel,
        out_shape=jax.ShapeDtypeStruct((Bp, NCp), jnp.float32),
        grid_spec=pltpu.PrefetchScalarGridSpec(
            num_scalar_prefetch=0,
            grid=(nb, NK),
            in_specs=[
                pl.BlockSpec((TB, Cp, DHW), lambda b, k: (b, 0, 0)),   # x (resident per batch tile)
                pl.BlockSpec((S, DHW), lambda b, k: (0, 0)),           # pooling masks
                pl.BlockSpec((Cp, OC), lambda b, k: (0, 0)),           # conv+BN weight
                pl.BlockSpec((1, OC), lambda b, k: (0, 0)),            # conv+BN bias
                pl.BlockSpec((CW, N1), lambda b, k: (k, 0)),           # fc1 weight chunk (pipelined)
                pl.BlockSpec((1, N1), lambda b, k: (0, 0)),            # fc1 bias
                pl.BlockSpec((N1, NCp), lambda b, k: (0, 0)),          # fc2 weight
                pl.BlockSpec((1, NCp), lambda b, k: (0, 0)),           # fc2 bias
            ],
            out_specs=pl.BlockSpec((TB, NCp), lambda b, k: (b, 0)),
            scratch_shapes=[
                pltpu.VMEM((NK, TB, CW), jnp.bfloat16),   # staged fc1 input z
                pltpu.VMEM((TB, N1), jnp.float32),        # h1 accumulator
            ],
        ),
        compiler_params=pltpu.CompilerParams(
            dimension_semantics=("parallel", "arbitrary")),
        cost_estimate=cost,
    )(x3, prep["kpool"], prep["wc_t"], prep["bc"], prep["w1_t"], prep["b1"],
      prep["w2_t"], prep["b2"])
    return out[:B, :num_classes]


# ----------------------- pure-JAX reference for checking -----------------------
def ref_forward(x, p):
    B, C, D, H, W = x.shape
    od, oh, ow = (D - 5) // 3 + 1, (H - 5) // 3 + 1, (W - 5) // 3 + 1
    ps = []
    for i in range(od):
        for j in range(oh):
            for k in range(ow):
                ps.append(
                    jnp.mean(
                        x[:, :, 3 * i: 3 * i + 5, 3 * j: 3 * j + 5, 3 * k: 3 * k + 5],
                        axis=(2, 3, 4),
                    )
                )
    pooled = jnp.stack(ps, axis=-1).reshape(B, C, od, oh, ow)
    y = jnp.einsum("oc,bcdhw->bodhw", p["conv_w"], pooled) + p["conv_b"][None, :, None, None, None]
    y = (y - p["bn_mean"][None, :, None, None, None]) / jnp.sqrt(
        p["bn_var"][None, :, None, None, None] + 1e-5
    ) * p["bn_gamma"][None, :, None, None, None] + p["bn_beta"][None, :, None, None, None]
    y = _activeben(y)
    f = y.reshape(B, -1)
    h = _activeben(f @ p["fc1_w"].T + p["fc1_b"])
    return h @ p["fc2_w"].T + p["fc2_b"]


def init_params(key, in_channels, num_classes):
    ks = jax.random.split(key, 10)
    return {
        "conv_w": jax.random.normal(ks[0], (128, in_channels), jnp.float32) * 0.1,
        "conv_b": jax.random.normal(ks[1], (128,), jnp.float32) * 0.1,
        "bn_gamma": jax.random.uniform(ks[2], (128,), jnp.float32, 0.5, 1.5),
        "bn_beta": jax.random.normal(ks[3], (128,), jnp.float32) * 0.1,
        "bn_mean": jax.random.normal(ks[4], (128,), jnp.float32) * 0.1,
        "bn_var": jax.random.uniform(ks[5], (128,), jnp.float32, 0.5, 1.5),
        "fc1_w": jax.random.normal(ks[6], (1024, 1024), jnp.float32) * (1.0 / 32.0),
        "fc1_b": jax.random.normal(ks[7], (1024,), jnp.float32) * 0.05,
        "fc2_w": jax.random.normal(ks[8], (num_classes, 1024), jnp.float32) * (1.0 / 32.0),
        "fc2_b": jax.random.normal(ks[9], (num_classes,), jnp.float32) * 0.05,
    }


if __name__ == "__main__":
    B, C, num_classes = 2, 4, 10
    # Spatial 8^3: AvgPool3d(5, stride=3) -> 2^3, so 128 * 8 = 1024 features for fc1.
    key = jax.random.PRNGKey(0)
    kx, kp = jax.random.split(key)
    x = jax.random.normal(kx, (B, C, 8, 8, 8), jnp.float32)
    params = init_params(kp, C, num_classes)

    prep = prepare_params(params, (8, 8, 8))
    out = inception_aux_forward(x, prep, num_classes=num_classes)
    out = jax.block_until_ready(out)

    ref = ref_forward(x, params)
    np.testing.assert_allclose(np.asarray(out), np.asarray(ref), rtol=2e-3, atol=2e-3)
    print("KERNEL_OK")
</pallas_src>

<mosaic_0001>
module attributes {stable_mosaic.version = 11 : i64} {
  func.func @_inception_aux_kernel(%arg0: i32, %arg1: i32, %arg2: memref<8x8x512xf32, #tpu.memory_space<vmem>>, %arg3: memref<8x512xf32, #tpu.memory_space<vmem>>, %arg4: memref<8x128xf32, #tpu.memory_space<vmem>>, %arg5: memref<1x128xf32, #tpu.memory_space<vmem>>, %arg6: memref<512x1024xbf16, #tpu.memory_space<vmem>>, %arg7: memref<1x1024xf32, #tpu.memory_space<vmem>>, %arg8: memref<1024x128xbf16, #tpu.memory_space<vmem>>, %arg9: memref<1x128xf32, #tpu.memory_space<vmem>>, %arg10: memref<8x128xf32, #tpu.memory_space<vmem>>, %arg11: memref<2x8x512xbf16, #tpu.memory_space<vmem>>, %arg12: memref<8x1024xf32, #tpu.memory_space<vmem>>) attributes {dimension_semantics = [#tpu.dimension_semantics<parallel>, #tpu.dimension_semantics<arbitrary>], iteration_bounds = array<i64: 1, 2>, scalar_prefetch = 0 : i64, scratch_operands = 2 : i64, tpu.core_type = #tpu.core_type<tc>, window_params = [{transform_indices = @transform_0, window_bounds = array<i64: 8, 8, 512>}, {pipeline_mode = #tpu.pipeline_mode<synchronous>, transform_indices = @transform_1, window_bounds = array<i64: 8, 512>}, {pipeline_mode = #tpu.pipeline_mode<synchronous>, transform_indices = @transform_2, window_bounds = array<i64: 8, 128>}, {pipeline_mode = #tpu.pipeline_mode<synchronous>, transform_indices = @transform_3, window_bounds = array<i64: 1, 128>}, {transform_indices = @transform_4, window_bounds = array<i64: 512, 1024>}, {pipeline_mode = #tpu.pipeline_mode<synchronous>, transform_indices = @transform_5, window_bounds = array<i64: 1, 1024>}, {pipeline_mode = #tpu.pipeline_mode<synchronous>, transform_indices = @transform_6, window_bounds = array<i64: 1024, 128>}, {pipeline_mode = #tpu.pipeline_mode<synchronous>, transform_indices = @transform_7, window_bounds = array<i64: 1, 128>}, {transform_indices = @transform_8, window_bounds = array<i64: 8, 128>}]} {
    %c0_i32 = arith.constant 0 : i32
    %0 = arith.cmpi eq, %arg1, %c0_i32 : i32
    %1 = arith.extui %0 : i1 to i32
    %c0_i32_0 = arith.constant 0 : i32
    %2 = arith.cmpi ne, %1, %c0_i32_0 : i32
    scf.if %2 {
      %cst_9 = arith.constant 0.000000e+00 : f32
      %14 = vector.broadcast %cst_9 : f32 to vector<8x1024xf32>
      %c0_10 = arith.constant 0 : index
      %c0_11 = arith.constant 0 : index
      %15 = vector.load %arg12[%c0_10, %c0_11] : memref<8x1024xf32, #tpu.memory_space<vmem>>, vector<8x1024xf32>
      tpu.vector_store %arg12[%c0_10, %c0_11], %14 {strides = array<i32>} : memref<8x1024xf32, #tpu.memory_space<vmem>>, vector<8x1024xf32>,
      %c0_12 = arith.constant 0 : index
      %c0_13 = arith.constant 0 : index
      %c0_14 = arith.constant 0 : index
      %16 = vector.load %arg2[%c0_12, %c0_13, %c0_14] : memref<8x8x512xf32, #tpu.memory_space<vmem>>, vector<8x8x512xf32>
      %c0_15 = arith.constant 0 : index
      %c0_16 = arith.constant 0 : index
      %17 = vector.load %arg3[%c0_15, %c0_16] : memref<8x512xf32, #tpu.memory_space<vmem>>, vector<8x512xf32>
      %18 = vector.extract_strided_slice %17 {offsets = [0, 0], sizes = [1, 512], strides = [1, 1]} : vector<8x512xf32> to vector<1x512xf32>
      %19 = vector.shape_cast %18 : vector<1x512xf32> to vector<1x1x512xf32>
      %20 = vector.broadcast %19 : vector<1x1x512xf32> to vector<8x8x512xf32>
      %21 = arith.mulf %16, %20 : vector<8x8x512xf32>
      %cst_17 = arith.constant dense<0.000000e+00> : vector<8x8xf32>
      %22 = vector.multi_reduction <add>, %21, %cst_17 [2] : vector<8x8x512xf32> to vector<8x8xf32>
      %23 = vector.extract_strided_slice %17 {offsets = [1, 0], sizes = [1, 512], strides = [1, 1]} : vector<8x512xf32> to vector<1x512xf32>
      %24 = vector.shape_cast %23 : vector<1x512xf32> to vector<1x1x512xf32>
      %25 = vector.broadcast %24 : vector<1x1x512xf32> to vector<8x8x512xf32>
      %26 = arith.mulf %16, %25 : vector<8x8x512xf32>
      %cst_18 = arith.constant dense<0.000000e+00> : vector<8x8xf32>
      %27 = vector.multi_reduction <add>, %26, %cst_18 [2] : vector<8x8x512xf32> to vector<8x8xf32>
      %28 = vector.extract_strided_slice %17 {offsets = [2, 0], sizes = [1, 512], strides = [1, 1]} : vector<8x512xf32> to vector<1x512xf32>
      %29 = vector.shape_cast %28 : vector<1x512xf32> to vector<1x1x512xf32>
      %30 = vector.broadcast %29 : vector<1x1x512xf32> to vector<8x8x512xf32>
      %31 = arith.mulf %16, %30 : vector<8x8x512xf32>
      %cst_19 = arith.constant dense<0.000000e+00> : vector<8x8xf32>
      %32 = vector.multi_reduction <add>, %31, %cst_19 [2] : vector<8x8x512xf32> to vector<8x8xf32>
      %33 = vector.extract_strided_slice %17 {offsets = [3, 0], sizes = [1, 512], strides = [1, 1]} : vector<8x512xf32> to vector<1x512xf32>
      %34 = vector.shape_cast %33 : vector<1x512xf32> to vector<1x1x512xf32>
      %35 = vector.broadcast %34 : vector<1x1x512xf32> to vector<8x8x512xf32>
      %36 = arith.mulf %16, %35 : vector<8x8x512xf32>
      %cst_20 = arith.constant dense<0.000000e+00> : vector<8x8xf32>
      %37 = vector.multi_reduction <add>, %36, %cst_20 [2] : vector<8x8x512xf32> to vector<8x8xf32>
      %38 = vector.extract_strided_slice %17 {offsets = [4, 0], sizes = [1, 512], strides = [1, 1]} : vector<8x512xf32> to vector<1x512xf32>
      %39 = vector.shape_cast %38 : vector<1x512xf32> to vector<1x1x512xf32>
      %40 = vector.broadcast %39 : vector<1x1x512xf32> to vector<8x8x512xf32>
      %41 = arith.mulf %16, %40 : vector<8x8x512xf32>
      %cst_21 = arith.constant dense<0.000000e+00> : vector<8x8xf32>
      %42 = vector.multi_reduction <add>, %41, %cst_21 [2] : vector<8x8x512xf32> to vector<8x8xf32>
      %43 = vector.extract_strided_slice %17 {offsets = [5, 0], sizes = [1, 512], strides = [1, 1]} : vector<8x512xf32> to vector<1x512xf32>
      %44 = vector.shape_cast %43 : vector<1x512xf32> to vector<1x1x512xf32>
      %45 = vector.broadcast %44 : vector<1x1x512xf32> to vector<8x8x512xf32>
      %46 = arith.mulf %16, %45 : vector<8x8x512xf32>
      %cst_22 = arith.constant dense<0.000000e+00> : vector<8x8xf32>
      %47 = vector.multi_reduction <add>, %46, %cst_22 [2] : vector<8x8x512xf32> to vector<8x8xf32>
      %48 = vector.extract_strided_slice %17 {offsets = [6, 0], sizes = [1, 512], strides = [1, 1]} : vector<8x512xf32> to vector<1x512xf32>
      %49 = vector.shape_cast %48 : vector<1x512xf32> to vector<1x1x512xf32>
      %50 = vector.broadcast %49 : vector<1x1x512xf32> to vector<8x8x512xf32>
      %51 = arith.mulf %16, %50 : vector<8x8x512xf32>
      %cst_23 = arith.constant dense<0.000000e+00> : vector<8x8xf32>
      %52 = vector.multi_reduction <add>, %51, %cst_23 [2] : vector<8x8x512xf32> to vector<8x8xf32>
      %53 = vector.extract_strided_slice %17 {offsets = [7, 0], sizes = [1, 512], strides = [1, 1]} : vector<8x512xf32> to vector<1x512xf32>
      %54 = vector.shape_cast %53 : vector<1x512xf32> to vector<1x1x512xf32>
      %55 = vector.broadcast %54 : vector<1x1x512xf32> to vector<8x8x512xf32>
      %56 = arith.mulf %16, %55 : vector<8x8x512xf32>
      %cst_24 = arith.constant dense<0.000000e+00> : vector<8x8xf32>
      %57 = vector.multi_reduction <add>, %56, %cst_24 [2] : vector<8x8x512xf32> to vector<8x8xf32>
      %c0_25 = arith.constant 0 : index
      %c0_26 = arith.constant 0 : index
      %58 = vector.load %arg4[%c0_25, %c0_26] : memref<8x128xf32, #tpu.memory_space<vmem>>, vector<8x128xf32>
      %c0_27 = arith.constant 0 : index
      %c0_28 = arith.constant 0 : index
      %59 = vector.load %arg5[%c0_27, %c0_28] : memref<1x128xf32, #tpu.memory_space<vmem>>, vector<1x128xf32>
      %cst_29 = arith.constant dense<0.000000e+00> : vector<8x128xf32>
      %60 = tpu.matmul %22, %58, %cst_29 {dimension_numbers = #tpu.dot_dimension_numbers<[1], [0], [0], [1], [0, 0, 1, 1], [], []>} : vector<8x8xf32>, vector<8x128xf32>, vector<8x128xf32> -> vector<8x128xf32>
      %61 = vector.broadcast %59 : vector<1x128xf32> to vector<8x128xf32>
      %62 = arith.addf %60, %61 : vector<8x128xf32>
      %cst_30 = arith.constant -1.000000e+00 : f32
      %63 = vector.broadcast %cst_30 : f32 to vector<8x128xf32>
      %64 = arith.cmpf ole, %62, %63 : vector<8x128xf32>
      %cst_31 = arith.constant 0.333333343 : f32
      %65 = vector.broadcast %cst_31 : f32 to vector<8x128xf32>
      %66 = arith.addf %62, %65 : vector<8x128xf32>
      %cst_32 = arith.constant 1.000000e+00 : f32
      %67 = vector.broadcast %cst_32 : f32 to vector<8x128xf32>
      %68 = arith.cmpf oge, %62, %67 : vector<8x128xf32>
      %cst_33 = arith.constant 0.333333343 : f32
      %69 = vector.broadcast %cst_33 : f32 to vector<8x128xf32>
      %70 = arith.subf %62, %69 : vector<8x128xf32>
      %71 = arith.mulf %62, %62 : vector<8x128xf32>
      %cst_34 = arith.constant 3.000000e+00 : f32
      %72 = vector.broadcast %cst_34 : f32 to vector<8x128xf32>
      %73 = arith.addf %71, %72 : vector<8x128xf32>
      %74 = arith.mulf %62, %73 : vector<8x128xf32>
      %cst_35 = arith.constant 0.166666672 : f32
      %75 = vector.broadcast %cst_35 : f32 to vector<8x128xf32>
      %76 = arith.mulf %74, %75 : vector<8x128xf32>
      %77 = arith.select %68, %70, %76 : vector<8x128xi1>, vector<8x128xf32>
      %78 = arith.select %64, %66, %77 : vector<8x128xi1>, vector<8x128xf32>
      %79 = arith.truncf %78 : vector<8x128xf32> to vector<8x128xbf16>
      %c0_36 = arith.constant 0 : index
      %c0_37 = arith.constant 0 : index
      %c0_38 = arith.constant 0 : index
      %80 = vector.load %arg11[%c0_36, %c0_37, %c0_38] : memref<2x8x512xbf16, #tpu.memory_space<vmem>>, vector<1x8x128xbf16>
      %81 = vector.shape_cast %80 : vector<1x8x128xbf16> to vector<8x128xbf16>
      %82 = vector.shape_cast %79 : vector<8x128xbf16> to vector<1x8x128xbf16>
      tpu.vector_store %arg11[%c0_36, %c0_37, %c0_38], %82 {strides = array<i32>} : memref<2x8x512xbf16, #tpu.memory_space<vmem>>, vector<1x8x128xbf16>,
      %cst_39 = arith.constant dense<0.000000e+00> : vector<8x128xf32>
      %83 = tpu.matmul %27, %58, %cst_39 {dimension_numbers = #tpu.dot_dimension_numbers<[1], [0], [0], [1], [0, 0, 1, 1], [], []>} : vector<8x8xf32>, vector<8x128xf32>, vector<8x128xf32> -> vector<8x128xf32>
      %84 = vector.broadcast %59 : vector<1x128xf32> to vector<8x128xf32>
      %85 = arith.addf %83, %84 : vector<8x128xf32>
      %cst_40 = arith.constant -1.000000e+00 : f32
      %86 = vector.broadcast %cst_40 : f32 to vector<8x128xf32>
      %87 = arith.cmpf ole, %85, %86 : vector<8x128xf32>
      %cst_41 = arith.constant 0.333333343 : f32
      %88 = vector.broadcast %cst_41 : f32 to vector<8x128xf32>
      %89 = arith.addf %85, %88 : vector<8x128xf32>
      %cst_42 = arith.constant 1.000000e+00 : f32
      %90 = vector.broadcast %cst_42 : f32 to vector<8x128xf32>
      %91 = arith.cmpf oge, %85, %90 : vector<8x128xf32>
      %cst_43 = arith.constant 0.333333343 : f32
      %92 = vector.broadcast %cst_43 : f32 to vector<8x128xf32>
      %93 = arith.subf %85, %92 : vector<8x128xf32>
      %94 = arith.mulf %85, %85 : vector<8x128xf32>
      %cst_44 = arith.constant 3.000000e+00 : f32
      %95 = vector.broadcast %cst_44 : f32 to vector<8x128xf32>
      %96 = arith.addf %94, %95 : vector<8x128xf32>
      %97 = arith.mulf %85, %96 : vector<8x128xf32>
      %cst_45 = arith.constant 0.166666672 : f32
      %98 = vector.broadcast %cst_45 : f32 to vector<8x128xf32>
      %99 = arith.mulf %97, %98 : vector<8x128xf32>
      %100 = arith.select %91, %93, %99 : vector<8x128xi1>, vector<8x128xf32>
      %101 = arith.select %87, %89, %100 : vector<8x128xi1>, vector<8x128xf32>
      %102 = arith.truncf %101 : vector<8x128xf32> to vector<8x128xbf16>
      %c0_46 = arith.constant 0 : index
      %c0_47 = arith.constant 0 : index
      %c128 = arith.constant 128 : index
      %103 = vector.load %arg11[%c0_46, %c0_47, %c128] : memref<2x8x512xbf16, #tpu.memory_space<vmem>>, vector<1x8x128xbf16>
      %104 = vector.shape_cast %103 : vector<1x8x128xbf16> to vector<8x128xbf16>
      %105 = vector.shape_cast %102 : vector<8x128xbf16> to vector<1x8x128xbf16>
      tpu.vector_store %arg11[%c0_46, %c0_47, %c128], %105 {strides = array<i32>} : memref<2x8x512xbf16, #tpu.memory_space<vmem>>, vector<1x8x128xbf16>,
      %cst_48 = arith.constant dense<0.000000e+00> : vector<8x128xf32>
      %106 = tpu.matmul %32, %58, %cst_48 {dimension_numbers = #tpu.dot_dimension_numbers<[1], [0], [0], [1], [0, 0, 1, 1], [], []>} : vector<8x8xf32>, vector<8x128xf32>, vector<8x128xf32> -> vector<8x128xf32>
      %107 = vector.broadcast %59 : vector<1x128xf32> to vector<8x128xf32>
      %108 = arith.addf %106, %107 : vector<8x128xf32>
      %cst_49 = arith.constant -1.000000e+00 : f32
      %109 = vector.broadcast %cst_49 : f32 to vector<8x128xf32>
      %110 = arith.cmpf ole, %108, %109 : vector<8x128xf32>
      %cst_50 = arith.constant 0.333333343 : f32
      %111 = vector.broadcast %cst_50 : f32 to vector<8x128xf32>
      %112 = arith.addf %108, %111 : vector<8x128xf32>
      %cst_51 = arith.constant 1.000000e+00 : f32
      %113 = vector.broadcast %cst_51 : f32 to vector<8x128xf32>
      %114 = arith.cmpf oge, %108, %113 : vector<8x128xf32>
      %cst_52 = arith.constant 0.333333343 : f32
      %115 = vector.broadcast %cst_52 : f32 to vector<8x128xf32>
      %116 = arith.subf %108, %115 : vector<8x128xf32>
      %117 = arith.mulf %108, %108 : vector<8x128xf32>
      %cst_53 = arith.constant 3.000000e+00 : f32
      %118 = vector.broadcast %cst_53 : f32 to vector<8x128xf32>
      %119 = arith.addf %117, %118 : vector<8x128xf32>
      %120 = arith.mulf %108, %119 : vector<8x128xf32>
      %cst_54 = arith.constant 0.166666672 : f32
      %121 = vector.broadcast %cst_54 : f32 to vector<8x128xf32>
      %122 = arith.mulf %120, %121 : vector<8x128xf32>
      %123 = arith.select %114, %116, %122 : vector<8x128xi1>, vector<8x128xf32>
      %124 = arith.select %110, %112, %123 : vector<8x128xi1>, vector<8x128xf32>
      %125 = arith.truncf %124 : vector<8x128xf32> to vector<8x128xbf16>
      %c0_55 = arith.constant 0 : index
      %c0_56 = arith.constant 0 : index
      %c256 = arith.constant 256 : index
      %126 = vector.load %arg11[%c0_55, %c0_56, %c256] : memref<2x8x512xbf16, #tpu.memory_space<vmem>>, vector<1x8x128xbf16>
      %127 = vector.shape_cast %126 : vector<1x8x128xbf16> to vector<8x128xbf16>
      %128 = vector.shape_cast %125 : vector<8x128xbf16> to vector<1x8x128xbf16>
      tpu.vector_store %arg11[%c0_55, %c0_56, %c256], %128 {strides = array<i32>} : memref<2x8x512xbf16, #tpu.memory_space<vmem>>, vector<1x8x128xbf16>,
      %cst_57 = arith.constant dense<0.000000e+00> : vector<8x128xf32>
      %129 = tpu.matmul %37, %58, %cst_57 {dimension_numbers = #tpu.dot_dimension_numbers<[1], [0], [0], [1], [0, 0, 1, 1], [], []>} : vector<8x8xf32>, vector<8x128xf32>, vector<8x128xf32> -> vector<8x128xf32>
      %130 = vector.broadcast %59 : vector<1x128xf32> to vector<8x128xf32>
      %131 = arith.addf %129, %130 : vector<8x128xf32>
      %cst_58 = arith.constant -1.000000e+00 : f32
      %132 = vector.broadcast %cst_58 : f32 to vector<8x128xf32>
      %133 = arith.cmpf ole, %131, %132 : vector<8x128xf32>
      %cst_59 = arith.constant 0.333333343 : f32
      %134 = vector.broadcast %cst_59 : f32 to vector<8x128xf32>
      %135 = arith.addf %131, %134 : vector<8x128xf32>
      %cst_60 = arith.constant 1.000000e+00 : f32
      %136 = vector.broadcast %cst_60 : f32 to vector<8x128xf32>
      %137 = arith.cmpf oge, %131, %136 : vector<8x128xf32>
      %cst_61 = arith.constant 0.333333343 : f32
      %138 = vector.broadcast %cst_61 : f32 to vector<8x128xf32>
      %139 = arith.subf %131, %138 : vector<8x128xf32>
      %140 = arith.mulf %131, %131 : vector<8x128xf32>
      %cst_62 = arith.constant 3.000000e+00 : f32
      %141 = vector.broadcast %cst_62 : f32 to vector<8x128xf32>
      %142 = arith.addf %140, %141 : vector<8x128xf32>
      %143 = arith.mulf %131, %142 : vector<8x128xf32>
      %cst_63 = arith.constant 0.166666672 : f32
      %144 = vector.broadcast %cst_63 : f32 to vector<8x128xf32>
      %145 = arith.mulf %143, %144 : vector<8x128xf32>
      %146 = arith.select %137, %139, %145 : vector<8x128xi1>, vector<8x128xf32>
      %147 = arith.select %133, %135, %146 : vector<8x128xi1>, vector<8x128xf32>
      %148 = arith.truncf %147 : vector<8x128xf32> to vector<8x128xbf16>
      %c0_64 = arith.constant 0 : index
      %c0_65 = arith.constant 0 : index
      %c384 = arith.constant 384 : index
      %149 = vector.load %arg11[%c0_64, %c0_65, %c384] : memref<2x8x512xbf16, #tpu.memory_space<vmem>>, vector<1x8x128xbf16>
      %150 = vector.shape_cast %149 : vector<1x8x128xbf16> to vector<8x128xbf16>
      %151 = vector.shape_cast %148 : vector<8x128xbf16> to vector<1x8x128xbf16>
      tpu.vector_store %arg11[%c0_64, %c0_65, %c384], %151 {strides = array<i32>} : memref<2x8x512xbf16, #tpu.memory_space<vmem>>, vector<1x8x128xbf16>,
      %cst_66 = arith.constant dense<0.000000e+00> : vector<8x128xf32>
      %152 = tpu.matmul %42, %58, %cst_66 {dimension_numbers = #tpu.dot_dimension_numbers<[1], [0], [0], [1], [0, 0, 1, 1], [], []>} : vector<8x8xf32>, vector<8x128xf32>, vector<8x128xf32> -> vector<8x128xf32>
      %153 = vector.broadcast %59 : vector<1x128xf32> to vector<8x128xf32>
      %154 = arith.addf %152, %153 : vector<8x128xf32>
      %cst_67 = arith.constant -1.000000e+00 : f32
      %155 = vector.broadcast %cst_67 : f32 to vector<8x128xf32>
      %156 = arith.cmpf ole, %154, %155 : vector<8x128xf32>
      %cst_68 = arith.constant 0.333333343 : f32
      %157 = vector.broadcast %cst_68 : f32 to vector<8x128xf32>
      %158 = arith.addf %154, %157 : vector<8x128xf32>
      %cst_69 = arith.constant 1.000000e+00 : f32
      %159 = vector.broadcast %cst_69 : f32 to vector<8x128xf32>
      %160 = arith.cmpf oge, %154, %159 : vector<8x128xf32>
      %cst_70 = arith.constant 0.333333343 : f32
      %161 = vector.broadcast %cst_70 : f32 to vector<8x128xf32>
      %162 = arith.subf %154, %161 : vector<8x128xf32>
      %163 = arith.mulf %154, %154 : vector<8x128xf32>
      %cst_71 = arith.constant 3.000000e+00 : f32
      %164 = vector.broadcast %cst_71 : f32 to vector<8x128xf32>
      %165 = arith.addf %163, %164 : vector<8x128xf32>
      %166 = arith.mulf %154, %165 : vector<8x128xf32>
      %cst_72 = arith.constant 0.166666672 : f32
      %167 = vector.broadcast %cst_72 : f32 to vector<8x128xf32>
      %168 = arith.mulf %166, %167 : vector<8x128xf32>
      %169 = arith.select %160, %162, %168 : vector<8x128xi1>, vector<8x128xf32>
      %170 = arith.select %156, %158, %169 : vector<8x128xi1>, vector<8x128xf32>
      %171 = arith.truncf %170 : vector<8x128xf32> to vector<8x128xbf16>
      %c1 = arith.constant 1 : index
      %c0_73 = arith.constant 0 : index
      %c0_74 = arith.constant 0 : index
      %172 = vector.load %arg11[%c1, %c0_73, %c0_74] : memref<2x8x512xbf16, #tpu.memory_space<vmem>>, vector<1x8x128xbf16>
      %173 = vector.shape_cast %172 : vector<1x8x128xbf16> to vector<8x128xbf16>
      %174 = vector.shape_cast %171 : vector<8x128xbf16> to vector<1x8x128xbf16>
      tpu.vector_store %arg11[%c1, %c0_73, %c0_74], %174 {strides = array<i32>} : memref<2x8x512xbf16, #tpu.memory_space<vmem>>, vector<1x8x128xbf16>,
      %cst_75 = arith.constant dense<0.000000e+00> : vector<8x128xf32>
      %175 = tpu.matmul %47, %58, %cst_75 {dimension_numbers = #tpu.dot_dimension_numbers<[1], [0], [0], [1], [0, 0, 1, 1], [], []>} : vector<8x8xf32>, vector<8x128xf32>, vector<8x128xf32> -> vector<8x128xf32>
      %176 = vector.broadcast %59 : vector<1x128xf32> to vector<8x128xf32>
      %177 = arith.addf %175, %176 : vector<8x128xf32>
      %cst_76 = arith.constant -1.000000e+00 : f32
      %178 = vector.broadcast %cst_76 : f32 to vector<8x128xf32>
      %179 = arith.cmpf ole, %177, %178 : vector<8x128xf32>
      %cst_77 = arith.constant 0.333333343 : f32
      %180 = vector.broadcast %cst_77 : f32 to vector<8x128xf32>
      %181 = arith.addf %177, %180 : vector<8x128xf32>
      %cst_78 = arith.constant 1.000000e+00 : f32
      %182 = vector.broadcast %cst_78 : f32 to vector<8x128xf32>
      %183 = arith.cmpf oge, %177, %182 : vector<8x128xf32>
      %cst_79 = arith.constant 0.333333343 : f32
      %184 = vector.broadcast %cst_79 : f32 to vector<8x128xf32>
      %185 = arith.subf %177, %184 : vector<8x128xf32>
      %186 = arith.mulf %177, %177 : vector<8x128xf32>
      %cst_80 = arith.constant 3.000000e+00 : f32
      %187 = vector.broadcast %cst_80 : f32 to vector<8x128xf32>
      %188 = arith.addf %186, %187 : vector<8x128xf32>
      %189 = arith.mulf %177, %188 : vector<8x128xf32>
      %cst_81 = arith.constant 0.166666672 : f32
      %190 = vector.broadcast %cst_81 : f32 to vector<8x128xf32>
      %191 = arith.mulf %189, %190 : vector<8x128xf32>
      %192 = arith.select %183, %185, %191 : vector<8x128xi1>, vector<8x128xf32>
      %193 = arith.select %179, %181, %192 : vector<8x128xi1>, vector<8x128xf32>
      %194 = arith.truncf %193 : vector<8x128xf32> to vector<8x128xbf16>
      %c1_82 = arith.constant 1 : index
      %c0_83 = arith.constant 0 : index
      %c128_84 = arith.constant 128 : index
      %195 = vector.load %arg11[%c1_82, %c0_83, %c128_84] : memref<2x8x512xbf16, #tpu.memory_space<vmem>>, vector<1x8x128xbf16>
      %196 = vector.shape_cast %195 : vector<1x8x128xbf16> to vector<8x128xbf16>
      %197 = vector.shape_cast %194 : vector<8x128xbf16> to vector<1x8x128xbf16>
      tpu.vector_store %arg11[%c1_82, %c0_83, %c128_84], %197 {strides = array<i32>} : memref<2x8x512xbf16, #tpu.memory_space<vmem>>, vector<1x8x128xbf16>,
      %cst_85 = arith.constant dense<0.000000e+00> : vector<8x128xf32>
      %198 = tpu.matmul %52, %58, %cst_85 {dimension_numbers = #tpu.dot_dimension_numbers<[1], [0], [0], [1], [0, 0, 1, 1], [], []>} : vector<8x8xf32>, vector<8x128xf32>, vector<8x128xf32> -> vector<8x128xf32>
      %199 = vector.broadcast %59 : vector<1x128xf32> to vector<8x128xf32>
      %200 = arith.addf %198, %199 : vector<8x128xf32>
      %cst_86 = arith.constant -1.000000e+00 : f32
      %201 = vector.broadcast %cst_86 : f32 to vector<8x128xf32>
      %202 = arith.cmpf ole, %200, %201 : vector<8x128xf32>
      %cst_87 = arith.constant 0.333333343 : f32
      %203 = vector.broadcast %cst_87 : f32 to vector<8x128xf32>
      %204 = arith.addf %200, %203 : vector<8x128xf32>
      %cst_88 = arith.constant 1.000000e+00 : f32
      %205 = vector.broadcast %cst_88 : f32 to vector<8x128xf32>
      %206 = arith.cmpf oge, %200, %205 : vector<8x128xf32>
      %cst_89 = arith.constant 0.333333343 : f32
      %207 = vector.broadcast %cst_89 : f32 to vector<8x128xf32>
      %208 = arith.subf %200, %207 : vector<8x128xf32>
      %209 = arith.mulf %200, %200 : vector<8x128xf32>
      %cst_90 = arith.constant 3.000000e+00 : f32
      %210 = vector.broadcast %cst_90 : f32 to vector<8x128xf32>
      %211 = arith.addf %209, %210 : vector<8x128xf32>
      %212 = arith.mulf %200, %211 : vector<8x128xf32>
      %cst_91 = arith.constant 0.166666672 : f32
      %213 = vector.broadcast %cst_91 : f32 to vector<8x128xf32>
      %214 = arith.mulf %212, %213 : vector<8x128xf32>
      %215 = arith.select %206, %208, %214 : vector<8x128xi1>, vector<8x128xf32>
      %216 = arith.select %202, %204, %215 : vector<8x128xi1>, vector<8x128xf32>
      %217 = arith.truncf %216 : vector<8x128xf32> to vector<8x128xbf16>
      %c1_92 = arith.constant 1 : index
      %c0_93 = arith.constant 0 : index
      %c256_94 = arith.constant 256 : index
      %218 = vector.load %arg11[%c1_92, %c0_93, %c256_94] : memref<2x8x512xbf16, #tpu.memory_space<vmem>>, vector<1x8x128xbf16>
      %219 = vector.shape_cast %218 : vector<1x8x128xbf16> to vector<8x128xbf16>
      %220 = vector.shape_cast %217 : vector<8x128xbf16> to vector<1x8x128xbf16>
      tpu.vector_store %arg11[%c1_92, %c0_93, %c256_94], %220 {strides = array<i32>} : memref<2x8x512xbf16, #tpu.memory_space<vmem>>, vector<1x8x128xbf16>,
      %cst_95 = arith.constant dense<0.000000e+00> : vector<8x128xf32>
      %221 = tpu.matmul %57, %58, %cst_95 {dimension_numbers = #tpu.dot_dimension_numbers<[1], [0], [0], [1], [0, 0, 1, 1], [], []>} : vector<8x8xf32>, vector<8x128xf32>, vector<8x128xf32> -> vector<8x128xf32>
      %222 = vector.broadcast %59 : vector<1x128xf32> to vector<8x128xf32>
      %223 = arith.addf %221, %222 : vector<8x128xf32>
      %cst_96 = arith.constant -1.000000e+00 : f32
      %224 = vector.broadcast %cst_96 : f32 to vector<8x128xf32>
      %225 = arith.cmpf ole, %223, %224 : vector<8x128xf32>
      %cst_97 = arith.constant 0.333333343 : f32
      %226 = vector.broadcast %cst_97 : f32 to vector<8x128xf32>
      %227 = arith.addf %223, %226 : vector<8x128xf32>
      %cst_98 = arith.constant 1.000000e+00 : f32
      %228 = vector.broadcast %cst_98 : f32 to vector<8x128xf32>
      %229 = arith.cmpf oge, %223, %228 : vector<8x128xf32>
      %cst_99 = arith.constant 0.333333343 : f32
      %230 = vector.broadcast %cst_99 : f32 to vector<8x128xf32>
      %231 = arith.subf %223, %230 : vector<8x128xf32>
      %232 = arith.mulf %223, %223 : vector<8x128xf32>
      %cst_100 = arith.constant 3.000000e+00 : f32
      %233 = vector.broadcast %cst_100 : f32 to vector<8x128xf32>
      %234 = arith.addf %232, %233 : vector<8x128xf32>
      %235 = arith.mulf %223, %234 : vector<8x128xf32>
      %cst_101 = arith.constant 0.166666672 : f32
      %236 = vector.broadcast %cst_101 : f32 to vector<8x128xf32>
      %237 = arith.mulf %235, %236 : vector<8x128xf32>
      %238 = arith.select %229, %231, %237 : vector<8x128xi1>, vector<8x128xf32>
      %239 = arith.select %225, %227, %238 : vector<8x128xi1>, vector<8x128xf32>
      %240 = arith.truncf %239 : vector<8x128xf32> to vector<8x128xbf16>
      %c1_102 = arith.constant 1 : index
      %c0_103 = arith.constant 0 : index
      %c384_104 = arith.constant 384 : index
      %241 = vector.load %arg11[%c1_102, %c0_103, %c384_104] : memref<2x8x512xbf16, #tpu.memory_space<vmem>>, vector<1x8x128xbf16>
      %242 = vector.shape_cast %241 : vector<1x8x128xbf16> to vector<8x128xbf16>
      %243 = vector.shape_cast %240 : vector<8x128xbf16> to vector<1x8x128xbf16>
      tpu.vector_store %arg11[%c1_102, %c0_103, %c384_104], %243 {strides = array<i32>} : memref<2x8x512xbf16, #tpu.memory_space<vmem>>, vector<1x8x128xbf16>,
    } else {
    }
    %c0 = arith.constant 0 : index
    %c0_1 = arith.constant 0 : index
    %3 = vector.load %arg12[%c0, %c0_1] : memref<8x1024xf32, #tpu.memory_space<vmem>>, vector<8x1024xf32>
    %4 = arith.index_cast %arg1 : i32 to index
    %c0_2 = arith.constant 0 : index
    %c0_3 = arith.constant 0 : index
    %5 = vector.load %arg11[%4, %c0_2, %c0_3] : memref<2x8x512xbf16, #tpu.memory_space<vmem>>, vector<1x8x512xbf16>
    %6 = vector.shape_cast %5 : vector<1x8x512xbf16> to vector<8x512xbf16>
    %c0_4 = arith.constant 0 : index
    %c0_5 = arith.constant 0 : index
    %7 = vector.load %arg6[%c0_4, %c0_5] : memref<512x1024xbf16, #tpu.memory_space<vmem>>, vector<512x1024xbf16>
    %cst = arith.constant dense<0.000000e+00> : vector<8x1024xf32>
    %8 = tpu.matmul %6, %7, %cst {dimension_numbers = #tpu.dot_dimension_numbers<[1], [0], [0], [1], [0, 0, 1, 1], [], []>} : vector<8x512xbf16>, vector<512x1024xbf16>, vector<8x1024xf32> -> vector<8x1024xf32>
    %9 = arith.addf %3, %8 : vector<8x1024xf32>
    %c0_6 = arith.constant 0 : index
    %c0_7 = arith.constant 0 : index
    %10 = vector.load %arg12[%c0_6, %c0_7] : memref<8x1024xf32, #tpu.memory_space<vmem>>, vector<8x1024xf32>
    tpu.vector_store %arg12[%c0_6, %c0_7], %9 {strides = array<i32>} : memref<8x1024xf32, #tpu.memory_space<vmem>>, vector<8x1024xf32>,
    %c1_i32 = arith.constant 1 : i32
    %11 = arith.cmpi eq, %arg1, %c1_i32 : i32
    %12 = arith.extui %11 : i1 to i32
    %c0_i32_8 = arith.constant 0 : i32
    %13 = arith.cmpi ne, %12, %c0_i32_8 : i32
    scf.if %13 {
      %c0_9 = arith.constant 0 : index
      %c0_10 = arith.constant 0 : index
      %14 = vector.load %arg12[%c0_9, %c0_10] : memref<8x1024xf32, #tpu.memory_space<vmem>>, vector<8x1024xf32>
      %c0_11 = arith.constant 0 : index
      %c0_12 = arith.constant 0 : index
      %15 = vector.load %arg7[%c0_11, %c0_12] : memref<1x1024xf32, #tpu.memory_space<vmem>>, vector<1x1024xf32>
      %16 = vector.broadcast %15 : vector<1x1024xf32> to vector<8x1024xf32>
      %17 = arith.addf %14, %16 : vector<8x1024xf32>
      %cst_13 = arith.constant -1.000000e+00 : f32
      %18 = vector.broadcast %cst_13 : f32 to vector<8x1024xf32>
      %19 = arith.cmpf ole, %17, %18 : vector<8x1024xf32>
      %cst_14 = arith.constant 0.333333343 : f32
      %20 = vector.broadcast %cst_14 : f32 to vector<8x1024xf32>
      %21 = arith.addf %17, %20 : vector<8x1024xf32>
      %cst_15 = arith.constant 1.000000e+00 : f32
      %22 = vector.broadcast %cst_15 : f32 to vector<8x1024xf32>
      %23 = arith.cmpf oge, %17, %22 : vector<8x1024xf32>
      %cst_16 = arith.constant 0.333333343 : f32
      %24 = vector.broadcast %cst_16 : f32 to vector<8x1024xf32>
      %25 = arith.subf %17, %24 : vector<8x1024xf32>
      %26 = arith.mulf %17, %17 : vector<8x1024xf32>
      %cst_17 = arith.constant 3.000000e+00 : f32
      %27 = vector.broadcast %cst_17 : f32 to vector<8x1024xf32>
      %28 = arith.addf %26, %27 : vector<8x1024xf32>
      %29 = arith.mulf %17, %28 : vector<8x1024xf32>
      %cst_18 = arith.constant 0.166666672 : f32
      %30 = vector.broadcast %cst_18 : f32 to vector<8x1024xf32>
      %31 = arith.mulf %29, %30 : vector<8x1024xf32>
      %32 = arith.select %23, %25, %31 : vector<8x1024xi1>, vector<8x1024xf32>
      %33 = arith.select %19, %21, %32 : vector<8x1024xi1>, vector<8x1024xf32>
      %34 = arith.truncf %33 : vector<8x1024xf32> to vector<8x1024xbf16>
      %c0_19 = arith.constant 0 : index
      %c0_20 = arith.constant 0 : index
      %35 = vector.load %arg8[%c0_19, %c0_20] : memref<1024x128xbf16, #tpu.memory_space<vmem>>, vector<1024x128xbf16>
      %cst_21 = arith.constant dense<0.000000e+00> : vector<8x128xf32>
      %36 = tpu.matmul %34, %35, %cst_21 {dimension_numbers = #tpu.dot_dimension_numbers<[1], [0], [0], [1], [0, 0, 1, 1], [], []>} : vector<8x1024xbf16>, vector<1024x128xbf16>, vector<8x128xf32> -> vector<8x128xf32>
      %c0_22 = arith.constant 0 : index
      %c0_23 = arith.constant 0 : index
      %37 = vector.load %arg9[%c0_22, %c0_23] : memref<1x128xf32, #tpu.memory_space<vmem>>, vector<1x128xf32>
      %38 = vector.broadcast %37 : vector<1x128xf32> to vector<8x128xf32>
      %39 = arith.addf %36, %38 : vector<8x128xf32>
      %c0_24 = arith.constant 0 : index
      %c0_25 = arith.constant 0 : index
      %40 = vector.load %arg10[%c0_24, %c0_25] : memref<8x128xf32, #tpu.memory_space<vmem>>, vector<8x128xf32>
      tpu.vector_store %arg10[%c0_24, %c0_25], %39 {strides = array<i32>} : memref<8x128xf32, #tpu.memory_space<vmem>>, vector<8x128xf32>,
    } else {
    }
    return
  }
  func.func @transform_0(%arg0: i32, %arg1: i32) -> (i32, i32, i32) {
    %c0_i32 = arith.constant 0 : i32
    %c0_i32_0 = arith.constant 0 : i32
    %c0_i32_1 = arith.constant 0 : i32
    return %arg0, %c0_i32, %c0_i32_0 : i32, i32, i32
  }
  func.func @transform_1(%arg0: i32, %arg1: i32) -> (i32, i32) {
    %c0_i32 = arith.constant 0 : i32
    %c0_i32_0 = arith.constant 0 : i32
    %c0_i32_1 = arith.constant 0 : i32
    return %c0_i32, %c0_i32_0 : i32, i32
  }
  func.func @transform_2(%arg0: i32, %arg1: i32) -> (i32, i32) {
    %c0_i32 = arith.constant 0 : i32
    %c0_i32_0 = arith.constant 0 : i32
    %c0_i32_1 = arith.constant 0 : i32
    return %c0_i32, %c0_i32_0 : i32, i32
  }
  func.func @transform_3(%arg0: i32, %arg1: i32) -> (i32, i32) {
    %c0_i32 = arith.constant 0 : i32
    %c0_i32_0 = arith.constant 0 : i32
    %c0_i32_1 = arith.constant 0 : i32
    return %c0_i32, %c0_i32_0 : i32, i32
  }
  func.func @transform_4(%arg0: i32, %arg1: i32) -> (i32, i32) {
    %c0_i32 = arith.constant 0 : i32
    %c0_i32_0 = arith.constant 0 : i32
    return %arg1, %c0_i32 : i32, i32
  }
  func.func @transform_5(%arg0: i32, %arg1: i32) -> (i32, i32) {
    %c0_i32 = arith.constant 0 : i32
    %c0_i32_0 = arith.constant 0 : i32
    %c0_i32_1 = arith.constant 0 : i32
    return %c0_i32, %c0_i32_0 : i32, i32
  }
  func.func @transform_6(%arg0: i32, %arg1: i32) -> (i32, i32) {
    %c0_i32 = arith.constant 0 : i32
    %c0_i32_0 = arith.constant 0 : i32
    %c0_i32_1 = arith.constant 0 : i32
    return %c0_i32, %c0_i32_0 : i32, i32
  }
  func.func @transform_7(%arg0: i32, %arg1: i32) -> (i32, i32) {
    %c0_i32 = arith.constant 0 : i32
    %c0_i32_0 = arith.constant 0 : i32
    %c0_i32_1 = arith.constant 0 : i32
    return %c0_i32, %c0_i32_0 : i32, i32
  }
  func.func @transform_8(%arg0: i32, %arg1: i32) -> (i32, i32) {
    %c0_i32 = arith.constant 0 : i32
    %c0_i32_0 = arith.constant 0 : i32
    return %arg0, %c0_i32 : i32, i32
  }
}

</mosaic_0001>

<bundles_post_ra>
// kernel: inception_aux_forward.1
= control target key start
LH: loop header
LB: loop body
LE: loop exit
PB: predicated region body
PF: predicated region fallthrough
CT: control target
= control target key end

     0   :  { %s8424_s0 = inlined_call_operand.vmem [shape: f32[8,8,512], index: 0, kind: input, shape index: {}]   ;;  %s8425_s1 = inlined_call_operand.hbm [shape: f32[8,512], index: 1, kind: input, shape index: {}]   ;;  %s8426_s2 = inlined_call_operand.hbm [shape: f32[8,128], index: 2, kind: input, shape index: {}]   ;;  %s8427_s3 = inlined_call_operand.hbm [shape: f32[1,128], index: 3, kind: input, shape index: {}]   ;;  %s8428_s4 = inlined_call_operand.hbm [shape: bf16[1024,1024], index: 4, kind: input, shape index: {}]   ;;  %s8429_s5 = inlined_call_operand.hbm [shape: f32[1,1024], index: 5, kind: input, shape index: {}]   ;;  %s8430_s6 = inlined_call_operand.hbm [shape: bf16[1024,128], index: 6, kind: input, shape index: {}]   ;;  %s8431_s7 = inlined_call_operand.hbm [shape: f32[1,128], index: 7, kind: input, shape index: {}]   ;;  %s8432_s8 = inlined_call_operand.vmem [shape: f32[8,128], index: 8, kind: output, shape index: {}]  }
   0x1   :  { %8470 = sst [smem:[#allocation38_spill]] %s8425_s1 }
   0x2   :  { %8471 = sst [smem:[#allocation39_spill]] %s8426_s2 }
   0x3   :  { %8472 = sst [smem:[#allocation40_spill]] %s8427_s3 }
   0x4   :  { %13 = vsyncpa [#allocation5], 0 }
   0x5   :  { %14 = vsyncpa [#allocation7], 0 }
   0x6   :  { %15 = vsyncpa [#allocation10], 0 }
   0x7   :  { %17 = vsyncpa [#allocation10 + $0x1], 0 }
   0x8   :  { %18 = vsyncpa [#allocation13], 0  ;;  %s6583_s27 = smov 0   ;;  %s6585_s28 = smov 0  }
   0x9   :  { %s6587_s29 = smov 0   ;;  %s6589_s30 = smov 0  }
   0xa   :  { %s6591_s9 = smov 0   ;;  %s6593_s10 = smov 0  }
   0xb LB: > { %s8473_s2 = sld [smem:[#allocation39_spill]]  ;;  %s8433_s14 = sadd.s32 4294967295, %s6525_s10   ;;  %s6525_s10 = sphi %s6593_s10, %s24_s10   ;;  %s6521_s9 = sphi %s6591_s9, %s8523_s9   ;;  %s6517_s30 = sphi %s6589_s30, %s8522_s30   ;;  %s6513_s29 = sphi %s6587_s29, %s8521_s29   ;;  %s6509_s28 = sphi %s6585_s28, %s8520_s28   ;;  %s6505_s27 = sphi %s6583_s27, %s8519_s27  }
   0xc   : > { %p4471_p0 = scmp.ge.s32.totalorder %s6525_s10, 1  ;;  %p6620_p1 = scmp.eq.s32.totalorder %s8433_s14, 0 }
   0xd   : > { %p245_p2 = scmp.lt.s32.totalorder %s6525_s10, 3  ;;  %s6527_s17 = smov [#allocation6]  }
   0xe   : > { %s281_s18 = sshll.u32 %s6527_s17, 4  ;;  %s303_s21 = sshll.u32 %s8429_s5, 4  ;;  %s282_s18 = int_to_ptr.vmem [resolvable:$true] %s281_s18  ;;  %s304_s21 = int_to_ptr.hbm [resolvable:$true] %s303_s21 }
   0xf   : > { %p6625_p3 = pnand %p4471_p0, %p245_p2  ;;  %s6528_s23 = smov [#allocation11]  }
  0x10   : > { %s305_s24 = sshll.u32 %s6528_s23, 4  ;;  %s314_s11 = sshll.u32 %s8430_s6, 4  ;;  %s306_s24 = int_to_ptr.vmem [resolvable:$true] %s305_s24  ;;  %s315_s11 = int_to_ptr.hbm [resolvable:$true] %s314_s11 }
  0x11   : > { %s279_s13 = sshll.u32 %s8473_s2, 4  ;;  %p6152_p4 = pneg %p6625_p3  ;;  %s280_s13 = int_to_ptr.hbm [resolvable:$true] %s279_s13 }
  0x12   : > { %s6529_s12 = smov [#allocation12]   ;;  %s6530_s19 = smov 64  }
  0x13   : > { %p6636_p5 = pnand %p6152_p4, %p6620_p1  ;;  %s316_s17 = sshll.u32 %s6529_s12, 4  ;;  %s317_s17 = int_to_ptr.vmem [resolvable:$true] %s316_s17 }
  0x14   : > { %s6531_s20 = smov 4   ;;  %s8477_s1 = sld [smem:[#allocation38_spill]] }
  0x15   : > { %6158 = dma.hbm_to_vmem [thread:$0]  (!%p6636_p5), %s280_s13, 128, %s282_s18, [#allocation7]  }
  0x16   : > { %6164 = dma.hbm_to_vmem [thread:$0]  (!%p6636_p5), %s304_s21, 128, %s306_s24, [#allocation10]  }
  0x17   : > { %6167 = dma.hbm_to_vmem [thread:$0]  (!%p6636_p5), %s315_s11, 8192, %s317_s17, [#allocation13], %s6530_s19, %s6530_s19, %s6531_s20  }
  0x18   : > { %s6532_s25 = smov [#allocation4]   ;;  %s8478_s3 = sld [smem:[#allocation40_spill]] }
  0x19   : > { %s269_s26 = sshll.u32 %s6532_s25, 4  ;;  %s329_s11 = sshll.u32 %s8431_s7, 4  ;;  %s270_s26 = int_to_ptr.vmem [resolvable:$true] %s269_s26  ;;  %s330_s11 = int_to_ptr.hbm [resolvable:$true] %s329_s11 }
  0x1a   : > { %s267_s2 = sshll.u32 %s8477_s1, 4  ;;  %s6533_s12 = smov [#allocation8]   ;;  %s268_s2 = int_to_ptr.hbm [resolvable:$true] %s267_s2 }
  0x1b   : > { %6155 = dma.hbm_to_vmem [thread:$0]  (!%p6636_p5), %s268_s2, 512, %s270_s26, [#allocation5]  }
  0x1c   : > { %s293_s17 = sshll.u32 %s6533_s12, 4  ;;  %s6534_s19 = smov [#allocation14]   ;;  %s294_s17 = int_to_ptr.vmem [resolvable:$true] %s293_s17 }
  0x1d   : > { %s331_s20 = sshll.u32 %s6534_s19, 4  ;;  %s33_s2 = sadd.s32 1, %s6521_s9  ;;  %s332_s20 = int_to_ptr.vmem [resolvable:$true] %s331_s20 }
  0x1e   : > { %s291_s21 = sshll.u32 %s8478_s3, 4  ;;  %s132_s23 = sadd.s32 1, %s6513_s29  ;;  %s292_s21 = int_to_ptr.hbm [resolvable:$true] %s291_s21 }
  0x1f   : > { %6161 = dma.hbm_to_vmem [thread:$0]  (!%p6636_p5), %s292_s21, 16, %s294_s17, [#allocation7]  }
  0x20   : > { %6170 = dma.hbm_to_vmem [thread:$0]  (!%p6636_p5), %s330_s11, 16, %s332_s20, [#allocation13]  }
  0x21   : > { %p34_p6 = scmp.ge.s32.totalorder %s33_s2, 2  ;;  %p139_p7 = scmp.ne.s32.totalorder %s6513_s29, %s6509_s28 }
  0x22   : > { %p140_p8 = scmp.eq.s32.totalorder %s6525_s10, 0  ;;  %p145_p9 = scmp.ne.s32.totalorder %s6509_s28, %s6505_s27 }
  0x23   : > { %s8525_s2 = smov (%p34_p6, %s33_s2), 0  ;;  %p6181_p12 = scmp.lt.s32.totalorder %s6525_s10, 2 }
  0x24   : > { %p6673_p10 = por %p140_p8, %p139_p7  ;;  %p6679_p11 = por %p6620_p1, %p145_p9 }
  0x25   : > { %s129_s26 = ssub.s32 %s6521_s9, %s8525_s2  ;;  %s342_s13 = sand.u32 1, %s6525_s10  }
  0x26   : > { %p130_p13 = scmp.eq.s32.totalorder %s129_s26, 0  ;;  %s344_s18 = sand.u32 1, %s6513_s29  }
  0x27   : > { %s4480_s21 = sshll.u32 %s344_s18, 11  ;;  %s5804_s24 = sshll.u32 %s6521_s9, 11 }
  0x28   : > { %s6689_s27 = scalar_select %p130_p13, %s6513_s29, %s132_s23  }
  0x29   : > { %s352_s12 = scalar_lea.hbm %s8428_s4, %s5804_s24  ;;  %s346_s19 = scalar_lea.vmem [#allocation9], %s4480_s21 }
  0x2a   : > { %s353_s17 = sshll.u32 %s352_s12, 4  ;;  %s355_s20 = sshll.u32 %s346_s19, 4  ;;  %s354_s17 = int_to_ptr.hbm [resolvable:$true] %s353_s17  ;;  %s356_s20 = int_to_ptr.vmem [resolvable:$true] %s355_s20 }
  0x2b   : > { %p6172_p0 = pnand %p6181_p12, %p6673_p10  ;;  %s343_s1 = scalar_lea.sflag [#allocation10], %s342_s13 }
  0x2c   : > { %s6535_s26 = smov 512   ;;  %s6536_s3 = smov 32  }
  0x2d   : > { %6174 = dma.hbm_to_vmem [thread:$0]  (!%p6172_p0), %s354_s17, 32768, %s356_s20, %s343_s1, %s6535_s26, %s6535_s26, %s6536_s3  }
  0x2e   : > { %367 = sbr.rel (%p6625_p3) target bundleno = 1152 (0x480), region = 52 }
  0x33   : > { %6484 = dma.done.wait (%p6620_p1), [#allocation5], 512  }
  0x34   : > { %6486 = vsyncadd (%p6620_p1), [#allocation5], 4294966784 }
  0x35   : > { %6488 = dma.done.wait (%p6620_p1), [#allocation7], 144  }
  0x36   : > { %6490 = vsyncadd (%p6620_p1), [#allocation7], 4294967152  ;;  %s8481_s23 = sadd.s32 4294967295, %s6525_s10   ;;  %s386_s3 = sand.u32 1, %s6509_s28  }
  0x37   : > { %s384_s1 = sand.u32 1, %s8481_s23   ;;  %s4488_s16 = sshll.u32 %s386_s3, 11 }
  0x38   : > { %s385_s25 = scalar_lea.sflag [#allocation10], %s384_s1  ;;  %s6712_s13 = scalar_lea.vmem [#allocation9], %s4488_s16 }
  0x39   : > { %6492 = dma.done.wait (%p6679_p11), %s385_s25, 32768  }
  0x3a   : > { %6494 = vsyncadd (%p6679_p11), %s385_s25, 4294934528 }
  0x3b   : > { %6496 = dma.done.wait (%p6620_p1), [#allocation10], 128  }
  0x3c   : > { %6498 = vsyncadd (%p6620_p1), [#allocation10], 4294967168 }
  0x3d   : > { %6500 = dma.done.wait (%p6620_p1), [#allocation13], 8208  }
  0x3e   : > { %6502 = vsyncadd (%p6620_p1), [#allocation13], 4294959088  ;;  %p4492_p2 = scmp.ne.s32.totalorder %s6517_s30, 0 }
  0x40   : > { %457 = sbr.rel (%p4492_p2) target bundleno = 512 (0x200), region = 84 }
  0x45   : > { %v6730_v0 = vld [vmem:[%s8424_s0 + $0x40] sm:$0xff]  ;;  %v6735_v1 = vld [vmem:[%s8424_s0 + $0x48] sm:$0xff]  ;;  %v6740_v2 = vld [vmem:[%s8424_s0 + $0x50] sm:$0xff]  ;;  %vm1133_vm0 = vcmask 1041409   ;;  %vm1135_vm1 = vcmask 1042434   ;;  %vm1137_vm2 = vcmask 1043459  }
  0x46   : > { %8482 = vst [vmem:[#allocation20_spill] sm:$0xff] %v6740_v2  ;;  %v6745_v3 = vld [vmem:[%s8424_s0 + $0x58] sm:$0xff]  ;;  %v6747_v4 = vld [vmem:[#allocation4] sm:$0xff]  ;;  %v6749_v5 = vld [vmem:[#allocation4 + $0x8] sm:$0xff]  ;;  %vm1139_vm3 = vcmask 1044484   ;;  %vm1141_vm4 = vcmask 1045509  }
  0x47   : > { %8483 = vst [vmem:[#allocation21_spill] sm:$0xff] %v6747_v4  ;;  %v6751_v6 = vld [vmem:[#allocation4 + $0x10] sm:$0xff]  ;;  %v6753_v7 = vld [vmem:[#allocation4 + $0x18] sm:$0xff]  ;;  %v6756_v8 = vperm.slane %v6747_v4, 2  ;;  %v6759_v9 = vperm.slane %v6749_v5, 2  ;;  %v6764_v10 = vld [vmem:[%s8424_s0] sm:$0xff] }
  0x48   : > { %8484 = vst [vmem:[#allocation22_spill] sm:$0xff] %v6749_v5  ;;  %v6767_v11 = vperm.slane %v6747_v4, 3  ;;  %v6770_v12 = vperm.slane %v6751_v6, 2  ;;  %v6773_v13 = vperm.slane %v6753_v7, 2  ;;  %v6778_v14 = vld [vmem:[%s8424_s0 + $0x8] sm:$0xff]  ;;  %v6783_v15 = vld [vmem:[%s8424_s0 + $0x10] sm:$0xff] }
  0x49   : > { %8485 = vst [vmem:[#allocation23_spill] sm:$0xff] %v6751_v6  ;;  %v6788_v16 = vld [vmem:[%s8424_s0 + $0x18] sm:$0xff]  ;;  %v6791_v17 = vperm.slane %v6749_v5, 3  ;;  %v666_v18 = vmul.f32 %v6756_v8, %v6730_v0  ;;  %v667_v19 = vmul.f32 %v6759_v9, %v6735_v1  ;;  %v6798_v20 = vperm.slane %v6751_v6, 3  ;;  %v6820_v30 = vld [vmem:[%s8424_s0 + $0x20] sm:$0xff]  ;;  %v6831_v35 = vld [vmem:[%s8424_s0 + $0x28] sm:$0xff] }
  0x4a   : > { %8486 = vst [vmem:[#allocation24_spill] sm:$0xff] %v6753_v7  ;;  %v6801_v21 = vperm.slane %v6753_v7, 3  ;;  %v668_v22 = vmul.f32 %v6770_v12, %v6740_v2  ;;  %v669_v23 = vmul.f32 %v6773_v13, %v6745_v3  ;;  %v734_v24 = vmul.f32 %v6767_v11, %v6764_v10  ;;  %v6836_v36 = vld [vmem:[%s8424_s0 + $0x30] sm:$0xff]  ;;  %v6847_v41 = vld [vmem:[%s8424_s0 + $0x38] sm:$0xff]  ;;  %v6860_v50 = vld [vmem:[%s8424_s0 + $0x80] sm:$0xff] }
  0x4b   : > { %8487 = vst [vmem:[#allocation25_spill] sm:$0xff] %v6764_v10  ;;  %v735_v25 = vmul.f32 %v6791_v17, %v6778_v14  ;;  %v700_v26 = vadd.f32 %v667_v19, %v666_v18  ;;  %v736_v27 = vmul.f32 %v6798_v20, %v6783_v15  ;;  %v658_v29 = vmul.f32 %v6756_v8, %v6764_v10  ;;  %v6865_v51 = vld [vmem:[%s8424_s0 + $0x88] sm:$0xff]  ;;  %v6878_v60 = vld [vmem:[%s8424_s0 + $0x60] sm:$0xff]  ;;  %v6888_v63 = vld [vmem:[%s8424_s0 + $0x90] sm:$0xff] }
  0x4c   : > { %8488 = vst [vmem:[#allocation26_spill] sm:$0xff] %v6778_v14  ;;  %v737_v28 = vmul.f32 %v6801_v21, %v6788_v16  ;;  %v659_v32 = vmul.f32 %v6759_v9, %v6778_v14  ;;  %v660_v33 = vmul.f32 %v6770_v12, %v6783_v15  ;;  %v661_v34 = vmul.f32 %v6773_v13, %v6788_v16  ;;  %v6883_v61 = vld [vmem:[%s8424_s0 + $0x68] sm:$0xff] }
  0x4d   : > { %8489 = vst [vmem:[#allocation27_spill] sm:$0xff] %v6783_v15  ;;  %v766_v31 = vadd.f32 %v735_v25, %v734_v24  ;;  %v701_v37 = vadd.f32 %v700_v26, %v668_v22  ;;  %v742_v38 = vmul.f32 %v6767_v11, %v6730_v0  ;;  %v743_v39 = vmul.f32 %v6791_v17, %v6735_v1  ;;  %v6897_v24 = vld [vmem:[%s8424_s0 + $0x70] sm:$0xff] }
  0x4e   : > { %8490 = vst [vmem:[#allocation28_spill] sm:$0xff] %v6788_v16  ;;  %v744_v40 = vmul.f32 %v6798_v20, %v6740_v2  ;;  %v690_v43 = vadd.f32 %v659_v32, %v658_v29  ;;  %v745_v44 = vmul.f32 %v6801_v21, %v6745_v3  ;;  %v738_v45 = vmul.f32 %v6767_v11, %v6820_v30  ;;  %v6908_v29 = vld [vmem:[%s8424_s0 + $0xa0] sm:$0xff] }
  0x4f   : > { %8491 = vst [vmem:[#allocation29_spill] sm:$0xff] %v6820_v30  ;;  %v767_v42 = vadd.f32 %v766_v31, %v736_v27  ;;  %v702_v46 = vadd.f32 %v701_v37, %v669_v23  ;;  %v776_v47 = vadd.f32 %v743_v39, %v742_v38  ;;  %v739_v48 = vmul.f32 %v6791_v17, %v6831_v35  ;;  %v6915_v37 = vld [vmem:[%s8424_s0 + $0xa8] sm:$0xff]  ;;  %v6920_v38 = vld [vmem:[%s8424_s0 + $0x98] sm:$0xff] }
  0x50   : > { %8492 = vst [vmem:[#allocation30_spill] sm:$0xff] %v6831_v35  ;;  %v740_v49 = vmul.f32 %v6798_v20, %v6836_v36  ;;  %v691_v53 = vadd.f32 %v690_v43, %v660_v33  ;;  %v741_v54 = vmul.f32 %v6801_v21, %v6847_v41  ;;  %v662_v55 = vmul.f32 %v6756_v8, %v6820_v30 }
  0x51   : > { %8493 = vst [vmem:[#allocation31_spill] sm:$0xff] %v6836_v36  ;;  %v768_v52 = vadd.f32 %v767_v42, %v737_v28  ;;  %703 = vadd.xlane.f32.xlu2 %v702_v46  ;;  %v777_v56 = vadd.f32 %v776_v47, %v744_v40  ;;  %v771_v57 = vadd.f32 %v739_v48, %v738_v45  ;;  %vm1143_vm5 = vcmask 1046534  }
  0x52   : > { %v663_v58 = vmul.f32 %v6759_v9, %v6831_v35  ;;  %v664_v59 = vmul.f32 %v6770_v12, %v6836_v36  ;;  %v692_v62 = vadd.f32 %v691_v53, %v661_v34  ;;  %v674_v18 = vmul.f32 %v6756_v8, %v6860_v50  ;;  %8494 = vst [vmem:[#allocation32_spill] sm:$0xff] %v6908_v29 }
  0x53   : > { %769 = vadd.xlane.f32.xlu1 %v768_v52  ;;  %v675_v19 = vmul.f32 %v6759_v9, %v6865_v51  ;;  %v772_v22 = vadd.f32 %v771_v57, %v740_v49  ;;  %v778_v25 = vadd.f32 %v777_v56, %v745_v44  ;;  %v665_v26 = vmul.f32 %v6773_v13, %v6847_v41  ;;  %v6931_v44 = vld [vmem:[%s8424_s0 + $0x78] sm:$0xff]  ;;  %v6940_v49 = vld [vmem:[%s8424_s0 + $0xb0] sm:$0xff] }
  0x54   : > { %v695_v23 = vadd.f32 %v663_v58, %v662_v55  ;;  %693 = vadd.xlane.f32.xlu0 %v692_v62  ;;  %v746_v27 = vmul.f32 %v6767_v11, %v6878_v60  ;;  %v747_v28 = vmul.f32 %v6791_v17, %v6883_v61  ;;  %v676_v33 = vmul.f32 %v6770_v12, %v6888_v63 }
  0x55   : > { %v773_v31 = vadd.f32 %v772_v22, %v741_v54  ;;  %v710_v34 = vadd.f32 %v675_v19, %v674_v18  ;;  %8495 = vst [vmem:[#allocation33_spill] sm:$0xff] %v6915_v37  ;;  %v748_v39 = vmul.f32 %v6798_v20, %v6897_v24  ;;  %v670_v42 = vmul.f32 %v6756_v8, %v6878_v60  ;;  %v6959_v22 = vld [vmem:[%s8424_s0 + $0xb8] sm:$0xff] }
  0x56   : > { %v696_v32 = vadd.f32 %v695_v23, %v664_v59  ;;  %8496 = vst [vmem:[#allocation34_spill] sm:$0xff] %v6920_v38  ;;  %v781_v40 = vadd.f32 %v747_v28, %v746_v27  ;;  %v671_v43 = vmul.f32 %v6759_v9, %v6883_v61  ;;  %v672_v45 = vmul.f32 %v6770_v12, %v6897_v24 }
  0x57   : > { %v754_v46 = vmul.f32 %v6767_v11, %v6908_v29  ;;  %8497 = vst [vmem:[#allocation35_spill] sm:$0xff] %v6940_v49  ;;  %v755_v52 = vmul.f32 %v6791_v17, %v6915_v37  ;;  %v677_v53 = vmul.f32 %v6773_v13, %v6920_v38  ;;  %v711_v54 = vadd.f32 %v710_v34, %v676_v33 }
  0x58   : > { %v697_v47 = vadd.f32 %v696_v32, %v665_v26  ;;  %v705_v48 = vadd.f32 %v671_v43, %v670_v42  ;;  %v678_v55 = vmul.f32 %v6756_v8, %v6908_v29  ;;  %v679_v56 = vmul.f32 %v6759_v9, %v6915_v37  ;;  %8498 = vst [vmem:[#allocation36_spill] sm:$0xff] %v6959_v22 }
  0x59   : > { %779 = vadd.xlane.f32.xlu2 %v778_v25  ;;  %v749_v57 = vmul.f32 %v6801_v21, %v6931_v44  ;;  %v782_v58 = vadd.f32 %v781_v40, %v748_v39  ;;  %v673_v59 = vmul.f32 %v6773_v13, %v6931_v44  ;;  %v756_v18 = vmul.f32 %v6798_v20, %v6940_v49  ;;  %v6972_v39 = vld [vmem:[%s8424_s0 + $0xc0] sm:$0xff]  ;;  %v6977_v40 = vld [vmem:[%s8424_s0 + $0xc8] sm:$0xff] }
  0x5a   : > { %v706_v62 = vadd.f32 %v705_v48, %v672_v45  ;;  %v791_v19 = vadd.f32 %v755_v52, %v754_v46  ;;  %v750_v23 = vmul.f32 %v6767_v11, %v6860_v50  ;;  %v751_v25 = vmul.f32 %v6791_v17, %v6865_v51 }
  0x5b   : > { %774 = vadd.xlane.f32.xlu1 %v773_v31  ;;  %v712_v26 = vadd.f32 %v711_v54, %v677_v53  ;;  %v680_v27 = vmul.f32 %v6770_v12, %v6940_v49  ;;  %v715_v28 = vadd.f32 %v679_v56, %v678_v55  ;;  %v783_v31 = vadd.f32 %v782_v58, %v749_v57 }
  0x5c   : > { %698 = vadd.xlane.f32.xlu0 %v697_v47  ;;  %v707_v32 = vadd.f32 %v706_v62, %v673_v59  ;;  %v757_v33 = vmul.f32 %v6801_v21, %v6959_v22  ;;  %v792_v34 = vadd.f32 %v791_v19, %v756_v18  ;;  %v752_v42 = vmul.f32 %v6798_v20, %v6888_v63  ;;  %v7005_v59 = vld [vmem:[%s8424_s0 + $0xd0] sm:$0xff] }
  0x5d   : > { %v786_v43 = vadd.f32 %v751_v25, %v750_v23  ;;  %v6982_v45 = vperm.slane %v6747_v4, 0  ;;  %v6985_v46 = vperm.slane %v6749_v5, 0  ;;  %v681_v47 = vmul.f32 %v6773_v13, %v6959_v22  ;;  %8499 = vst [vmem:[#allocation37_spill] sm:$0xff] %v7005_v59 }
  0x5e   : > { %v716_v48 = vadd.f32 %v715_v28, %v680_v27  ;;  %v6990_v52 = vperm.slane %v6751_v6, 0  ;;  %v758_v53 = vmul.f32 %v6767_v11, %v6972_v39  ;;  %v759_v54 = vmul.f32 %v6791_v17, %v6977_v40 }
  0x5f   : > { %v506_v55 = vmul.f32 %v6982_v45, %v6764_v10  ;;  %v507_v56 = vmul.f32 %v6985_v46, %v6778_v14  ;;  %v793_v57 = vadd.f32 %v792_v34, %v757_v33  ;;  %v753_v58 = vmul.f32 %v6801_v21, %v6920_v38  ;;  %v7027_v34 = vld [vmem:[%s8424_s0 + $0xd8] sm:$0xff] }
  0x60   : > { %v787_v62 = vadd.f32 %v786_v43, %v752_v42  ;;  %v682_v18 = vmul.f32 %v6756_v8, %v6972_v39  ;;  %v683_v19 = vmul.f32 %v6759_v9, %v6977_v40  ;;  %v7012_v23 = vperm.slane %v6753_v7, 0 }
  0x61   : > { %713 = vadd.xlane.f32.xlu2 %v712_v26  ;;  %v508_v25 = vmul.f32 %v6990_v52, %v6783_v15  ;;  %v538_v26 = vadd.f32 %v507_v56, %v506_v55  ;;  %v7017_v27 = vperm.slane %v6747_v4, 1  ;;  %v7020_v28 = vperm.slane %v6749_v5, 1 }
  0x62   : > { %v796_v33 = vadd.f32 %v759_v54, %v758_v53  ;;  %v788_v42 = vadd.f32 %v787_v62, %v753_v58  ;;  %v684_v43 = vmul.f32 %v6770_v12, %v7005_v59  ;;  %v720_v55 = vadd.f32 %v683_v19, %v682_v18 }
  0x63   : > { %784 = vadd.xlane.f32.xlu1 %v783_v31  ;;  %v717_v31 = vadd.f32 %v716_v48, %v681_v47  ;;  %v509_v56 = vmul.f32 %v7012_v23, %v6788_v16  ;;  %v539_v22 = vadd.f32 %v538_v26, %v508_v25  ;;  %v7034_v47 = vperm.slane %v6751_v6, 1 }
  0x64   : > { %708 = vadd.xlane.f32.xlu0 %v707_v32  ;;  %v760_v32 = vmul.f32 %v6798_v20, %v7005_v59  ;;  %v586_v48 = vmul.f32 %v7017_v27, %v6820_v30  ;;  %v587_v53 = vmul.f32 %v7020_v28, %v6831_v35  ;;  %v761_v54 = vmul.f32 %v6801_v21, %v7027_v34 }
  0x65   : > { %v582_v62 = vmul.f32 %v7017_v27, %v6764_v10  ;;  %v510_v18 = vmul.f32 %v6982_v45, %v6820_v30  ;;  %v511_v19 = vmul.f32 %v6985_v46, %v6831_v35  ;;  %v685_v25 = vmul.f32 %v6773_v13, %v7027_v34 }
  0x66   : > { %v797_v58 = vadd.f32 %v796_v33, %v760_v32  ;;  %v721_v26 = vadd.f32 %v720_v55, %v684_v43  ;;  %v7053_v32 = vperm.slane %v6753_v7, 1  ;;  %v588_v33 = vmul.f32 %v7034_v47, %v6836_v36  ;;  %v7069_v43 = vld [vmem:[%s8424_s0 + $0xe8] sm:$0xff] }
  0x67   : > { %v619_v49 = vadd.f32 %v587_v53, %v586_v48  ;;  %v584_v29 = vmul.f32 %v7034_v47, %v6783_v15  ;;  %v543_v59 = vadd.f32 %v511_v19, %v510_v18  ;;  %v515_v48 = vmul.f32 %v6985_v46, %v6735_v1 }
  0x68   : > { %v798_v37 = vadd.f32 %v797_v58, %v761_v54  ;;  %v722_v55 = vadd.f32 %v721_v26, %v685_v25  ;;  %v589_v53 = vmul.f32 %v7053_v32, %v6847_v41  ;;  %v585_v58 = vmul.f32 %v7053_v32, %v6788_v16  ;;  %v7088_v26 = vld [vmem:[%s8424_s0 + $0xf0] sm:$0xff] }
  0x69   : > { %794 = vadd.xlane.f32.xlu2 %v793_v57  ;;  %v583_v57 = vmul.f32 %v7020_v28, %v6778_v14  ;;  %v620_v54 = vadd.f32 %v619_v49, %v588_v33  ;;  %v763_v18 = vmul.f32 %v6791_v17, %v7069_v43  ;;  %v513_v19 = vmul.f32 %v7012_v23, %v6847_v41 }
  0x6a   : > { %vm1145_vm6 = vcmask 1047559   ;;  %vm1147_vm7 = vcmask 64512  }
  0x6b   : > { %718 = vadd.xlane.f32.xlu1 %v717_v31  ;;  %v540_v31 = vadd.f32 %v539_v22, %v509_v56  ;;  %v614_v38 = vadd.f32 %v583_v57, %v582_v62  ;;  %v7064_v22 = vld [vmem:[%s8424_s0 + $0xe0] sm:$0xff]  ;;  %v514_v56 = vmul.f32 %v6982_v45, %v6730_v0 }
  0x6c   : > { %789 = vadd.xlane.f32.xlu0 %v788_v42  ;;  %v512_v42 = vmul.f32 %v6990_v52, %v6836_v36  ;;  %v762_v57 = vmul.f32 %v6767_v11, %v7064_v22  ;;  %v516_v11 = vmul.f32 %v6990_v52, %v6740_v2 }
  0x6d   : > { %v615_v62 = vadd.f32 %v614_v38, %v584_v29  ;;  %v687_v29 = vmul.f32 %v6759_v9, %v7069_v43  ;;  %v548_v17 = vadd.f32 %v515_v48, %v514_v56  ;;  %v621_v38 = vadd.f32 %v620_v54, %v589_v53 }
  0x6e   : > { %v544_v25 = vadd.f32 %v543_v59, %v512_v42  ;;  %v764_v59 = vmul.f32 %v6798_v20, %v7088_v26  ;;  %v7101_v42 = vld [vmem:[%s8424_s0 + $0xf8] sm:$0xff]  ;;  %v518_v48 = vmul.f32 %v6982_v45, %v6878_v60  ;;  %v519_v20 = vmul.f32 %v6985_v46, %v6883_v61 }
  0x6f   : > { %v616_v49 = vadd.f32 %v615_v62, %v585_v58  ;;  %v549_v56 = vadd.f32 %v548_v17, %v516_v11  ;;  %v594_v53 = vmul.f32 %v7017_v27, %v6878_v60  ;;  %v595_v54 = vmul.f32 %v7020_v28, %v6883_v61 }
  0x70   : > { %v545_v33 = vadd.f32 %v544_v25, %v513_v19  ;;  %v689_v62 = vmul.f32 %v6773_v13, %v7101_v42  ;;  %v591_v19 = vmul.f32 %v7020_v28, %v6735_v1  ;;  %v7128_v17 = vperm.slane %v6747_v4, 7 }
  0x71   : > { %541 = vadd.xlane.f32.xlu2 %v540_v31  ;;  %v801_v31 = vadd.f32 %v763_v18, %v762_v57  ;;  %v590_v18 = vmul.f32 %v7017_v27, %v6730_v0  ;;  %v629_v11 = vadd.f32 %v595_v54, %v594_v53  ;;  %v7131_v13 = vperm.slane %v6749_v5, 7 }
  0x72   : > { %v7149_v53 = vperm.slane %v6751_v6, 7  ;;  %v1038_v54 = vmul.f32 %v7128_v17, %v6764_v10 }
  0x73   : > { %799 = vadd.xlane.f32.xlu1 %v798_v37  ;;  %v686_v37 = vmul.f32 %v6756_v8, %v7064_v22  ;;  %v688_v8 = vmul.f32 %v6770_v12, %v7088_v26  ;;  %v765_v12 = vmul.f32 %v6801_v21, %v7101_v42  ;;  %v802_v58 = vadd.f32 %v801_v31, %v764_v59 }
  0x74   : > { %723 = vadd.xlane.f32.xlu0 %v722_v55  ;;  %v517_v55 = vmul.f32 %v7012_v23, %v6745_v3  ;;  %v596_v21 = vmul.f32 %v7034_v47, %v6897_v24  ;;  %v7137_v59 = vperm.slane %v6749_v5, 6 }
  0x75   : > { %v725_v9 = vadd.f32 %v687_v29, %v686_v37  ;;  %v520_v37 = vmul.f32 %v6990_v52, %v6897_v24  ;;  %v553_v29 = vadd.f32 %v519_v20, %v518_v48  ;;  %v7146_v48 = vperm.slane %v6751_v6, 6 }
  0x76   : > { %v550_v25 = vadd.f32 %v549_v56, %v517_v55  ;;  %v597_v56 = vmul.f32 %v7053_v32, %v6931_v44  ;;  %v630_v20 = vadd.f32 %v629_v11, %v596_v21  ;;  %v7169_v11 = vperm.slane %v6753_v7, 7 }
  0x77   : > { %v726_v57 = vadd.f32 %v725_v9, %v688_v8  ;;  %v624_v8 = vadd.f32 %v591_v19, %v590_v18  ;;  %v521_v9 = vmul.f32 %v7012_v23, %v6931_v44  ;;  %v554_v55 = vadd.f32 %v553_v29, %v520_v37 }
  0x78   : > { %v967_v18 = vmul.f32 %v7137_v59, %v6831_v35  ;;  %v593_v19 = vmul.f32 %v7053_v32, %v6745_v3  ;;  %v7166_v29 = vperm.slane %v6753_v7, 6  ;;  %v631_v21 = vadd.f32 %v630_v20, %v597_v56 }
  0x79   : > { %622 = vadd.xlane.f32.xlu2 %v621_v38  ;;  %v803_v38 = vadd.f32 %v802_v58, %v765_v12  ;;  %v727_v31 = vadd.f32 %v726_v57, %v689_v62  ;;  %v1039_v12 = vmul.f32 %v7131_v13, %v6778_v14  ;;  %v963_v62 = vmul.f32 %v7137_v59, %v6778_v14 }
  0x7a   : > { %v555_v37 = vadd.f32 %v554_v55, %v521_v9  ;;  %v968_v6 = vmul.f32 %v7146_v48, %v6836_v36  ;;  %v1043_v9 = vmul.f32 %v7131_v13, %v6831_v35  ;;  %v522_v55 = vmul.f32 %v6982_v45, %v6860_v50 }
  0x7b   : > { %617 = vadd.xlane.f32.xlu1 %v616_v49  ;;  %v7134_v49 = vperm.slane %v6747_v4, 6  ;;  %v1070_v14 = vadd.f32 %v1039_v12, %v1038_v54  ;;  %v523_v56 = vmul.f32 %v6985_v46, %v6865_v51  ;;  %v598_v54 = vmul.f32 %v7017_v27, %v6860_v50 }
  0x7c   : > { %546 = vadd.xlane.f32.xlu0 %v545_v33  ;;  %v592_v33 = vmul.f32 %v7034_v47, %v6740_v2  ;;  %v599_v12 = vmul.f32 %v7020_v28, %v6865_v51 }
  0x7d   : > { %v962_v58 = vmul.f32 %v7134_v49, %v6764_v10  ;;  %v966_v57 = vmul.f32 %v7134_v49, %v6820_v30  ;;  %v964_v10 = vmul.f32 %v7146_v48, %v6783_v15  ;;  %v558_v35 = vadd.f32 %v523_v56, %v522_v55  ;;  %v8501_v56 = vld [vmem:[#allocation34_spill] sm:$0xff] }
  0x7e   : > { %v1045_v55 = vmul.f32 %v7169_v11, %v6847_v41 }
  0x81   : > { %551 = vadd.xlane.f32.xlu2 %v550_v25  ;;  %v625_v25 = vadd.f32 %v624_v8, %v592_v33  ;;  %v999_v33 = vadd.f32 %v967_v18, %v966_v57  ;;  %v1042_v8 = vmul.f32 %v7128_v17, %v6820_v30  ;;  %v600_v30 = vmul.f32 %v7034_v47, %v6888_v63 }
  0x83   : > { %804 = vadd.xlane.f32.xlu1 %v803_v38  ;;  %v1040_v38 = vmul.f32 %v7149_v53, %v6783_v15  ;;  %v626_v20 = vadd.f32 %v625_v25, %v593_v19  ;;  %v969_v15 = vmul.f32 %v7166_v29, %v6847_v41  ;;  %v1000_v19 = vadd.f32 %v999_v33, %v968_v6  ;;  %v8500_v6 = vld [vmem:[#allocation37_spill] sm:$0xff] }
  0x84   : > { %728 = vadd.xlane.f32.xlu0 %v727_v31  ;;  %v994_v31 = vadd.f32 %v963_v62, %v962_v58  ;;  %v965_v58 = vmul.f32 %v7166_v29, %v6788_v16  ;;  %v1041_v62 = vmul.f32 %v7169_v11, %v6788_v16  ;;  %v1044_v25 = vmul.f32 %v7149_v53, %v6836_v36 }
  0x85   : > { %v1071_v57 = vadd.f32 %v1070_v14, %v1040_v38  ;;  %v1075_v7 = vadd.f32 %v1043_v9, %v1042_v8  ;;  %v634_v16 = vadd.f32 %v599_v12, %v598_v54  ;;  %v531_v14 = vmul.f32 %v6985_v46, %v6977_v40 }
  0x86   : > { %v995_v18 = vadd.f32 %v994_v31, %v964_v10  ;;  %v530_v10 = vmul.f32 %v6982_v45, %v6972_v39  ;;  %v1001_v31 = vadd.f32 %v1000_v19, %v969_v15  ;;  %v533_v33 = vmul.f32 %v7012_v23, %v7027_v34  ;;  %v8502_v15 = vld [vmem:[#allocation32_spill] sm:$0xff] }
  0x87   : > { %v1072_v38 = vadd.f32 %v1071_v57, %v1041_v62  ;;  %v601_v54 = vmul.f32 %v7053_v32, %v8501_v56  ;;  %v1076_v12 = vadd.f32 %v1075_v7, %v1044_v25  ;;  %v635_v5 = vadd.f32 %v634_v16, %v600_v30  ;;  %v8503_v57 = vld [vmem:[#allocation33_spill] sm:$0xff] }
  0x88   : > { %v568_v8 = vadd.f32 %v531_v14, %v530_v10  ;;  %v996_v9 = vadd.f32 %v995_v18, %v965_v58  ;;  %v526_v62 = vmul.f32 %v6982_v45, %v8502_v15  ;;  %v527_v58 = vmul.f32 %v6985_v46, %v8503_v57 }
  0x89   : > { %632 = vadd.xlane.f32.xlu2 %v631_v21  ;;  %v524_v21 = vmul.f32 %v6990_v52, %v6888_v63  ;;  %v1046_v18 = vmul.f32 %v7128_v17, %v6730_v0  ;;  %v1047_v19 = vmul.f32 %v7131_v13, %v6735_v1  ;;  %v970_v7 = vmul.f32 %v7134_v49, %v6730_v0 }
  0x8a   : > { %v971_v16 = vmul.f32 %v7137_v59, %v6735_v1  ;;  %v972_v30 = vmul.f32 %v7146_v48, %v6740_v2  ;;  %v1048_v14 = vmul.f32 %v7149_v53, %v6740_v2 }
  0x8b   : > { %556 = vadd.xlane.f32.xlu1 %v555_v37  ;;  %v532_v37 = vmul.f32 %v6990_v52, %v8500_v6  ;;  %v559_v36 = vadd.f32 %v558_v35, %v524_v21  ;;  %v1077_v35 = vadd.f32 %v1076_v12, %v1045_v55  ;;  %v636_v21 = vadd.f32 %v635_v5, %v601_v54  ;;  %v8505_v12 = vld [vmem:[#allocation36_spill] sm:$0xff] }
  0x8c   : > { %627 = vadd.xlane.f32.xlu0 %v626_v20  ;;  %v525_v20 = vmul.f32 %v7012_v23, %v8501_v56  ;;  %v610_v5 = vmul.f32 %v7017_v27, %v7064_v22  ;;  %v1004_v55 = vadd.f32 %v971_v16, %v970_v7  ;;  %v1051_v7 = vmul.f32 %v7131_v13, %v6883_v61 }
  0x8d   : > { %v569_v4 = vadd.f32 %v568_v8, %v532_v37  ;;  %v8504_v37 = vld [vmem:[#allocation35_spill] sm:$0xff]  ;;  %v1080_v8 = vadd.f32 %v1047_v19, %v1046_v18  ;;  %v1050_v19 = vmul.f32 %v7128_v17, %v6878_v60 }
  0x8e   : > { %v560_v25 = vadd.f32 %v559_v36, %v525_v20  ;;  %v611_v36 = vmul.f32 %v7020_v28, %v7069_v43  ;;  %v1049_v20 = vmul.f32 %v7169_v11, %v6745_v3 }
  0x8f   : > { %v7223_v10 = vadd.f32 %v569_v4, %v533_v33  ;;  %v528_v4 = vmul.f32 %v6990_v52, %v8504_v37  ;;  %v535_v33 = vmul.f32 %v6985_v46, %v7069_v43  ;;  %v529_v46 = vmul.f32 %v7012_v23, %v8505_v12 }
  0x91   : > { %1073 = vadd.xlane.f32.xlu2 %v1072_v38  ;;  %v563_v38 = vadd.f32 %v527_v58, %v526_v62  ;;  %v613_v62 = vmul.f32 %v7053_v32, %v7101_v42  ;;  %v649_v58 = vadd.f32 %v611_v36, %v610_v5  ;;  %v602_v5 = vmul.f32 %v7017_v27, %v8502_v15 }
  0x92   : > { %v1085_v36 = vadd.f32 %v1051_v7, %v1050_v19  ;;  %v606_v19 = vmul.f32 %v7017_v27, %v6972_v39  ;;  %v607_v7 = vmul.f32 %v7020_v28, %v6977_v40  ;;  %v981_v27 = vmul.f32 %v7166_v29, %v8501_v56 }
  0x93   : > { %1002 = vadd.xlane.f32.xlu1 %v1001_v31  ;;  %v534_v31 = vmul.f32 %v6982_v45, %v7064_v22  ;;  %v612_v45 = vmul.f32 %v7034_v47, %v7088_v26  ;;  %v564_v18 = vadd.f32 %v563_v38, %v528_v4  ;;  %v1005_v38 = vadd.f32 %v1004_v55, %v972_v30 }
  0x94   : > { %997 = vadd.xlane.f32.xlu0 %v996_v9  ;;  %v536_v9 = vmul.f32 %v6990_v52, %v7088_v26  ;;  %v537_v52 = vmul.f32 %v7012_v23, %v7101_v42  ;;  %v975_v23 = vmul.f32 %v7137_v59, %v6883_v61  ;;  %v604_v30 = vmul.f32 %v7034_v47, %v8504_v37 }
  0x95   : > { %v573_v54 = vadd.f32 %v535_v33, %v534_v31  ;;  %v1081_v31 = vadd.f32 %v1080_v8, %v1048_v14  ;;  %v974_v33 = vmul.f32 %v7134_v49, %v6878_v60  ;;  %v650_v2 = vadd.f32 %v649_v58, %v612_v45 }
  0x96   : > { %v565_v8 = vadd.f32 %v564_v18, %v529_v46  ;;  %v976_v45 = vmul.f32 %v7146_v48, %v6897_v24  ;;  %v978_v46 = vmul.f32 %v7134_v49, %v6860_v50  ;;  %v977_v58 = vmul.f32 %v7166_v29, %v6931_v44 }
  0x97   : > { %v574_v16 = vadd.f32 %v573_v54, %v536_v9  ;;  %v7271_v14 = vadd.f32 %v650_v2, %v613_v62  ;;  %v1052_v9 = vmul.f32 %v7149_v53, %v6897_v24  ;;  %v1082_v54 = vadd.f32 %v1081_v31, %v1049_v20 }
  0x98   : > { %v1053_v2 = vmul.f32 %v7169_v11, %v6931_v44  ;;  %v979_v20 = vmul.f32 %v7137_v59, %v6865_v51 }
  0x99   : > { %637 = vadd.xlane.f32.xlu2 %v636_v21  ;;  %v973_v21 = vmul.f32 %v7166_v29, %v6745_v3  ;;  %v7265_v4 = vadd.f32 %v574_v16, %v537_v52  ;;  %v1009_v52 = vadd.f32 %v975_v23, %v974_v33  ;;  %v1086_v62 = vadd.f32 %v1085_v36, %v1052_v9 }
  0x9a   : > { %v605_v16 = vmul.f32 %v7053_v32, %v8505_v12  ;;  %v980_v23 = vmul.f32 %v7146_v48, %v6888_v63  ;;  %v609_v9 = vmul.f32 %v7053_v32, %v7027_v34  ;;  %v991_v32 = vmul.f32 %v7137_v59, %v7069_v43 }
  0x9b   : > { %561 = vadd.xlane.f32.xlu1 %v560_v25  ;;  %v603_v25 = vmul.f32 %v7020_v28, %v8503_v57  ;;  %v1010_v18 = vadd.f32 %v1009_v52, %v976_v45  ;;  %v1087_v33 = vadd.f32 %v1086_v62, %v1053_v2  ;;  %v1055_v45 = vmul.f32 %v7131_v13, %v6865_v51 }
  0x9c   : > { %1078 = vadd.xlane.f32.xlu0 %v1077_v35  ;;  %v1006_v35 = vadd.f32 %v1005_v38, %v973_v21  ;;  %v1014_v21 = vadd.f32 %v979_v20, %v978_v46  ;;  %v990_v52 = vmul.f32 %v7134_v49, %v7064_v22  ;;  %v992_v2 = vmul.f32 %v7146_v48, %v7088_v26 }
  0x9d   : > { %v639_v55 = vadd.f32 %v603_v25, %v602_v5  ;;  %v1011_v38 = vadd.f32 %v1010_v18, %v977_v58  ;;  %v608_v5 = vmul.f32 %v7034_v47, %v8500_v6  ;;  %v644_v25 = vadd.f32 %v607_v7, %v606_v19 }
  0x9e   : > { %v1015_v28 = vadd.f32 %v1014_v21, %v980_v23  ;;  %v1058_v62 = vmul.f32 %v7128_v17, %v8502_v15  ;;  %v1059_v46 = vmul.f32 %v7131_v13, %v8503_v57  ;;  %v986_v20 = vmul.f32 %v7134_v49, %v6972_v39 }
  0x9f   : > { %v640_v31 = vadd.f32 %v639_v55, %v604_v30  ;;  %v645_v36 = vadd.f32 %v644_v25, %v608_v5  ;;  %v1056_v30 = vmul.f32 %v7149_v53, %v6888_v63  ;;  %v987_v58 = vmul.f32 %v7137_v59, %v6977_v40 }
  0xa0   : > { %v1016_v47 = vadd.f32 %v1015_v28, %v981_v27  ;;  %v993_v18 = vmul.f32 %v7166_v29, %v7101_v42  ;;  %v1029_v19 = vadd.f32 %v991_v32, %v990_v52  ;;  %v1057_v7 = vmul.f32 %v7169_v11, %v8501_v56  ;;  %v8506_v27 = vld [vmem:[#allocation21_spill] sm:$0xff] }
  0xa1   : > { %566 = vadd.xlane.f32.xlu2 %v565_v8  ;;  %v641_v8 = vadd.f32 %v640_v31, %v605_v16  ;;  %v982_v31 = vmul.f32 %v7134_v49, %v8502_v15  ;;  %v1060_v23 = vmul.f32 %v7149_v53, %v8504_v37  ;;  %v988_v5 = vmul.f32 %v7146_v48, %v8500_v6 }
  0xa2   : > { %v1030_v21 = vadd.f32 %v1029_v19, %v992_v2  ;;  %v1066_v25 = vmul.f32 %v7128_v17, %v7064_v22  ;;  %v1024_v49 = vadd.f32 %v987_v58, %v986_v20  ;;  %v7339_v28 = vperm.slane %v8506_v27, 4  ;;  %v8509_v58 = vld [vmem:[#allocation29_spill] sm:$0xff] }
  0xa3   : > { %1083 = vadd.xlane.f32.xlu1 %v1082_v54  ;;  %v1054_v54 = vmul.f32 %v7128_v17, %v6860_v50  ;;  %v1069_v32 = vmul.f32 %v7169_v11, %v7101_v42 }
  0xa4   : > { %1007 = vadd.xlane.f32.xlu0 %v1006_v35  ;;  %v646_v35 = vadd.f32 %v645_v36, %v609_v9  ;;  %v7344_v36 = vadd.f32 %v1030_v21, %v993_v18  ;;  %v8510_v18 = vld [vmem:[#allocation30_spill] sm:$0xff] }
  0xa5   : > { %v1090_v55 = vadd.f32 %v1055_v45, %v1054_v54 }
  0xa7   : > { %v1091_v16 = vadd.f32 %v1090_v55, %v1056_v30  ;;  %v989_v55 = vmul.f32 %v7166_v29, %v7027_v34 }
  0xa9   : > { %1088 = vadd.xlane.f32.xlu2 %v1087_v33  ;;  %v983_v33 = vmul.f32 %v7137_v59, %v8503_v57  ;;  %v8507_v59 = vld [vmem:[#allocation22_spill] sm:$0xff]  ;;  %v1092_v45 = vadd.f32 %v1091_v16, %v1057_v7  ;;  %v8511_v7 = vld [vmem:[#allocation25_spill] sm:$0xff] }
  0xaa   : > { %v7342_v9 = vperm.slane %v8507_v59, 4  ;;  %v810_v16 = vmul.f32 %v7339_v28, %v8511_v7 }
  0xab   : > { %1012 = vadd.xlane.f32.xlu1 %v1011_v38  ;;  %v1095_v38 = vadd.f32 %v1059_v46, %v1058_v62  ;;  %v1019_v52 = vadd.f32 %v983_v33, %v982_v31  ;;  %v1025_v62 = vadd.f32 %v1024_v49, %v988_v5  ;;  %v8508_v46 = vld [vmem:[#allocation23_spill] sm:$0xff]  ;;  %v8512_v31 = vld [vmem:[#allocation26_spill] sm:$0xff]  ;;  %v1062_v5 = vmul.f32 %v7128_v17, %v6972_v39 }
  0xac   : > { %642 = vadd.xlane.f32.xlu0 %v641_v8  ;;  %v1067_v8 = vmul.f32 %v7131_v13, %v7069_v43  ;;  %v7358_v20 = vperm.slane %v8508_v46, 4  ;;  %v815_v19 = vmul.f32 %v7342_v9, %v8510_v18  ;;  %v811_v33 = vmul.f32 %v7342_v9, %v8512_v31 }
  0xad   : > { %v1096_v30 = vadd.f32 %v1095_v38, %v1060_v23  ;;  %v7388_v17 = vperm.slane %v8507_v59, 5 }
  0xae   : > { %v1105_v54 = vadd.f32 %v1067_v8, %v1066_v25  ;;  %v1026_v25 = vadd.f32 %v1025_v62, %v989_v55  ;;  %v8513_v8 = vld [vmem:[#allocation24_spill] sm:$0xff] }
  0xaf   : > { %v7378_v49 = vperm.slane %v8513_v8, 4 }
  0xb1   : > { %1017 = vadd.xlane.f32.xlu2 %v1016_v47  ;;  %v984_v47 = vmul.f32 %v7146_v48, %v8504_v37  ;;  %v814_v48 = vmul.f32 %v7339_v28, %v8509_v58  ;;  %v817_v62 = vmul.f32 %v7378_v49, %v6847_v41 }
  0xb3   : > { %647 = vadd.xlane.f32.xlu1 %v646_v35  ;;  %v1061_v35 = vmul.f32 %v7169_v11, %v8505_v12  ;;  %v1020_v21 = vadd.f32 %v1019_v52, %v984_v47  ;;  %v7385_v47 = vperm.slane %v8506_v27, 5  ;;  %v7397_v27 = vperm.slane %v8508_v46, 5 }
  0xb4   : > { %571 = vadd.xlane.f32.xlu0 %v7223_v10  ;;  %v1068_v10 = vmul.f32 %v7149_v53, %v7088_v26  ;;  %v887_v46 = vmul.f32 %v7388_v17, %v8512_v31 }
  0xb5   : > { %v1097_v38 = vadd.f32 %v1096_v30, %v1061_v35  ;;  %v8516_v30 = vld [vmem:[#allocation28_spill] sm:$0xff]  ;;  %v890_v59 = vmul.f32 %v7385_v47, %v8509_v58  ;;  %v894_v31 = vmul.f32 %v7385_v47, %v6730_v0 }
  0xb6   : > { %v1106_v2 = vadd.f32 %v1105_v54, %v1068_v10  ;;  %v8514_v10 = vld [vmem:[#allocation31_spill] sm:$0xff]  ;;  %v813_v55 = vmul.f32 %v7378_v49, %v8516_v30 }
  0xb7   : > { %v816_v54 = vmul.f32 %v7358_v20, %v8514_v10 }
  0xb8   : > { %v7369_v23 = vadd.f32 %v1106_v2, %v1069_v32  ;;  %v847_v32 = vadd.f32 %v815_v19, %v814_v48  ;;  %v8515_v2 = vld [vmem:[#allocation27_spill] sm:$0xff] }
  0xb9   : > { %652 = vadd.xlane.f32.xlu2 %v7271_v14  ;;  %v985_v14 = vmul.f32 %v7166_v29, %v8505_v12  ;;  %v812_v29 = vmul.f32 %v7358_v20, %v8515_v2 }
  0xba   : > { %v848_v48 = vadd.f32 %v847_v32, %v816_v54 }
  0xbb   : > { %576 = vadd.xlane.f32.xlu1 %v7265_v4  ;;  %v1063_v4 = vmul.f32 %v7131_v13, %v6977_v40  ;;  %v1021_v52 = vadd.f32 %v1020_v21, %v985_v14  ;;  %v1064_v13 = vmul.f32 %v7149_v53, %v8500_v6  ;;  %v891_v53 = vmul.f32 %v7388_v17, %v8510_v18 }
  0xbc   : > { %1093 = vadd.xlane.f32.xlu0 %v1092_v45  ;;  %v842_v45 = vadd.f32 %v811_v33, %v810_v16  ;;  %v1065_v33 = vmul.f32 %v7169_v11, %v7027_v34  ;;  %v886_v21 = vmul.f32 %v7385_v47, %v8511_v7  ;;  %v892_v18 = vmul.f32 %v7397_v27, %v8514_v10 }
  0xbd   : > { %v1100_v35 = vadd.f32 %v1063_v4, %v1062_v5  ;;  %v849_v5 = vadd.f32 %v848_v48, %v817_v62  ;;  %v7414_v4 = vperm.slane %v8513_v8, 5  ;;  %v888_v7 = vmul.f32 %v7397_v27, %v8515_v2  ;;  %v8517_v62 = vld [vmem:[#allocation20_spill] sm:$0xff] }
  0xbe   : > { %v843_v19 = vadd.f32 %v842_v45, %v812_v29  ;;  %v918_v32 = vadd.f32 %v887_v46, %v886_v21  ;;  %v895_v29 = vmul.f32 %v7388_v17, %v6735_v1  ;;  %v818_v45 = vmul.f32 %v7339_v28, %v6730_v0 }
  0xbf   : > { %v1101_v14 = vadd.f32 %v1100_v35, %v1064_v13  ;;  %v893_v8 = vmul.f32 %v7414_v4, %v6847_v41  ;;  %v889_v13 = vmul.f32 %v7414_v4, %v8516_v30  ;;  %v896_v48 = vmul.f32 %v7397_v27, %v8517_v62 }
  0xc0   : > { %v844_v58 = vadd.f32 %v843_v19, %v813_v55  ;;  %v919_v35 = vadd.f32 %v918_v32, %v888_v7  ;;  %v928_v41 = vadd.f32 %v895_v29, %v894_v31  ;;  %v820_v0 = vmul.f32 %v7358_v20, %v8517_v62 }
  0xc1   : > { %1027 = vadd.xlane.f32.xlu2 %v1026_v25  ;;  %v923_v25 = vadd.f32 %v891_v53, %v890_v59  ;;  %v1102_v11 = vadd.f32 %v1101_v14, %v1065_v33  ;;  %v897_v30 = vmul.f32 %v7414_v4, %v6745_v3  ;;  %v826_v14 = vmul.f32 %v7339_v28, %v6860_v50 }
  0xc2   : > { %v929_v33 = vadd.f32 %v928_v41, %v896_v48  ;;  %v827_v21 = vmul.f32 %v7342_v9, %v6865_v51  ;;  %v821_v46 = vmul.f32 %v7378_v49, %v6745_v3  ;;  %v828_v3 = vmul.f32 %v7358_v20, %v6888_v63 }
  0xc3   : > { %1098 = vadd.xlane.f32.xlu1 %v1097_v38  ;;  %v924_v10 = vadd.f32 %v923_v25, %v892_v18  ;;  %v822_v25 = vmul.f32 %v7339_v28, %v6878_v60  ;;  %v906_v48 = vmul.f32 %v7385_v47, %v8502_v15  ;;  %v907_v41 = vmul.f32 %v7388_v17, %v8503_v57 }
  0xc4   : > { %1022 = vadd.xlane.f32.xlu0 %v1021_v52  ;;  %v7403_v16 = vpop.xlane.xlu2 %703  ;;  %v819_v52 = vmul.f32 %v7342_v9, %v6735_v1  ;;  %v920_v1 = vadd.f32 %v919_v35, %v889_v13  ;;  %v930_v32 = vadd.f32 %v929_v33, %v897_v30  ;;  %v862_v31 = vadd.f32 %v827_v21, %v826_v14  ;;  %v1110_v35 = vld [vmem:[#allocation6] sm:$0xff] }
  0xc5   : > { %v925_v19 = vadd.f32 %v924_v10, %v893_v8  ;;  %v900_v8 = vmul.f32 %v7397_v27, %v6897_v24  ;;  %v829_v13 = vmul.f32 %v7378_v49, %v8501_v56  ;;  %1279 = vmatpush.msra.mxu2 %v1110_v35  ;;  %1336 = vmatpush.msra.mxu3 %v1110_v35 }
  0xc6   : > { %v7411_v38 = vpop.xlane.xlu1 %769  ;;  %v852_v59 = vadd.f32 %v819_v52, %v818_v45  ;;  %v863_v62 = vadd.f32 %v862_v31, %v828_v3  ;;  %1165 = vmatpush.msra.mxu0 %v1110_v35  ;;  %1222 = vmatpush.msra.mxu1 %v1110_v35  ;;  %v902_v33 = vmul.f32 %v7385_v47, %v6860_v50 }
  0xc7   : > { %v7418_v54 = vpop.xlane.xlu0 %693  ;;  %1508 = vmatpush.msrb.mxu2 %v1110_v35  ;;  %v943_v21 = vadd.f32 %v907_v41, %v906_v48  ;;  %1565 = vmatpush.msrb.mxu3 %v1110_v35  ;;  %v833_v3 = vmul.f32 %v7378_v49, %v8505_v12 }
  0xc8   : > { %1393 = vmatpush.msrb.mxu0 %v1110_v35  ;;  %1451 = vmatpush.msrb.mxu1 %v1110_v35 }
  0xc9   : > { %850 = vadd.xlane.f32.xlu2 %v849_v5  ;;  %v853_v5 = vadd.f32 %v852_v59, %v820_v0  ;;  %v831_v0 = vmul.f32 %v7342_v9, %v8503_v57  ;;  %v825_v59 = vmul.f32 %v7378_v49, %v6931_v44  ;;  %v864_v57 = vadd.f32 %v863_v62, %v829_v13 }
  0xca   : > { %v840_v62 = vmul.f32 %v7358_v20, %v7088_v26 }
  0xcb   : > { %845 = vadd.xlane.f32.xlu1 %v844_v58  ;;  %v898_v58 = vmul.f32 %v7385_v47, %v6878_v60  ;;  %v854_v29 = vadd.f32 %v853_v5, %v821_v46  ;;  %v824_v60 = vmul.f32 %v7358_v20, %v6897_v24  ;;  %v830_v24 = vmul.f32 %v7339_v28, %v8502_v15 }
  0xcc   : > { %1103 = vadd.xlane.f32.xlu0 %v1102_v11  ;;  %v7432_v2 = vpop.xlane.xlu2 %779  ;;  %v823_v11 = vmul.f32 %v7342_v9, %v6883_v61  ;;  %v903_v15 = vmul.f32 %v7388_v17, %v6865_v51  ;;  %v832_v46 = vmul.f32 %v7358_v20, %v8504_v37  ;;  %v904_v51 = vmul.f32 %v7397_v27, %v6888_v63 }
  0xcd   : > { %v867_v5 = vadd.f32 %v831_v0, %v830_v24  ;;  %v910_v63 = vmul.f32 %v7385_v47, %v6972_v39 }
  0xce   : > { %v7436_v55 = vpop.xlane.xlu1 %774  ;;  %v857_v52 = vadd.f32 %v823_v11, %v822_v25  ;;  %v909_v25 = vmul.f32 %v7414_v4, %v8505_v12  ;;  %v835_v12 = vmul.f32 %v7342_v9, %v6977_v40 }
  0xcf   : > { %v7442_v53 = vpop.xlane.xlu0 %698  ;;  %v868_v31 = vadd.f32 %v867_v5, %v832_v46 }
  0xd0   : > { %v858_v30 = vadd.f32 %v857_v52, %v824_v60  ;;  %v905_v60 = vmul.f32 %v7414_v4, %v8501_v56 }
  0xd1   : > { %1032 = vadd.xlane.f32.xlu2 %v7344_v36  ;;  %v899_v36 = vmul.f32 %v7388_v17, %v6883_v61  ;;  %v901_v61 = vmul.f32 %v7414_v4, %v6931_v44  ;;  %v908_v44 = vmul.f32 %v7397_v27, %v8504_v37  ;;  %v839_v37 = vmul.f32 %v7342_v9, %v7069_v43 }
  0xd2   : > { %v869_v41 = vadd.f32 %v868_v31, %v833_v3  ;;  %v841_v9 = vmul.f32 %v7378_v49, %v7101_v42 }
  0xd3   : > { %926 = vadd.xlane.f32.xlu1 %v925_v19  ;;  %v933_v10 = vadd.f32 %v899_v36, %v898_v58  ;;  %v859_v58 = vadd.f32 %v858_v30, %v825_v59  ;;  %v938_v36 = vadd.f32 %v903_v15, %v902_v33  ;;  %v944_v11 = vadd.f32 %v943_v21, %v908_v44 }
  0xd4   : > { %921 = vadd.xlane.f32.xlu0 %v920_v1  ;;  %v7457_v18 = vpop.xlane.xlu2 %713  ;;  %v913_v15 = vmul.f32 %v7414_v4, %v7027_v34  ;;  %v837_v44 = vmul.f32 %v7378_v49, %v7027_v34 }
  0xd5   : > { %v934_v19 = vadd.f32 %v933_v10, %v900_v8  ;;  %v1123_v8 = vlaneseq  ;;  %v939_v52 = vadd.f32 %v938_v36, %v904_v51  ;;  %v945_v35 = vadd.f32 %v944_v11, %v909_v25 }
  0xd6   : > { %v7463_v7 = vpop.xlane.xlu1 %784  ;;  %v916_v51 = vmul.f32 %v7397_v27, %v7088_v26 }
  0xd7   : > { %v7469_v45 = vpop.xlane.xlu0 %708  ;;  %v7532_v0 = vand.u32 127, %v1123_v8 }
  0xd9   : > { %931 = vadd.xlane.f32.xlu2 %v930_v32  ;;  %v838_v32 = vmul.f32 %v7339_v28, %v7064_v22  ;;  %v1304_v30 = vperm.slane %v7411_v38, %v7532_v0  ;;  %v1305_v33 = vperm.slane %v7436_v55, %v7532_v0  ;;  %v914_v38 = vmul.f32 %v7385_v47, %v7064_v22 }
  0xda   : > { %v915_v55 = vmul.f32 %v7388_v17, %v7069_v43  ;;  %v1306_v46 = vperm.slane %v7432_v2, %v7532_v0  ;;  %v1307_v34 = vperm.slane %v7463_v7, %v7532_v0  ;;  %v1249_v22 = vperm.slane %v7403_v16, %v7532_v0 }
  0xdb   : > { %855 = vadd.xlane.f32.xlu1 %v854_v29  ;;  %v911_v29 = vmul.f32 %v7388_v17, %v6977_v40  ;;  %v877_v48 = vadd.f32 %v839_v37, %v838_v32  ;;  %v836_v40 = vmul.f32 %v7358_v20, %v8500_v6  ;;  %v917_v37 = vmul.f32 %v7414_v4, %v7101_v42 }
  0xdc   : > { %1108 = vadd.xlane.f32.xlu0 %v7369_v23  ;;  %v7488_v1 = vpop.xlane.xlu2 %794  ;;  %v935_v23 = vadd.f32 %v934_v19, %v901_v61  ;;  %v834_v61 = vmul.f32 %v7339_v28, %v6972_v39  ;;  %v912_v19 = vmul.f32 %v7397_v27, %v8500_v6  ;;  %v940_v39 = vadd.f32 %v939_v52, %v905_v60 }
  0xdd   : > { %v948_v24 = vadd.f32 %v911_v29, %v910_v63  ;;  %v878_v59 = vadd.f32 %v877_v48, %v840_v62  ;;  %v1248_v6 = vperm.slane %v7442_v53, %v7532_v0  ;;  %v953_v7 = vadd.f32 %v915_v55, %v914_v38 }
  0xde   : > { %v7494_v14 = vpop.xlane.xlu1 %718  ;;  %v872_v28 = vadd.f32 %v835_v12, %v834_v61  ;;  %v1309_v25 = vperm.slane %v7488_v1, %v7532_v0 }
  0xdf   : > { %v7500_v50 = vpop.xlane.xlu0 %789  ;;  %v879_v5 = vadd.f32 %v878_v59, %v841_v9  ;;  %v1252_v32 = vperm.slane %v7494_v14, %v7532_v0  ;;  %v954_v3 = vadd.f32 %v953_v7, %v916_v51 }
  0xe0   : > { %v873_v21 = vadd.f32 %v872_v28, %v836_v40  ;;  %v1308_v47 = vperm.slane %v7500_v50, %v7532_v0  ;;  %v6537_v28 = vmov 0.0  }
  0xe1   : > { %865 = vadd.xlane.f32.xlu2 %v864_v57  ;;  %v949_v57 = vadd.f32 %v948_v24, %v912_v19  ;;  %v955_v61 = vadd.f32 %v954_v3, %v917_v37  ;;  %458 = vst [vmem:[#allocation3 + $0x30] sm:$0xff] %v6537_v28 }
  0xe2   : > { %v874_v2 = vadd.f32 %v873_v21, %v837_v44  ;;  %459 = vst [vmem:[#allocation3] sm:$0xff] %v6537_v28 }
  0xe3   : > { %936 = vadd.xlane.f32.xlu1 %v935_v23  ;;  %v1247_v23 = vperm.slane %v7418_v54, %v7532_v0  ;;  %v950_v49 = vadd.f32 %v949_v57, %v913_v15  ;;  %v1250_v54 = vperm.slane %v7469_v45, %v7532_v0  ;;  %v1251_v45 = vperm.slane %v7457_v18, %v7532_v0 }
  0xe4   : > { %860 = vadd.xlane.f32.xlu0 %v859_v58  ;;  %v7516_v10 = vpop.xlane.xlu2 %541  ;;  %v1312_v58 = vsel %vm1133_vm0, %v1305_v33, %v1304_v30  ;;  %460 = vst [vmem:[#allocation3 + $0x18] sm:$0xff] %v6537_v28 }
  0xe5   : > { %v1255_v43 = vsel %vm1133_vm0, %v1248_v6, %v1247_v23  ;;  %v1313_v36 = vsel %vm1135_vm1, %v1306_v46, %v1312_v58  ;;  %461 = vst [vmem:[#allocation3 + $0x10] sm:$0xff] %v6537_v28  ;;  %v1125_v23 = vperm.slane %v7516_v10, %v7532_v0 }
  0xe6   : > { %v7524_v13 = vpop.xlane.xlu1 %799  ;;  %v1314_v16 = vsel %vm1137_vm2, %v1307_v34, %v1313_v36  ;;  %v1256_v50 = vsel %vm1135_vm1, %v1249_v22, %v1255_v43  ;;  %462 = vst [vmem:[#allocation3 + $0x8] sm:$0xff] %v6537_v28 }
  0xe7   : > { %v7530_v56 = vpop.xlane.xlu0 %723  ;;  %v1315_v26 = vsel %vm1139_vm3, %v1308_v47, %v1314_v16  ;;  %v1310_v27 = vperm.slane %v7524_v13, %v7532_v0  ;;  %v1257_v11 = vsel %vm1137_vm2, %v1250_v54, %v1256_v50  ;;  %463 = vst [vmem:[#allocation3 + $0x20] sm:$0xff] %v6537_v28 }
  0xe8   : > { %v1253_v18 = vperm.slane %v7530_v56, %v7532_v0  ;;  %v1316_v29 = vsel %vm1141_vm4, %v1309_v25, %v1315_v26  ;;  %v1258_v8 = vsel %vm1139_vm3, %v1251_v45, %v1257_v11  ;;  %464 = vst [vmem:[#allocation3 + $0x28] sm:$0xff] %v6537_v28 }
  0xe9   : > { %946 = vadd.xlane.f32.xlu2 %v945_v35  ;;  %v1317_v60 = vsel %vm1143_vm5, %v1310_v27, %v1316_v29  ;;  %v1259_v52 = vsel %vm1141_vm4, %v1252_v32, %v1258_v8  ;;  %465 = vst [vmem:[#allocation3 + $0x38] sm:$0xff] %v6537_v28 }
  0xea   : > { %v1260_v12 = vsel %vm1143_vm5, %v1253_v18, %v1259_v52 }
  0xeb   : > { %870 = vadd.xlane.f32.xlu1 %v869_v41 }
  0xec   : > { %941 = vadd.xlane.f32.xlu0 %v940_v39  ;;  %v7546_v20 = vpop.xlane.xlu2 %622 }
  0xed   : > { %v1191_v44 = vperm.slane %v7546_v20, %v7532_v0 }
  0xee   : > { %v7558_v53 = vpop.xlane.xlu1 %617 }
  0xef   : > { %v7568_v17 = vpop.xlane.xlu0 %546  ;;  %v1190_v6 = vperm.slane %v7558_v53, %v7532_v0 }
  0xf0   : > { %v1126_v46 = vperm.slane %v7568_v17, %v7532_v0 }
  0xf1   : > { %880 = vadd.xlane.f32.xlu2 %v879_v5  ;;  %v1198_v5 = vsel %vm1133_vm0, %v1191_v44, %v1190_v6 }
  0xf2   : > { %v1134_v47 = vsel %vm1133_vm0, %v1126_v46, %v1125_v23 }
  0xf3   : > { %951 = vadd.xlane.f32.xlu1 %v950_v49 }
  0xf4   : > { %875 = vadd.xlane.f32.xlu0 %v874_v2  ;;  %v7587_v1 = vpop.xlane.xlu2 %551 }
  0xf5   : > { %v1127_v58 = vperm.slane %v7587_v1, %v7532_v0 }
  0xf6   : > { %v805_v31 = vpop.xlane.xlu1 %804 }
  0xf7   : > { %v1311_v63 = vperm.slane %v805_v31, %v7532_v0  ;;  %v729_v14 = vpop.xlane.xlu0 %728  ;;  %v1136_v2 = vsel %vm1135_vm1, %v1127_v58, %v1134_v47 }
  0xf8   : > { %v1254_v42 = vperm.slane %v729_v14, %v7532_v0 }
  0xf9   : > { %v1318_v4 = vsel %vm1145_vm6, %v1311_v63, %v1317_v60 }
  0xfa   : > { %4499 = vmatmul.msk.f32.vlgmr.msra.gmra.mxu3 %vm1147_vm7, %v1318_v4  ;;  %v1261_v13 = vsel %vm1145_vm6, %v1254_v42, %v1260_v12 }
  0xfb   : > { %4497 = vmatmul.msk.f32.vlgmr.msra.gmra.mxu2 %vm1147_vm7, %v1261_v13 }
  0xfc   : > { %956 = vadd.xlane.f32.xlu0 %v955_v61  ;;  %v633_v35 = vpop.xlane.xlu2 %632 }
  0xfd   : > { %v1193_v53 = vperm.slane %v633_v35, %v7532_v0 }
  0xfe   : > { %v557_v62 = vpop.xlane.xlu1 %556 }
  0xff   : > { %v628_v48 = vpop.xlane.xlu0 %627  ;;  %v1128_v49 = vperm.slane %v557_v62, %v7532_v0 }
 0x100   : > { %v1192_v21 = vperm.slane %v628_v48, %v7532_v0 }
 0x101   : > { %v1138_v36 = vsel %vm1137_vm2, %v1128_v49, %v1136_v2 }
 0x102   : > { %v1199_v20 = vsel %vm1135_vm1, %v1192_v21, %v1198_v5 }
 0x103   : > { %v1200_v51 = vsel %vm1137_vm2, %v1193_v53, %v1199_v20 }
 0x104   : > { %v7604_v41 = vpop.xlane.xlu2 %1073 }
 0x105   : > { %v1533_v44 = vperm.slane %v7604_v41, %v7532_v0 }
 0x106   : > { %v7606_v19 = vpop.xlane.xlu1 %1002 }
 0x107   : > { %v7608_v24 = vpop.xlane.xlu0 %997  ;;  %v1477_v60 = vperm.slane %v7606_v19, %v7532_v0 }
 0x108   : > { %v1476_v14 = vperm.slane %v7608_v24, %v7532_v0 }
 0x10a   : > { %v1484_v13 = vsel %vm1133_vm0, %v1477_v60, %v1476_v14 }
 0x10c   : > { %v638_v56 = vpop.xlane.xlu2 %637 }
 0x10d   : > { %v1194_v22 = vperm.slane %v638_v56, %v7532_v0 }
 0x10e   : > { %v562_v39 = vpop.xlane.xlu1 %561 }
 0x10f   : > { %v7610_v40 = vpop.xlane.xlu0 %1078  ;;  %v1129_v43 = vperm.slane %v562_v39, %v7532_v0  ;;  %v1201_v16 = vsel %vm1139_vm3, %v1194_v22, %v1200_v51 }
 0x110   : > { %v1534_v21 = vperm.slane %v7610_v40, %v7532_v0 }
 0x111   : > { %v1140_v45 = vsel %vm1139_vm3, %v1129_v43, %v1138_v36 }
 0x112   : > { %v1541_v46 = vsel %vm1133_vm0, %v1534_v21, %v1533_v44 }
 0x114   : > { %v567_v9 = vpop.xlane.xlu2 %566 }
 0x115   : > { %v1130_v17 = vperm.slane %v567_v9, %v7532_v0 }
 0x116   : > { %v7612_v59 = vpop.xlane.xlu1 %1083 }
 0x117   : > { %v1008_v30 = vpop.xlane.xlu0 %1007  ;;  %v1142_v11 = vsel %vm1141_vm4, %v1130_v17, %v1140_v45 }
 0x118   : > { %v1478_v52 = vperm.slane %v1008_v30, %v7532_v0 }
 0x11a   : > { %v1485_v48 = vsel %vm1135_vm1, %v1478_v52, %v1484_v13 }
 0x11c   : > { %v7614_v33 = vpop.xlane.xlu2 %1088 }
 0x11e   : > { %v1013_v15 = vpop.xlane.xlu1 %1012 }
 0x11f   : > { %v643_v57 = vpop.xlane.xlu0 %642  ;;  %v1479_v4 = vperm.slane %v1013_v15, %v7532_v0 }
 0x120   : > { %v1195_v10 = vperm.slane %v643_v57, %v7532_v0 }
 0x121   : > { %v1486_v24 = vsel %vm1137_vm2, %v1479_v4, %v1485_v48 }
 0x122   : > { %v1202_v50 = vsel %vm1141_vm4, %v1195_v10, %v1201_v16 }
 0x124   : > { %v1018_v38 = vpop.xlane.xlu2 %1017 }
 0x125   : > { %v1480_v12 = vperm.slane %v1018_v38, %v7532_v0  ;;  %v1535_v38 = vperm.slane %v7612_v59, %v7532_v0 }
 0x126   : > { %v648_v55 = vpop.xlane.xlu1 %647 }
 0x127   : > { %v572_v34 = vpop.xlane.xlu0 %571  ;;  %v1196_v54 = vperm.slane %v648_v55, %v7532_v0  ;;  %v1487_v56 = vsel %vm1139_vm3, %v1480_v12, %v1486_v24  ;;  %v1536_v55 = vperm.slane %v7614_v33, %v7532_v0  ;;  %v1542_v41 = vsel %vm1135_vm1, %v1535_v38, %v1541_v46 }
 0x128   : > { %v1131_v7 = vperm.slane %v572_v34, %v7532_v0 }
 0x129   : > { %v1203_v1 = vsel %vm1143_vm5, %v1196_v54, %v1202_v50  ;;  %v1543_v34 = vsel %vm1137_vm2, %v1536_v55, %v1542_v41 }
 0x12a   : > { %v1144_v3 = vsel %vm1143_vm5, %v1131_v7, %v1142_v11 }
 0x12c   : > { %v653_v25 = vpop.xlane.xlu2 %652 }
 0x12d   : > { %v1197_v27 = vperm.slane %v653_v25, %v7532_v0 }
 0x12e   : > { %v577_v26 = vpop.xlane.xlu1 %576 }
 0x12f   : > { %v1132_v32 = vperm.slane %v577_v26, %v7532_v0  ;;  %v1094_v37 = vpop.xlane.xlu0 %1093  ;;  %v1204_v18 = vsel %vm1145_vm6, %v1197_v27, %v1203_v1 }
 0x130   : > { %4495 = vmatmul.msk.f32.vlgmr.msra.gmra.mxu1 %vm1147_vm7, %v1204_v18  ;;  %v1537_v23 = vperm.slane %v1094_v37, %v7532_v0 }
 0x131   : > { %v1146_v31 = vsel %vm1145_vm6, %v1132_v32, %v1144_v3 }
 0x132   : > { %4493 = vmatmul.msk.f32.vlgmr.msra.gmra.mxu0 %vm1147_vm7, %v1146_v31  ;;  %v1544_v20 = vsel %vm1139_vm3, %v1537_v23, %v1543_v34 }
 0x134   : > { %v1028_v63 = vpop.xlane.xlu2 %1027 }
 0x135   : > { %v1482_v19 = vperm.slane %v1028_v63, %v7532_v0 }
 0x136   : > { %v1099_v29 = vpop.xlane.xlu1 %1098 }
 0x137   : > { %v1023_v8 = vpop.xlane.xlu0 %1022  ;;  %v1538_v5 = vperm.slane %v1099_v29, %v7532_v0 }
 0x138   : > { %v1481_v35 = vperm.slane %v1023_v8, %v7532_v0 }
 0x139   : > { %v1545_v49 = vsel %vm1141_vm4, %v1538_v5, %v1544_v20 }
 0x13a   : > { %v1488_v39 = vsel %vm1141_vm4, %v1481_v35, %v1487_v56 }
 0x13b   : > { %v1489_v15 = vsel %vm1143_vm5, %v1482_v19, %v1488_v39 }
 0x13c   : > { %v851_v42 = vpop.xlane.xlu2 %850 }
 0x13d   : > { %v1362_v51 = vperm.slane %v851_v42, %v7532_v0 }
 0x13e   : > { %v846_v61 = vpop.xlane.xlu1 %845 }
 0x13f   : > { %v1104_v62 = vpop.xlane.xlu0 %1103  ;;  %v1361_v2 = vperm.slane %v846_v61, %v7532_v0 }
 0x140   : > { %v1539_v53 = vperm.slane %v1104_v62, %v7532_v0 }
 0x141   : > { %v1369_v45 = vsel %vm1133_vm0, %v1362_v51, %v1361_v2 }
 0x142   : > { %v1546_v22 = vsel %vm1143_vm5, %v1539_v53, %v1545_v49 }
 0x144   : > { %v1033_v28 = vpop.xlane.xlu2 %1032 }
 0x145   : > { %v1483_v30 = vperm.slane %v1033_v28, %v7532_v0 }
 0x146   : > { %v927_v9 = vpop.xlane.xlu1 %926 }
 0x147   : > { %v922_v57 = vpop.xlane.xlu0 %921  ;;  %v1490_v6 = vsel %vm1145_vm6, %v1483_v30, %v1489_v15  ;;  %v1420_v37 = vperm.slane %v927_v9, %v7532_v0  ;;  %v7723_v9 = vld [vmem:[#allocation8] ss:$0 sm:$0xff] }
 0x148   : > { %4505 = vmatmul.msk.f32.vlgmr.msrb.gmra.mxu2 %vm1147_vm7, %v1490_v6  ;;  %v1419_v1 = vperm.slane %v922_v57, %v7532_v0 }
 0x14a   : > { %v1427_v52 = vsel %vm1133_vm0, %v1420_v37, %v1419_v1 }
 0x14c   : > { %v932_v58 = vpop.xlane.xlu2 %931 }
 0x14d   : > { %v1421_v3 = vperm.slane %v932_v58, %v7532_v0 }
 0x14e   : > { %v856_v40 = vpop.xlane.xlu1 %855 }
 0x14f   : > { %v1109_v59 = vpop.xlane.xlu0 %1108  ;;  %v1363_v36 = vperm.slane %v856_v40, %v7532_v0  ;;  %v1428_v61 = vsel %vm1135_vm1, %v1421_v3, %v1427_v52 }
 0x150   : > { %v1540_v33 = vperm.slane %v1109_v59, %v7532_v0 }
 0x151   : > { %v1370_v50 = vsel %vm1135_vm1, %v1363_v36, %v1369_v45 }
 0x152   : > { %v1547_v43 = vsel %vm1145_vm6, %v1540_v33, %v1546_v22 }
 0x153   : > { %4507 = vmatmul.msk.f32.vlgmr.msrb.gmra.mxu3 %vm1147_vm7, %v1547_v43 }
 0x154   : > { %v866_v10 = vpop.xlane.xlu2 %865 }
 0x155   : > { %v1365_v26 = vperm.slane %v866_v10, %v7532_v0 }
 0x156   : > { %v937_v47 = vpop.xlane.xlu1 %936 }
 0x157   : > { %v861_v17 = vpop.xlane.xlu0 %860  ;;  %v1422_v63 = vperm.slane %v937_v47, %v7532_v0 }
 0x158   : > { %v1364_v25 = vperm.slane %v861_v17, %v7532_v0 }
 0x159   : > { %v1429_v13 = vsel %vm1137_vm2, %v1422_v63, %v1428_v61 }
 0x15a   : > { %v1371_v11 = vsel %vm1137_vm2, %v1364_v25, %v1370_v50 }
 0x15b   : > { %v1372_v29 = vsel %vm1139_vm3, %v1365_v26, %v1371_v11 }
 0x15c   : > { %v947_v54 = vpop.xlane.xlu2 %946 }
 0x15d   : > { %v1424_v35 = vperm.slane %v947_v54, %v7532_v0 }
 0x15e   : > { %v871_v16 = vpop.xlane.xlu1 %870 }
 0x15f   : > { %v942_v7 = vpop.xlane.xlu0 %941  ;;  %v1366_v32 = vperm.slane %v871_v16, %v7532_v0 }
 0x160   : > { %v1423_v14 = vperm.slane %v942_v7, %v7532_v0 }
 0x161   : > { %v1373_v60 = vsel %vm1141_vm4, %v1366_v32, %v1372_v29 }
 0x162   : > { %v1430_v62 = vsel %vm1139_vm3, %v1423_v14, %v1429_v13 }
 0x163   : > { %v1431_v56 = vsel %vm1141_vm4, %v1424_v35, %v1430_v62 }
 0x164   : > { %v881_v27 = vpop.xlane.xlu2 %880 }
 0x165   : > { %v1368_v31 = vperm.slane %v881_v27, %v7532_v0 }
 0x166   : > { %v952_v4 = vpop.xlane.xlu1 %951 }
 0x167   : > { %v876_v18 = vpop.xlane.xlu0 %875  ;;  %v1425_v48 = vperm.slane %v952_v4, %v7532_v0 }
 0x168   : > { %v1367_v8 = vperm.slane %v876_v18, %v7532_v0 }
 0x169   : > { %v1432_v39 = vsel %vm1143_vm5, %v1425_v48, %v1431_v56 }
 0x16a   : > { %v1374_v42 = vsel %vm1143_vm5, %v1367_v8, %v1373_v60 }
 0x16b   : > { %v1375_v12 = vsel %vm1145_vm6, %v1368_v31, %v1374_v42 }
 0x16c   : > { %4501 = vmatmul.msk.f32.vlgmr.msrb.gmra.mxu0 %vm1147_vm7, %v1375_v12 }
 0x16f   : > { %v957_v24 = vpop.xlane.xlu0 %956 }
 0x170   : > { %v1426_v19 = vperm.slane %v957_v24, %v7532_v0 }
 0x172   : > { %v1433_v28 = vsel %vm1145_vm6, %v1426_v19, %v1432_v39 }
 0x173   : > { %4503 = vmatmul.msk.f32.vlgmr.msrb.gmra.mxu1 %vm1147_vm7, %v1433_v28 }
 0x17d   : > { %v1338_v30 = vpop.f32.mrf.mxu3 }
 0x17e   : > { %v1339_v15 = vadd.f32 %v7723_v9, %v1338_v30  ;;  %v1281_v57 = vpop.f32.mrf.mxu2 }
 0x17f   : > { %v1282_v6 = vadd.f32 %v7723_v9, %v1281_v57 }
 0x180   : > { %v1345_v44 = vmul.f32 %v1339_v15, %v1339_v15  ;;  %v4500_v46 = vadd.f32 -0.33333334, %v1339_v15  ;;  %v1342_v58 = vadd.f32 0.33333334, %v1339_v15  ;;  %vm1343_vm8 = vcmp.ge.f32.partialorder %v1339_v15, 1.0 }
 0x181   : > { %v1288_v21 = vmul.f32 %v1282_v6, %v1282_v6  ;;  %v4498_v41 = vadd.f32 -0.33333334, %v1282_v6  ;;  %vm1341_vm9 = vcmp.le.f32.partialorder %v1339_v15, -1.0  ;;  %v1285_v34 = vadd.f32 0.33333334, %v1282_v6 }
 0x182   : > { %v1346_v38 = vadd.f32 3.0, %v1345_v44  ;;  %vm1286_vm10 = vcmp.ge.f32.partialorder %v1282_v6, 1.0  ;;  %vm1284_vm11 = vcmp.le.f32.partialorder %v1282_v6, -1.0 }
 0x183   : > { %v1289_v55 = vadd.f32 3.0, %v1288_v21 }
 0x184   : > { %v1347_v23 = vmul.f32 %v1346_v38, %v1339_v15 }
 0x185   : > { %v1290_v0 = vmul.f32 %v1289_v55, %v1282_v6 }
 0x186   : > { %v1348_v5 = vmul.f32 0.16666667, %v1347_v23 }
 0x187   : > { %v1291_v53 = vmul.f32 0.16666667, %v1290_v0 }
 0x188   : > { %v1349_v40 = vsel %vm1343_vm8, %v4500_v46, %v1348_v5 }
 0x189   : > { %v1350_v20 = vsel %vm1341_vm9, %v1342_v58, %v1349_v40  ;;  %v1292_v59 = vsel %vm1286_vm10, %v4498_v41, %v1291_v53 }
 0x18a   : > { %v1351_v49 = vpack.c.bf16 %v1350_v20, %v1350_v20  ;;  %v1293_v33 = vsel %vm1284_vm11, %v1285_v34, %v1292_v59 }
 0x18b   : > { %v1294_v22 = vpack.c.bf16 %v1293_v33, %v1293_v33 }
 0x18c   : > { %1352 = vst [vmem:[#allocation2 + $0xc] sm:$0xf] %v1351_v49 }
 0x18d   : > { %1295 = vst [vmem:[#allocation2 + $0x8] sm:$0xf] %v1294_v22 }
 0x1ad   : > { %v1224_v43 = vpop.f32.mrf.mxu1 }
 0x1ae   : > { %v1225_v47 = vadd.f32 %v7723_v9, %v1224_v43 }
 0x1af   : > { %v1167_v10 = vpop.f32.mrf.mxu0 }
 0x1b0   : > { %v1168_v17 = vadd.f32 %v7723_v9, %v1167_v10  ;;  %v1231_v2 = vmul.f32 %v1225_v47, %v1225_v47  ;;  %v4496_v25 = vadd.f32 -0.33333334, %v1225_v47  ;;  %v1228_v11 = vadd.f32 0.33333334, %v1225_v47 }
 0x1b1   : > { %vm1229_vm13 = vcmp.ge.f32.partialorder %v1225_v47, 1.0  ;;  %vm1227_vm15 = vcmp.le.f32.partialorder %v1225_v47, -1.0 }
 0x1b2   : > { %v1174_v54 = vmul.f32 %v1168_v17, %v1168_v17  ;;  %v1232_v7 = vadd.f32 3.0, %v1231_v2  ;;  %v4494_v45 = vadd.f32 -0.33333334, %v1168_v17  ;;  %v1171_v27 = vadd.f32 0.33333334, %v1168_v17 }
 0x1b3   : > { %vm1172_vm12 = vcmp.ge.f32.partialorder %v1168_v17, 1.0  ;;  %vm1170_vm14 = vcmp.le.f32.partialorder %v1168_v17, -1.0 }
 0x1b4   : > { %v1175_v51 = vadd.f32 3.0, %v1174_v54  ;;  %v1233_v16 = vmul.f32 %v1232_v7, %v1225_v47 }
 0x1b6   : > { %v1176_v36 = vmul.f32 %v1175_v51, %v1168_v17  ;;  %v1234_v26 = vmul.f32 0.16666667, %v1233_v16 }
 0x1b8   : > { %v1177_v50 = vmul.f32 0.16666667, %v1176_v36  ;;  %v1235_v1 = vsel %vm1229_vm13, %v4496_v25, %v1234_v26 }
 0x1b9   : > { %v1236_v3 = vsel %vm1227_vm15, %v1228_v11, %v1235_v1 }
 0x1ba   : > { %v1178_v32 = vsel %vm1172_vm12, %v4494_v45, %v1177_v50  ;;  %v1237_v31 = vpack.c.bf16 %v1236_v3, %v1236_v3 }
 0x1bb   : > { %v1179_v37 = vsel %vm1170_vm14, %v1171_v27, %v1178_v32 }
 0x1bc   : > { %v1180_v18 = vpack.c.bf16 %v1179_v37, %v1179_v37  ;;  %1238 = vst [vmem:[#allocation2 + $0x4] sm:$0xf] %v1237_v31 }
 0x1be   : > { %1181 = vst [vmem:[#allocation2] sm:$0xf] %v1180_v18 }
 0x1cb   : > { %v1510_v63 = vpop.f32.mrf.mxu2 }
 0x1cc   : > { %v1511_v29 = vadd.f32 %v7723_v9, %v1510_v63 }
 0x1ce   : > { %v1517_v8 = vmul.f32 %v1511_v29, %v1511_v29  ;;  %v4506_v52 = vadd.f32 -0.33333334, %v1511_v29  ;;  %v1514_v4 = vadd.f32 0.33333334, %v1511_v29  ;;  %vm1515_vm0 = vcmp.ge.f32.partialorder %v1511_v29, 1.0 }
 0x1cf   : > { %vm1513_vm1 = vcmp.le.f32.partialorder %v1511_v29, -1.0 }
 0x1d0   : > { %v1518_v14 = vadd.f32 3.0, %v1517_v8 }
 0x1d2   : > { %v1519_v60 = vmul.f32 %v1518_v14, %v1511_v29 }
 0x1d4   : > { %v1520_v42 = vmul.f32 0.16666667, %v1519_v60 }
 0x1d6   : > { %v1567_v61 = vpop.f32.mrf.mxu3  ;;  %v1521_v12 = vsel %vm1515_vm0, %v4506_v52, %v1520_v42 }
 0x1d7   : > { %v1568_v13 = vadd.f32 %v7723_v9, %v1567_v61  ;;  %v1522_v35 = vsel %vm1513_vm1, %v1514_v4, %v1521_v12 }
 0x1d8   : > { %v1523_v62 = vpack.c.bf16 %v1522_v35, %v1522_v35 }
 0x1d9   : > { %v1574_v48 = vmul.f32 %v1568_v13, %v1568_v13  ;;  %v4508_v19 = vadd.f32 -0.33333334, %v1568_v13  ;;  %v1571_v28 = vadd.f32 0.33333334, %v1568_v13  ;;  %vm1572_vm2 = vcmp.ge.f32.partialorder %v1568_v13, 1.0 }
 0x1da   : > { %1524 = vst [vmem:[#allocation2 + $0x18] sm:$0xf] %v1523_v62  ;;  %vm1570_vm3 = vcmp.le.f32.partialorder %v1568_v13, -1.0 }
 0x1db   : > { %v1575_v24 = vadd.f32 3.0, %v1574_v48 }
 0x1dd   : > { %v1576_v56 = vmul.f32 %v1575_v24, %v1568_v13 }
 0x1df   : > { %v1577_v39 = vmul.f32 0.16666667, %v1576_v56 }
 0x1e1   : > { %v1578_v30 = vsel %vm1572_vm2, %v4508_v19, %v1577_v39 }
 0x1e2   : > { %v1579_v15 = vsel %vm1570_vm3, %v1571_v28, %v1578_v30 }
 0x1e3   : > { %v1580_v57 = vpack.c.bf16 %v1579_v15, %v1579_v15 }
 0x1e5   : > { %1581 = vst [vmem:[#allocation2 + $0x1c] sm:$0xf] %v1580_v57 }
 0x1e9   : > { %v1395_v6 = vpop.f32.mrf.mxu0 }
 0x1ea   : > { %v1396_v44 = vadd.f32 %v7723_v9, %v1395_v6 }
 0x1ec   : > { %v1402_v21 = vmul.f32 %v1396_v44, %v1396_v44  ;;  %v4502_v46 = vadd.f32 -0.33333334, %v1396_v44  ;;  %v1399_v58 = vadd.f32 0.33333334, %v1396_v44  ;;  %vm1400_vm4 = vcmp.ge.f32.partialorder %v1396_v44, 1.0 }
 0x1ed   : > { %vm1398_vm5 = vcmp.le.f32.partialorder %v1396_v44, -1.0 }
 0x1ee   : > { %v1403_v38 = vadd.f32 3.0, %v1402_v21 }
 0x1f0   : > { %v1453_v55 = vpop.f32.mrf.mxu1  ;;  %v1404_v23 = vmul.f32 %v1403_v38, %v1396_v44 }
 0x1f1   : > { %v1454_v0 = vadd.f32 %v7723_v9, %v1453_v55 }
 0x1f2   : > { %v1405_v5 = vmul.f32 0.16666667, %v1404_v23 }
 0x1f3   : > { %v1460_v41 = vmul.f32 %v1454_v0, %v1454_v0  ;;  %v4504_v49 = vadd.f32 -0.33333334, %v1454_v0  ;;  %v1457_v22 = vadd.f32 0.33333334, %v1454_v0  ;;  %vm1458_vm6 = vcmp.ge.f32.partialorder %v1454_v0, 1.0 }
 0x1f4   : > { %v1406_v53 = vsel %vm1400_vm4, %v4502_v46, %v1405_v5  ;;  %vm1456_vm7 = vcmp.le.f32.partialorder %v1454_v0, -1.0 }
 0x1f5   : > { %v1407_v40 = vsel %vm1398_vm5, %v1399_v58, %v1406_v53  ;;  %v1461_v34 = vadd.f32 3.0, %v1460_v41 }
 0x1f6   : > { %v1408_v20 = vpack.c.bf16 %v1407_v40, %v1407_v40 }
 0x1f7   : > { %v1462_v59 = vmul.f32 %v1461_v34, %v1454_v0 }
 0x1f8   : > { %1410 = vst [vmem:[#allocation2 + $0x10] sm:$0xf] %v1408_v20 }
 0x1f9   : > { %v1463_v33 = vmul.f32 0.16666667, %v1462_v59 }
 0x1fb   : > { %v1464_v43 = vsel %vm1458_vm6, %v4504_v49, %v1463_v33 }
 0x1fc   : > { %v1465_v10 = vsel %vm1456_vm7, %v1457_v22, %v1464_v43 }
 0x1fd   : > { %v1466_v9 = vpack.c.bf16 %v1465_v10, %v1465_v10 }
 0x1ff   : > { %1467 = vst [vmem:[#allocation2 + $0x14] sm:$0xf] %v1466_v9 }
 0x200 PF: > { %v4737_v47 = vld [vmem:[%s6712_s13 + $0x1c0] sm:$0xf]  ;;  %s5805_s1 = sshll.u32 %s6517_s30, 4  ;;  %p5535_p1 = scmp.ne.s32.totalorder %s6517_s30, 1 }
 0x201   : > { %v5866_v17 = vld [vmem:[%s6712_s13 + $0x1dc] sm:$0xf0]  ;;  %s1592_s3 = scalar_lea.vmem [#allocation2], %s5805_s1 }
 0x202   : > { %v4993_v54 = vld [vmem:[%s6712_s13 + $0x3c0] sm:$0xf]  ;;  %v4738_v2 = vor.u32 %v5866_v17, %v4737_v47 }
 0x203   : > { %v5930_v51 = vld [vmem:[%s6712_s13 + $0x3dc] sm:$0xf0] }
 0x204   : > { %v5249_v7 = vld [vmem:[%s6712_s13 + $0x5c0] sm:$0xf]  ;;  %v4994_v16 = vor.u32 %v5930_v51, %v4993_v54  ;;  %3145 = vmatpush.bf16.msra.mxu0 %v4738_v2 }
 0x205   : > { %v5994_v36 = vld [vmem:[%s6712_s13 + $0x5dc] sm:$0xf0] }
 0x206   : > { %v5250_v25 = vor.u32 %v5994_v36, %v5249_v7  ;;  %v5505_v45 = vld [vmem:[%s6712_s13 + $0x7c0] sm:$0xf]  ;;  %3158 = vmatpush.bf16.msra.mxu1 %v4994_v16 }
 0x207   : > { %v6058_v50 = vld [vmem:[%s6712_s13 + $0x7dc] sm:$0xf0] }
 0x208   : > { %v4705_v26 = vld [vmem:[%s6712_s13 + $0x180] sm:$0xf]  ;;  %v5506_v27 = vor.u32 %v6058_v50, %v5505_v45  ;;  %3171 = vmatpush.bf16.msra.mxu2 %v5250_v25 }
 0x209   : > { %v5858_v11 = vld [vmem:[%s6712_s13 + $0x19c] sm:$0xf0] }
 0x20a   : > { %v4961_v32 = vld [vmem:[%s6712_s13 + $0x380] sm:$0xf]  ;;  %v4706_v37 = vor.u32 %v5858_v11, %v4705_v26  ;;  %3184 = vmatpush.bf16.msra.mxu3 %v5506_v27 }
 0x20b   : > { %v5922_v1 = vld [vmem:[%s6712_s13 + $0x39c] sm:$0xf0] }
 0x20c   : > { %v4962_v3 = vor.u32 %v5922_v1, %v4961_v32  ;;  %v5217_v18 = vld [vmem:[%s6712_s13 + $0x580] sm:$0xf]  ;;  %3146 = vmatpush.bf16.msra.mxu0 %v4706_v37 }
 0x20d   : > { %v5986_v31 = vld [vmem:[%s6712_s13 + $0x59c] sm:$0xf0] }
 0x20e   : > { %v5473_v63 = vld [vmem:[%s6712_s13 + $0x780] sm:$0xf]  ;;  %v5218_v29 = vor.u32 %v5986_v31, %v5217_v18  ;;  %3159 = vmatpush.bf16.msra.mxu1 %v4962_v3 }
 0x20f   : > { %v6050_v8 = vld [vmem:[%s6712_s13 + $0x79c] sm:$0xf0] }
 0x210   : > { %v4673_v14 = vld [vmem:[%s6712_s13 + $0x140] sm:$0xf]  ;;  %v5474_v52 = vor.u32 %v6050_v8, %v5473_v63  ;;  %3172 = vmatpush.bf16.msra.mxu2 %v5218_v29 }
 0x211   : > { %v5850_v60 = vld [vmem:[%s6712_s13 + $0x15c] sm:$0xf0] }
 0x212   : > { %v4929_v42 = vld [vmem:[%s6712_s13 + $0x340] sm:$0xf]  ;;  %v4674_v12 = vor.u32 %v5850_v60, %v4673_v14  ;;  %3185 = vmatpush.bf16.msra.mxu3 %v5474_v52 }
 0x213   : > { %v5914_v4 = vld [vmem:[%s6712_s13 + $0x35c] sm:$0xf0] }
 0x214   : > { %v5185_v61 = vld [vmem:[%s6712_s13 + $0x540] sm:$0xf]  ;;  %v4930_v48 = vor.u32 %v5914_v4, %v4929_v42  ;;  %3147 = vmatpush.bf16.msra.mxu0 %v4674_v12  ;;  %v4739_v12 = vld [vmem:[%s6712_s13 + $0x1e0] sm:$0xf0] }
 0x215   : > { %v5978_v13 = vld [vmem:[%s6712_s13 + $0x55c] sm:$0xf0] }
 0x216   : > { %v5441_v35 = vld [vmem:[%s6712_s13 + $0x740] sm:$0xf]  ;;  %v5186_v24 = vor.u32 %v5978_v13, %v5185_v61  ;;  %3160 = vmatpush.bf16.msra.mxu1 %v4930_v48  ;;  %v5862_v61 = vld [vmem:[%s6712_s13 + $0x1c4] sm:$0xf] }
 0x217   : > { %v6042_v62 = vld [vmem:[%s6712_s13 + $0x75c] sm:$0xf0]  ;;  %v5926_v13 = vld [vmem:[%s6712_s13 + $0x3c4] sm:$0xf] }
 0x218   : > { %v4641_v56 = vld [vmem:[%s6712_s13 + $0x100] sm:$0xf]  ;;  %v5442_v28 = vor.u32 %v6042_v62, %v5441_v35  ;;  %3173 = vmatpush.bf16.msra.mxu2 %v5186_v24  ;;  %v4995_v62 = vld [vmem:[%s6712_s13 + $0x3e0] sm:$0xf0] }
 0x219   : > { %v5842_v19 = vld [vmem:[%s6712_s13 + $0x11c] sm:$0xf0]  ;;  %v5990_v48 = vld [vmem:[%s6712_s13 + $0x5c4] sm:$0xf] }
 0x21a   : > { %v4897_v39 = vld [vmem:[%s6712_s13 + $0x300] sm:$0xf]  ;;  %v4642_v21 = vor.u32 %v5842_v19, %v4641_v56  ;;  %3186 = vmatpush.bf16.msra.mxu3 %v5442_v28  ;;  %v5251_v24 = vld [vmem:[%s6712_s13 + $0x5e0] sm:$0xf0] }
 0x21b   : > { %v5906_v30 = vld [vmem:[%s6712_s13 + $0x31c] sm:$0xf0]  ;;  %v5507_v28 = vld [vmem:[%s6712_s13 + $0x7e0] sm:$0xf0] }
 0x21c   : > { %v5153_v15 = vld [vmem:[%s6712_s13 + $0x500] sm:$0xf]  ;;  %v4898_v38 = vor.u32 %v5906_v30, %v4897_v39  ;;  %3148 = vmatpush.bf16.msra.mxu0 %v4642_v21  ;;  %v6054_v39 = vld [vmem:[%s6712_s13 + $0x7c4] sm:$0xf] }
 0x21d   : > { %v5970_v57 = vld [vmem:[%s6712_s13 + $0x51c] sm:$0xf0]  ;;  %v4707_v21 = vld [vmem:[%s6712_s13 + $0x1a0] sm:$0xf0] }
 0x21e   : > { %v5409_v6 = vld [vmem:[%s6712_s13 + $0x700] sm:$0xf]  ;;  %v5154_v55 = vor.u32 %v5970_v57, %v5153_v15  ;;  %3161 = vmatpush.bf16.msra.mxu1 %v4898_v38  ;;  %v4742_v15 = vor.u32 %v5862_v61, %v4739_v12  ;;  %v4998_v57 = vor.u32 %v5926_v13, %v4995_v62  ;;  %v5918_v38 = vld [vmem:[%s6712_s13 + $0x384] sm:$0xf] }
 0x21f   : > { %v6034_v44 = vld [vmem:[%s6712_s13 + $0x71c] sm:$0xf0]  ;;  %v5958_v61 = vld [vmem:[%s6712_s13 + $0x4c4] sm:$0xf] }
 0x220   : > { %v4609_v23 = vld [vmem:[%s6712_s13 + $0xc0] sm:$0xf]  ;;  %v5410_v5 = vor.u32 %v6034_v44, %v5409_v6  ;;  %3174 = vmatpush.bf16.msra.mxu2 %v5154_v55  ;;  %v5254_v6 = vor.u32 %v5990_v48, %v5251_v24  ;;  %v5854_v44 = vld [vmem:[%s6712_s13 + $0x184] sm:$0xf]  ;;  %v5510_v55 = vor.u32 %v6054_v39, %v5507_v28 }
 0x221   : > { %v5834_v0 = vld [vmem:[%s6712_s13 + $0xdc] sm:$0xf0]  ;;  %v5123_v12 = vld [vmem:[%s6712_s13 + $0x4e0] sm:$0xf0] }
 0x222   : > { %v4865_v46 = vld [vmem:[%s6712_s13 + $0x2c0] sm:$0xf]  ;;  %v4610_v20 = vor.u32 %v5834_v0, %v4609_v23  ;;  %3187 = vmatpush.bf16.msra.mxu3 %v5410_v5  ;;  %v4963_v23 = vld [vmem:[%s6712_s13 + $0x3a0] sm:$0xf0] }
 0x223   : > { %v5898_v58 = vld [vmem:[%s6712_s13 + $0x2dc] sm:$0xf0]  ;;  %v5982_v0 = vld [vmem:[%s6712_s13 + $0x584] sm:$0xf] }
 0x224   : > { %v5121_v41 = vld [vmem:[%s6712_s13 + $0x4c0] sm:$0xf]  ;;  %v4866_v59 = vor.u32 %v5898_v58, %v4865_v46  ;;  %3149 = vmatpush.bf16.msra.mxu0 %v4610_v20  ;;  %v5219_v46 = vld [vmem:[%s6712_s13 + $0x5a0] sm:$0xf0] }
 0x225   : > { %v5962_v53 = vld [vmem:[%s6712_s13 + $0x4dc] sm:$0xf0]  ;;  %v6046_v5 = vld [vmem:[%s6712_s13 + $0x784] sm:$0xf] }
 0x226   : > { %v5377_v40 = vld [vmem:[%s6712_s13 + $0x6c0] sm:$0xf]  ;;  %v5122_v49 = vor.u32 %v5962_v53, %v5121_v41  ;;  %3162 = vmatpush.bf16.msra.mxu1 %v4866_v59  ;;  %v5475_v58 = vld [vmem:[%s6712_s13 + $0x7a0] sm:$0xf0]  ;;  %v4710_v41 = vor.u32 %v5854_v44, %v4707_v21 }
 0x227   : > { %v6026_v34 = vld [vmem:[%s6712_s13 + $0x6dc] sm:$0xf0]  ;;  %v5846_v53 = vld [vmem:[%s6712_s13 + $0x144] sm:$0xf] }
 0x228   : > { %v4577_v33 = vld [vmem:[%s6712_s13 + $0x80] sm:$0xf]  ;;  %v5378_v10 = vor.u32 %v6026_v34, %v5377_v40  ;;  %3175 = vmatpush.bf16.msra.mxu2 %v5122_v49  ;;  %v4966_v40 = vor.u32 %v5918_v38, %v4963_v23  ;;  %v5222_v34 = vor.u32 %v5982_v0, %v5219_v46  ;;  %v4675_v20 = vld [vmem:[%s6712_s13 + $0x160] sm:$0xf0] }
 0x229   : > { %v5826_v22 = vld [vmem:[%s6712_s13 + $0x9c] sm:$0xf0]  ;;  %v5910_v59 = vld [vmem:[%s6712_s13 + $0x344] sm:$0xf] }
 0x22a   : > { %v4833_v43 = vld [vmem:[%s6712_s13 + $0x280] sm:$0xf]  ;;  %v4578_v51 = vor.u32 %v5826_v22, %v4577_v33  ;;  %3188 = vmatpush.bf16.msra.mxu3 %v5378_v10  ;;  %v4931_v49 = vld [vmem:[%s6712_s13 + $0x360] sm:$0xf0]  ;;  %v5478_v33 = vor.u32 %v6046_v5, %v5475_v58 }
 0x22b   : > { %v5890_v9 = vld [vmem:[%s6712_s13 + $0x29c] sm:$0xf0]  ;;  %v5974_v22 = vld [vmem:[%s6712_s13 + $0x544] sm:$0xf] }
 0x22c   : > { %v5089_v47 = vld [vmem:[%s6712_s13 + $0x480] sm:$0xf]  ;;  %v4834_v7 = vor.u32 %v5890_v9, %v4833_v43  ;;  %3150 = vmatpush.bf16.msra.mxu0 %v4578_v51  ;;  %v5187_v43 = vld [vmem:[%s6712_s13 + $0x560] sm:$0xf0] }
 0x22d   : > { %v5954_v17 = vld [vmem:[%s6712_s13 + $0x49c] sm:$0xf0]  ;;  %v6038_v10 = vld [vmem:[%s6712_s13 + $0x744] sm:$0xf] }
 0x22e   : > { %v5345_v54 = vld [vmem:[%s6712_s13 + $0x680] sm:$0xf]  ;;  %v5090_v36 = vor.u32 %v5954_v17, %v5089_v47  ;;  %3163 = vmatpush.bf16.msra.mxu1 %v4834_v7  ;;  %v5443_v9 = vld [vmem:[%s6712_s13 + $0x760] sm:$0xf0]  ;;  %v4934_v7 = vor.u32 %v5910_v59, %v4931_v49 }
 0x22f   : > { %v6018_v2 = vld [vmem:[%s6712_s13 + $0x69c] sm:$0xf0]  ;;  %v5838_v47 = vld [vmem:[%s6712_s13 + $0x104] sm:$0xf] }
 0x230   : > { %v4545_v16 = vld [vmem:[%s6712_s13 + $0x40] sm:$0xf]  ;;  %v5346_v50 = vor.u32 %v6018_v2, %v5345_v54  ;;  %3176 = vmatpush.bf16.msra.mxu2 %v5090_v36  ;;  %v4643_v17 = vld [vmem:[%s6712_s13 + $0x120] sm:$0xf0]  ;;  %v4678_v54 = vor.u32 %v5846_v53, %v4675_v20  ;;  %v5190_v36 = vor.u32 %v5974_v22, %v5187_v43 }
 0x231   : > { %v5818_v25 = vld [vmem:[%s6712_s13 + $0x5c] sm:$0xf0]  ;;  %v5902_v2 = vld [vmem:[%s6712_s13 + $0x304] sm:$0xf] }
 0x232   : > { %v4801_v45 = vld [vmem:[%s6712_s13 + $0x240] sm:$0xf]  ;;  %v4546_v37 = vor.u32 %v5818_v25, %v4545_v16  ;;  %3189 = vmatpush.bf16.msra.mxu3 %v5346_v50  ;;  %v4899_v51 = vld [vmem:[%s6712_s13 + $0x320] sm:$0xf0] }
 0x233   : > { %v5882_v26 = vld [vmem:[%s6712_s13 + $0x25c] sm:$0xf0]  ;;  %v5966_v16 = vld [vmem:[%s6712_s13 + $0x504] sm:$0xf] }
 0x234   : > { %v5057_v27 = vld [vmem:[%s6712_s13 + $0x440] sm:$0xf]  ;;  %v4802_v31 = vor.u32 %v5882_v26, %v4801_v45  ;;  %3151 = vmatpush.bf16.msra.mxu0 %v4546_v37  ;;  %v5155_v25 = vld [vmem:[%s6712_s13 + $0x520] sm:$0xf0]  ;;  %v5446_v45 = vor.u32 %v6038_v10, %v5443_v9  ;;  %v4902_v37 = vor.u32 %v5902_v2, %v4899_v51 }
 0x235   : > { %v5946_v11 = vld [vmem:[%s6712_s13 + $0x45c] sm:$0xf0]  ;;  %v6030_v26 = vld [vmem:[%s6712_s13 + $0x704] sm:$0xf] }
 0x236   : > { %v5313_v32 = vld [vmem:[%s6712_s13 + $0x640] sm:$0xf]  ;;  %v5058_v63 = vor.u32 %v5946_v11, %v5057_v27  ;;  %3164 = vmatpush.bf16.msra.mxu1 %v4802_v31  ;;  %v5411_v27 = vld [vmem:[%s6712_s13 + $0x720] sm:$0xf0] }
 0x237   : > { %v6010_v1 = vld [vmem:[%s6712_s13 + $0x65c] sm:$0xf0]  ;;  %v5830_v31 = vld [vmem:[%s6712_s13 + $0xc4] sm:$0xf] }
 0x238   : > { %v4513_v3 = vld [vmem:[%s6712_s13] sm:$0xf]  ;;  %v5314_v60 = vor.u32 %v6010_v1, %v5313_v32  ;;  %3177 = vmatpush.bf16.msra.mxu2 %v5058_v63  ;;  %v4646_v1 = vor.u32 %v5838_v47, %v4643_v17  ;;  %v4611_v63 = vld [vmem:[%s6712_s13 + $0xe0] sm:$0xf0] }
 0x239   : > { %v5810_v18 = vld [vmem:[%s6712_s13 + $0x1c] sm:$0xf0]  ;;  %v6022_v13 = vld [vmem:[%s6712_s13 + $0x6c4] sm:$0xf]  ;;  %v4614_v24 = vor.u32 %v5830_v31, %v4611_v63 }
 0x23a   : > { %v4769_v29 = vld [vmem:[%s6712_s13 + $0x200] sm:$0xf]  ;;  %v4514_v35 = vor.u32 %v5810_v18, %v4513_v3  ;;  %3190 = vmatpush.bf16.msra.mxu3 %v5314_v60  ;;  %v5158_v3 = vor.u32 %v5966_v16, %v5155_v25  ;;  %v1593_v18 = vld [vmem:[%s1592_s3] sm:$0xff]  ;;  %v5822_v39 = vld [vmem:[%s6712_s13 + $0x84] sm:$0xf] }
 0x23b   : > { %v5874_v8 = vld [vmem:[%s6712_s13 + $0x21c] sm:$0xf0]  ;;  %v1853_v60 = vunpack.c.l.b16 %v1593_v18  ;;  %v4579_v28 = vld [vmem:[%s6712_s13 + $0xa0] sm:$0xf0]  ;;  %v5867_v16 = vld [vmem:[%s6712_s13 + $0x1e4] sm:$0xf0] }
 0x23c   : > { %v5025_v14 = vld [vmem:[%s6712_s13 + $0x400] sm:$0xf]  ;;  %v4770_v56 = vor.u32 %v5874_v8, %v4769_v29  ;;  %3152 = vmatpush.bf16.msra.mxu0 %v4514_v35  ;;  %v5894_v29 = vld [vmem:[%s6712_s13 + $0x2c4] sm:$0xf]  ;;  %v5001_v25 = vld [vmem:[%s6712_s13 + $0x3c8] sm:$0xf] }
 0x23d   : > { %v5938_v52 = vld [vmem:[%s6712_s13 + $0x41c] sm:$0xf0]  ;;  %v5379_v35 = vld [vmem:[%s6712_s13 + $0x6e0] sm:$0xf0]  ;;  %v7844_v62 = vpack.c.b16 %v1853_v60, %v1853_v60  ;;  %v5859_v60 = vld [vmem:[%s6712_s13 + $0x1a4] sm:$0xf0] }
 0x23e   : > { %v5281_v42 = vld [vmem:[%s6712_s13 + $0x600] sm:$0xf]  ;;  %v5026_v19 = vor.u32 %v5938_v52, %v5025_v14  ;;  %3165 = vmatpush.bf16.msra.mxu1 %v4770_v56  ;;  %v1854_v52 = vunpack.c.h.b16 %v1593_v18  ;;  %v5091_v44 = vld [vmem:[%s6712_s13 + $0x4a0] sm:$0xf0] }
 0x23f   : > { %v6002_v4 = vld [vmem:[%s6712_s13 + $0x61c] sm:$0xf0]  ;;  %3153 = vmatmul.bf16.vlgmr.msra.gmra.mxu0 %v7844_v62  ;;  %v6014_v21 = vld [vmem:[%s6712_s13 + $0x684] sm:$0xf] }
 0x240   : > { %v5282_v30 = vor.u32 %v6002_v4, %v5281_v42  ;;  %3178 = vmatpush.bf16.msra.mxu2 %v5026_v19  ;;  %3197 = vmatpush.bf16.msrb.mxu0 %v4742_v15  ;;  %v1594_v50 = vld [vmem:[%s1592_s3 + $0x8] sm:$0xff]  ;;  %v5414_v42 = vor.u32 %v6030_v26, %v5411_v27  ;;  %v7846_v48 = vpack.c.b16 %v1854_v52, %v1854_v52  ;;  %v5257_v26 = vld [vmem:[%s6712_s13 + $0x5c8] sm:$0xf] }
 0x241   : > { %v1855_v11 = vunpack.c.l.b16 %v1594_v50  ;;  %v1856_v32 = vunpack.c.h.b16 %v1594_v50  ;;  %v4867_v4 = vld [vmem:[%s6712_s13 + $0x2e0] sm:$0xf0]  ;;  %v5126_v19 = vor.u32 %v5958_v61, %v5123_v12  ;;  %v5382_v15 = vor.u32 %v6022_v13, %v5379_v35  ;;  %v5931_v50 = vld [vmem:[%s6712_s13 + $0x3e4] sm:$0xf0] }
 0x242   : > { %3191 = vmatpush.bf16.msra.mxu3 %v5282_v30  ;;  %3210 = vmatpush.bf16.msrb.mxu1 %v4998_v57  ;;  %v4870_v56 = vor.u32 %v5894_v29, %v4867_v4  ;;  %v5886_v30 = vld [vmem:[%s6712_s13 + $0x284] sm:$0xf]  ;;  %v5995_v27 = vld [vmem:[%s6712_s13 + $0x5e4] sm:$0xf0]  ;;  %v5002_v31 = vor.u32 %v5931_v50, %v5001_v25 }
 0x243   : > { %v7833_v8 = vpack.c.b16 %v1855_v11, %v1855_v11  ;;  %v7835_v14 = vpack.c.b16 %v1856_v32, %v1856_v32  ;;  %v4835_v57 = vld [vmem:[%s6712_s13 + $0x2a0] sm:$0xf0]  ;;  %3166 = vmatmul.bf16.vlgmr.msra.gmra.mxu1 %v7846_v48  ;;  %v5258_v63 = vor.u32 %v5995_v27, %v5257_v26  ;;  %v4713_v29 = vld [vmem:[%s6712_s13 + $0x188] sm:$0xf] }
 0x244   : > { %3223 = vmatpush.bf16.msrb.mxu2 %v5254_v6  ;;  %3198 = vmatpush.bf16.msrb.mxu0 %v4710_v41  ;;  %v5950_v6 = vld [vmem:[%s6712_s13 + $0x484] sm:$0xf]  ;;  %v4838_v23 = vor.u32 %v5886_v30, %v4835_v57  ;;  %v4969_v52 = vld [vmem:[%s6712_s13 + $0x388] sm:$0xf] }
 0x245   : > { %3179 = vmatmul.bf16.vlgmr.msra.gmra.mxu2 %v7833_v8  ;;  %3192 = vmatmul.bf16.vlgmr.msra.gmra.mxu3 %v7835_v14  ;;  %v5347_v38 = vld [vmem:[%s6712_s13 + $0x6a0] sm:$0xf0]  ;;  %v5094_v0 = vor.u32 %v5950_v6, %v5091_v44  ;;  %v5923_v4 = vld [vmem:[%s6712_s13 + $0x3a4] sm:$0xf0] }
 0x246   : > { %3236 = vmatpush.bf16.msrb.mxu3 %v5510_v55  ;;  %3211 = vmatpush.bf16.msrb.mxu1 %v4966_v40  ;;  %v4582_v55 = vor.u32 %v5822_v39, %v4579_v28  ;;  %v5814_v46 = vld [vmem:[%s6712_s13 + $0x44] sm:$0xf]  ;;  %v5350_v41 = vor.u32 %v6014_v21, %v5347_v38  ;;  %v5225_v61 = vld [vmem:[%s6712_s13 + $0x588] sm:$0xf] }
 0x247   : > { %v4547_v5 = vld [vmem:[%s6712_s13 + $0x60] sm:$0xf0]  ;;  %v5987_v12 = vld [vmem:[%s6712_s13 + $0x5a4] sm:$0xf0] }
 0x248   : > { %3224 = vmatpush.bf16.msrb.mxu2 %v5222_v34  ;;  %3199 = vmatpush.bf16.msrb.mxu0 %v4678_v54  ;;  %v5878_v58 = vld [vmem:[%s6712_s13 + $0x244] sm:$0xf]  ;;  %v4550_v49 = vor.u32 %v5814_v46, %v4547_v5  ;;  %v5481_v13 = vld [vmem:[%s6712_s13 + $0x788] sm:$0xf] }
 0x249   : > { %v4803_v53 = vld [vmem:[%s6712_s13 + $0x260] sm:$0xf0]  ;;  %v6051_v35 = vld [vmem:[%s6712_s13 + $0x7a4] sm:$0xf0] }
 0x24a   : > { %3237 = vmatpush.bf16.msrb.mxu3 %v5478_v33  ;;  %3212 = vmatpush.bf16.msrb.mxu1 %v4934_v7  ;;  %v5942_v40 = vld [vmem:[%s6712_s13 + $0x444] sm:$0xf]  ;;  %v4806_v43 = vor.u32 %v5878_v58, %v4803_v53  ;;  %v4681_v39 = vld [vmem:[%s6712_s13 + $0x148] sm:$0xf] }
 0x24b   : > { %v5059_v34 = vld [vmem:[%s6712_s13 + $0x460] sm:$0xf0]  ;;  %v5851_v28 = vld [vmem:[%s6712_s13 + $0x164] sm:$0xf0] }
 0x24c   : > { %3225 = vmatpush.bf16.msrb.mxu2 %v5190_v36  ;;  %3200 = vmatpush.bf16.msrb.mxu0 %v4646_v1  ;;  %v6006_v20 = vld [vmem:[%s6712_s13 + $0x644] sm:$0xf]  ;;  %v5062_v10 = vor.u32 %v5942_v40, %v5059_v34  ;;  %v4745_v36 = vld [vmem:[%s6712_s13 + $0x1c8] sm:$0xf] }
 0x24d   : > { %v5315_v59 = vld [vmem:[%s6712_s13 + $0x660] sm:$0xf0]  ;;  %v5513_v1 = vld [vmem:[%s6712_s13 + $0x7c8] sm:$0xf]  ;;  %v4746_v18 = vor.u32 %v5867_v16, %v4745_v36 }
 0x24e   : > { %3238 = vmatpush.bf16.msrb.mxu3 %v5446_v45  ;;  %3213 = vmatpush.bf16.msrb.mxu1 %v4902_v37  ;;  %v5806_v33 = vld [vmem:[%s6712_s13 + $0x4] sm:$0xf]  ;;  %v5318_v54 = vor.u32 %v6006_v20, %v5315_v59  ;;  %v6059_v37 = vld [vmem:[%s6712_s13 + $0x7e4] sm:$0xf0] }
 0x24f   : > { %v4515_v22 = vld [vmem:[%s6712_s13 + $0x20] sm:$0xf0]  ;;  %v4937_v30 = vld [vmem:[%s6712_s13 + $0x348] sm:$0xf] }
 0x250   : > { %3226 = vmatpush.bf16.msrb.mxu2 %v5158_v3  ;;  %3201 = vmatpush.bf16.msrb.mxu0 %v4614_v24  ;;  %v5870_v9 = vld [vmem:[%s6712_s13 + $0x204] sm:$0xf]  ;;  %v4518_v45 = vor.u32 %v5806_v33, %v4515_v22  ;;  %v4714_v24 = vor.u32 %v5859_v60, %v4713_v29  ;;  %v5915_v57 = vld [vmem:[%s6712_s13 + $0x364] sm:$0xf0] }
 0x251   : > { %v4771_v47 = vld [vmem:[%s6712_s13 + $0x220] sm:$0xf0]  ;;  %v5193_v6 = vld [vmem:[%s6712_s13 + $0x548] sm:$0xf] }
 0x252   : > { %3239 = vmatpush.bf16.msrb.mxu3 %v5414_v42  ;;  %3214 = vmatpush.bf16.msrb.mxu1 %v4870_v56  ;;  %v5934_v17 = vld [vmem:[%s6712_s13 + $0x404] sm:$0xf]  ;;  %v4774_v11 = vor.u32 %v5870_v9, %v4771_v47  ;;  %v5514_v42 = vor.u32 %v6059_v37, %v5513_v1  ;;  %v4970_v56 = vor.u32 %v5923_v4, %v4969_v52  ;;  %v5979_v44 = vld [vmem:[%s6712_s13 + $0x564] sm:$0xf0] }
 0x253   : > { %v5027_v2 = vld [vmem:[%s6712_s13 + $0x420] sm:$0xf0]  ;;  %v5449_v21 = vld [vmem:[%s6712_s13 + $0x748] sm:$0xf] }
 0x254   : > { %3227 = vmatpush.bf16.msrb.mxu2 %v5126_v19  ;;  %3202 = vmatpush.bf16.msrb.mxu0 %v4582_v55  ;;  %v5998_v51 = vld [vmem:[%s6712_s13 + $0x604] sm:$0xf]  ;;  %v5030_v32 = vor.u32 %v5934_v17, %v5027_v2  ;;  %v5226_v19 = vor.u32 %v5987_v12, %v5225_v61  ;;  %v6043_v38 = vld [vmem:[%s6712_s13 + $0x764] sm:$0xf0]  ;;  %v4682_v55 = vor.u32 %v5851_v28, %v4681_v39 }
 0x255   : > { %v5283_v7 = vld [vmem:[%s6712_s13 + $0x620] sm:$0xf0]  ;;  %v4649_v46 = vld [vmem:[%s6712_s13 + $0x108] sm:$0xf] }
 0x256   : > { %3240 = vmatpush.bf16.msrb.mxu3 %v5382_v15  ;;  %3215 = vmatpush.bf16.msrb.mxu1 %v4838_v23  ;;  %v5286_v3 = vor.u32 %v5998_v51, %v5283_v7  ;;  %v5482_v15 = vor.u32 %v6051_v35, %v5481_v13  ;;  %v4938_v23 = vor.u32 %v5915_v57, %v4937_v30  ;;  %v5843_v5 = vld [vmem:[%s6712_s13 + $0x124] sm:$0xf0] }
 0x257   : > { %v4905_v58 = vld [vmem:[%s6712_s13 + $0x308] sm:$0xf] }
 0x258   : > { %3228 = vmatpush.bf16.msrb.mxu2 %v5094_v0  ;;  %3203 = vmatpush.bf16.msrb.mxu0 %v4550_v49  ;;  %v5194_v0 = vor.u32 %v5979_v44, %v5193_v6  ;;  %v5907_v53 = vld [vmem:[%s6712_s13 + $0x324] sm:$0xf0]  ;;  %v4650_v49 = vor.u32 %v5843_v5, %v4649_v46  ;;  %v5003_v5 = vld [vmem:[%s6712_s13 + $0x3e8] sm:$0xf0] }
 0x259   : > { %v5161_v40 = vld [vmem:[%s6712_s13 + $0x508] sm:$0xf]  ;;  %v4906_v33 = vor.u32 %v5907_v53, %v4905_v58  ;;  %v5991_v58 = vld [vmem:[%s6712_s13 + $0x5cc] sm:$0xf] }
 0x25a   : > { %3241 = vmatpush.bf16.msrb.mxu3 %v5350_v41  ;;  %3216 = vmatpush.bf16.msrb.mxu1 %v4806_v43  ;;  %v5450_v41 = vor.u32 %v6043_v38, %v5449_v21  ;;  %v5971_v34 = vld [vmem:[%s6712_s13 + $0x524] sm:$0xf0] }
 0x25b   : > { %v5417_v20 = vld [vmem:[%s6712_s13 + $0x708] sm:$0xf]  ;;  %v5162_v22 = vor.u32 %v5971_v34, %v5161_v40  ;;  %v6055_v34 = vld [vmem:[%s6712_s13 + $0x7cc] sm:$0xf] }
 0x25c   : > { %3229 = vmatpush.bf16.msrb.mxu2 %v5062_v10  ;;  %3204 = vmatpush.bf16.msrb.mxu0 %v4518_v45  ;;  %v6035_v59 = vld [vmem:[%s6712_s13 + $0x724] sm:$0xf0] }
 0x25d   : > { %v4617_v43 = vld [vmem:[%s6712_s13 + $0xc8] sm:$0xf]  ;;  %v5418_v47 = vor.u32 %v6035_v59, %v5417_v20  ;;  %v5515_v20 = vld [vmem:[%s6712_s13 + $0x7e8] sm:$0xf0] }
 0x25e   : > { %3242 = vmatpush.bf16.msrb.mxu3 %v5318_v54  ;;  %3217 = vmatpush.bf16.msrb.mxu1 %v4774_v11  ;;  %v5835_v10 = vld [vmem:[%s6712_s13 + $0xe4] sm:$0xf0] }
 0x25f   : > { %3205 = vmatmul.bf16.vlgmr.msrb.gmra.mxu0 %v7844_v62  ;;  %v4873_v9 = vld [vmem:[%s6712_s13 + $0x2c8] sm:$0xf]  ;;  %v4618_v36 = vor.u32 %v5835_v10, %v4617_v43  ;;  %v5855_v43 = vld [vmem:[%s6712_s13 + $0x18c] sm:$0xf] }
 0x260   : > { %3230 = vmatpush.bf16.msrb.mxu2 %v5030_v32  ;;  %3249 = vmatpush.bf16.msra.mxu0 %v4746_v18  ;;  %v5899_v17 = vld [vmem:[%s6712_s13 + $0x2e4] sm:$0xf0]  ;;  %v4715_v10 = vld [vmem:[%s6712_s13 + $0x1a8] sm:$0xf0] }
 0x261   : > { %3218 = vmatmul.bf16.vlgmr.msrb.gmra.mxu1 %v7846_v48  ;;  %v5129_v54 = vld [vmem:[%s6712_s13 + $0x4c8] sm:$0xf]  ;;  %v4874_v16 = vor.u32 %v5899_v17, %v4873_v9  ;;  %v5919_v9 = vld [vmem:[%s6712_s13 + $0x38c] sm:$0xf] }
 0x262   : > { %3243 = vmatpush.bf16.msrb.mxu3 %v5286_v3  ;;  %3262 = vmatpush.bf16.msra.mxu1 %v5002_v31  ;;  %v5963_v2 = vld [vmem:[%s6712_s13 + $0x4e4] sm:$0xf0]  ;;  %v4971_v17 = vld [vmem:[%s6712_s13 + $0x3a8] sm:$0xf0] }
 0x263   : > { %3231 = vmatmul.bf16.vlgmr.msrb.gmra.mxu2 %v7833_v8  ;;  %v5385_v51 = vld [vmem:[%s6712_s13 + $0x6c8] sm:$0xf]  ;;  %v5130_v25 = vor.u32 %v5963_v2, %v5129_v54  ;;  %v5983_v54 = vld [vmem:[%s6712_s13 + $0x58c] sm:$0xf] }
 0x264   : > { %3275 = vmatpush.bf16.msra.mxu2 %v5258_v63  ;;  %3250 = vmatpush.bf16.msra.mxu0 %v4714_v24  ;;  %v6027_v7 = vld [vmem:[%s6712_s13 + $0x6e4] sm:$0xf0]  ;;  %v5227_v2 = vld [vmem:[%s6712_s13 + $0x5a8] sm:$0xf0] }
 0x265   : > { %3244 = vmatmul.bf16.vlgmr.msrb.gmra.mxu3 %v7835_v14  ;;  %v4585_v45 = vld [vmem:[%s6712_s13 + $0x88] sm:$0xf]  ;;  %v5386_v27 = vor.u32 %v6027_v7, %v5385_v51  ;;  %v6047_v51 = vld [vmem:[%s6712_s13 + $0x78c] sm:$0xf] }
 0x266   : > { %3288 = vmatpush.bf16.msra.mxu3 %v5514_v42  ;;  %3263 = vmatpush.bf16.msra.mxu1 %v4970_v56  ;;  %v5827_v50 = vld [vmem:[%s6712_s13 + $0xa4] sm:$0xf0]  ;;  %v5483_v7 = vld [vmem:[%s6712_s13 + $0x7a8] sm:$0xf0] }
 0x267   : > { %v4841_v26 = vld [vmem:[%s6712_s13 + $0x288] sm:$0xf]  ;;  %v4586_v18 = vor.u32 %v5827_v50, %v4585_v45  ;;  %v5847_v45 = vld [vmem:[%s6712_s13 + $0x14c] sm:$0xf] }
 0x268   : > { %3276 = vmatpush.bf16.msra.mxu2 %v5226_v19  ;;  %3251 = vmatpush.bf16.msra.mxu0 %v4682_v55  ;;  %v5891_v11 = vld [vmem:[%s6712_s13 + $0x2a4] sm:$0xf0]  ;;  %v5863_v55 = vld [vmem:[%s6712_s13 + $0x1cc] sm:$0xf] }
 0x269   : > { %v5097_v32 = vld [vmem:[%s6712_s13 + $0x488] sm:$0xf]  ;;  %v4842_v31 = vor.u32 %v5891_v11, %v4841_v26  ;;  %v4683_v50 = vld [vmem:[%s6712_s13 + $0x168] sm:$0xf0] }
 0x26a   : > { %3289 = vmatpush.bf16.msra.mxu3 %v5482_v15  ;;  %3264 = vmatpush.bf16.msra.mxu1 %v4938_v23  ;;  %v5955_v1 = vld [vmem:[%s6712_s13 + $0x4a4] sm:$0xf0]  ;;  %v4747_v23 = vld [vmem:[%s6712_s13 + $0x1e8] sm:$0xf0] }
 0x26b   : > { %v5353_v37 = vld [vmem:[%s6712_s13 + $0x688] sm:$0xf]  ;;  %v5098_v63 = vor.u32 %v5955_v1, %v5097_v32  ;;  %v5911_v26 = vld [vmem:[%s6712_s13 + $0x34c] sm:$0xf] }
 0x26c   : > { %3277 = vmatpush.bf16.msra.mxu2 %v5194_v0  ;;  %3252 = vmatpush.bf16.msra.mxu0 %v4650_v49  ;;  %v6019_v3 = vld [vmem:[%s6712_s13 + $0x6a4] sm:$0xf0]  ;;  %v5927_v0 = vld [vmem:[%s6712_s13 + $0x3cc] sm:$0xf]  ;;  %v4750_v49 = vor.u32 %v5863_v55, %v4747_v23 }
 0x26d   : > { %v4553_v29 = vld [vmem:[%s6712_s13 + $0x48] sm:$0xf]  ;;  %v5354_v42 = vor.u32 %v6019_v3, %v5353_v37  ;;  %v4939_v11 = vld [vmem:[%s6712_s13 + $0x368] sm:$0xf0] }
 0x26e   : > { %3290 = vmatpush.bf16.msra.mxu3 %v5450_v41  ;;  %3265 = vmatpush.bf16.msra.mxu1 %v4906_v33  ;;  %v5819_v60 = vld [vmem:[%s6712_s13 + $0x64] sm:$0xf0]  ;;  %v5259_v41 = vld [vmem:[%s6712_s13 + $0x5e8] sm:$0xf0]  ;;  %v5006_v33 = vor.u32 %v5927_v0, %v5003_v5 }
 0x26f   : > { %v4809_v52 = vld [vmem:[%s6712_s13 + $0x248] sm:$0xf]  ;;  %v4554_v24 = vor.u32 %v5819_v60, %v4553_v29  ;;  %v5975_v32 = vld [vmem:[%s6712_s13 + $0x54c] sm:$0xf] }
 0x270   : > { %3278 = vmatpush.bf16.msra.mxu2 %v5162_v22  ;;  %3253 = vmatpush.bf16.msra.mxu0 %v4618_v36  ;;  %v5883_v4 = vld [vmem:[%s6712_s13 + $0x264] sm:$0xf0]  ;;  %v5262_v22 = vor.u32 %v5991_v58, %v5259_v41  ;;  %v4718_v36 = vor.u32 %v5855_v43, %v4715_v10  ;;  %v5195_v1 = vld [vmem:[%s6712_s13 + $0x568] sm:$0xf0] }
 0x271   : > { %v5065_v61 = vld [vmem:[%s6712_s13 + $0x448] sm:$0xf]  ;;  %v4810_v39 = vor.u32 %v5883_v4, %v4809_v52  ;;  %v6039_v37 = vld [vmem:[%s6712_s13 + $0x74c] sm:$0xf] }
 0x272   : > { %3291 = vmatpush.bf16.msra.mxu3 %v5418_v47  ;;  %3266 = vmatpush.bf16.msra.mxu1 %v4874_v16  ;;  %v5947_v12 = vld [vmem:[%s6712_s13 + $0x464] sm:$0xf0]  ;;  %v5518_v47 = vor.u32 %v6055_v34, %v5515_v20  ;;  %v4974_v16 = vor.u32 %v5919_v9, %v4971_v17  ;;  %v5451_v3 = vld [vmem:[%s6712_s13 + $0x768] sm:$0xf0] }
 0x273   : > { %v5321_v13 = vld [vmem:[%s6712_s13 + $0x648] sm:$0xf]  ;;  %v5066_v28 = vor.u32 %v5947_v12, %v5065_v61  ;;  %v5839_v29 = vld [vmem:[%s6712_s13 + $0x10c] sm:$0xf] }
 0x274   : > { %3279 = vmatpush.bf16.msra.mxu2 %v5130_v25  ;;  %v6011_v35 = vld [vmem:[%s6712_s13 + $0x664] sm:$0xf0]  ;;  %3254 = vmatpush.bf16.msra.mxu0 %v4586_v18  ;;  %v5230_v25 = vor.u32 %v5983_v54, %v5227_v2  ;;  %v4686_v18 = vor.u32 %v5847_v45, %v4683_v50  ;;  %v4651_v60 = vld [vmem:[%s6712_s13 + $0x128] sm:$0xf0] }
 0x275   : > { %v4521_v56 = vld [vmem:[%s6712_s13 + $0x8] sm:$0xf]  ;;  %v5322_v6 = vor.u32 %v6011_v35, %v5321_v13  ;;  %v5903_v52 = vld [vmem:[%s6712_s13 + $0x30c] sm:$0xf] }
 0x276   : > { %3292 = vmatpush.bf16.msra.mxu3 %v5386_v27  ;;  %v5811_v19 = vld [vmem:[%s6712_s13 + $0x24] sm:$0xf0]  ;;  %3267 = vmatpush.bf16.msra.mxu1 %v4842_v31  ;;  %v5486_v27 = vor.u32 %v6047_v51, %v5483_v7  ;;  %v4942_v31 = vor.u32 %v5911_v26, %v4939_v11  ;;  %v4907_v4 = vld [vmem:[%s6712_s13 + $0x328] sm:$0xf0] }
 0x277   : > { %v4777_v30 = vld [vmem:[%s6712_s13 + $0x208] sm:$0xf]  ;;  %v4522_v46 = vor.u32 %v5811_v19, %v4521_v56  ;;  %v5967_v61 = vld [vmem:[%s6712_s13 + $0x50c] sm:$0xf]  ;;  %v4910_v56 = vor.u32 %v5903_v52, %v4907_v4  ;;  %v5265_v52 = vld [vmem:[%s6712_s13 + $0x5d0] sm:$0xf] }
 0x278   : > { %3280 = vmatpush.bf16.msra.mxu2 %v5098_v63  ;;  %v5875_v15 = vld [vmem:[%s6712_s13 + $0x224] sm:$0xf0]  ;;  %3255 = vmatpush.bf16.msra.mxu0 %v4554_v24  ;;  %v5198_v63 = vor.u32 %v5975_v32, %v5195_v1  ;;  %v5163_v12 = vld [vmem:[%s6712_s13 + $0x528] sm:$0xf0]  ;;  %v4654_v24 = vor.u32 %v5839_v29, %v4651_v60  ;;  %v5932_v60 = vld [vmem:[%s6712_s13 + $0x3ec] sm:$0xf0] }
 0x279   : > { %v5033_v57 = vld [vmem:[%s6712_s13 + $0x408] sm:$0xf]  ;;  %v4778_v53 = vor.u32 %v5875_v15, %v4777_v30  ;;  %v6031_v13 = vld [vmem:[%s6712_s13 + $0x70c] sm:$0xf]  ;;  %v5166_v19 = vor.u32 %v5967_v61, %v5163_v12  ;;  %v5521_v12 = vld [vmem:[%s6712_s13 + $0x7d0] sm:$0xf] }
 0x27a   : > { %3293 = vmatpush.bf16.msra.mxu3 %v5354_v42  ;;  %v5939_v44 = vld [vmem:[%s6712_s13 + $0x424] sm:$0xf0]  ;;  %3268 = vmatpush.bf16.msra.mxu1 %v4810_v39  ;;  %v5454_v42 = vor.u32 %v6039_v37, %v5451_v3  ;;  %v5419_v35 = vld [vmem:[%s6712_s13 + $0x728] sm:$0xf0] }
 0x27b   : > { %v5289_v21 = vld [vmem:[%s6712_s13 + $0x608] sm:$0xf]  ;;  %v5034_v40 = vor.u32 %v5939_v44, %v5033_v57  ;;  %v5831_v39 = vld [vmem:[%s6712_s13 + $0xcc] sm:$0xf]  ;;  %v5422_v15 = vor.u32 %v6031_v13, %v5419_v35  ;;  %v6060_v13 = vld [vmem:[%s6712_s13 + $0x7ec] sm:$0xf0] }
 0x27c   : > { %v6003_v38 = vld [vmem:[%s6712_s13 + $0x624] sm:$0xf0]  ;;  %3281 = vmatpush.bf16.msra.mxu2 %v5066_v28  ;;  %3256 = vmatpush.bf16.msra.mxu0 %v4522_v46  ;;  %v4619_v28 = vld [vmem:[%s6712_s13 + $0xe8] sm:$0xf0] }
 0x27d   : > { %v5290_v59 = vor.u32 %v6003_v38, %v5289_v21  ;;  %v5895_v30 = vld [vmem:[%s6712_s13 + $0x2cc] sm:$0xf]  ;;  %v4622_v55 = vor.u32 %v5831_v39, %v4619_v28  ;;  %v4721_v39 = vld [vmem:[%s6712_s13 + $0x190] sm:$0xf] }
 0x27e   : > { %3294 = vmatpush.bf16.msra.mxu3 %v5322_v6  ;;  %3269 = vmatpush.bf16.msra.mxu1 %v4778_v53  ;;  %v4875_v57 = vld [vmem:[%s6712_s13 + $0x2e8] sm:$0xf0]  ;;  %v5860_v28 = vld [vmem:[%s6712_s13 + $0x1ac] sm:$0xf0] }
 0x27f   : > { %3257 = vmatmul.bf16.vlgmr.msra.gmra.mxu0 %v7844_v62  ;;  %v5959_v6 = vld [vmem:[%s6712_s13 + $0x4cc] sm:$0xf]  ;;  %v4878_v23 = vor.u32 %v5895_v30, %v4875_v57  ;;  %v4977_v30 = vld [vmem:[%s6712_s13 + $0x390] sm:$0xf] }
 0x280   : > { %3282 = vmatpush.bf16.msra.mxu2 %v5034_v40  ;;  %3301 = vmatpush.bf16.msrb.mxu0 %v4750_v49  ;;  %v5131_v44 = vld [vmem:[%s6712_s13 + $0x4e8] sm:$0xf0]  ;;  %v5924_v57 = vld [vmem:[%s6712_s13 + $0x3ac] sm:$0xf0] }
 0x281   : > { %3270 = vmatmul.bf16.vlgmr.msra.gmra.mxu1 %v7846_v48  ;;  %v6023_v21 = vld [vmem:[%s6712_s13 + $0x6cc] sm:$0xf]  ;;  %v5134_v0 = vor.u32 %v5959_v6, %v5131_v44  ;;  %v5233_v6 = vld [vmem:[%s6712_s13 + $0x590] sm:$0xf] }
 0x282   : > { %3295 = vmatpush.bf16.msra.mxu3 %v5290_v59  ;;  %3314 = vmatpush.bf16.msrb.mxu1 %v5006_v33  ;;  %v5387_v38 = vld [vmem:[%s6712_s13 + $0x6e8] sm:$0xf0]  ;;  %v5988_v44 = vld [vmem:[%s6712_s13 + $0x5ac] sm:$0xf0] }
 0x283   : > { %3283 = vmatmul.bf16.vlgmr.msra.gmra.mxu2 %v7833_v8  ;;  %v5823_v46 = vld [vmem:[%s6712_s13 + $0x8c] sm:$0xf]  ;;  %v5390_v41 = vor.u32 %v6023_v21, %v5387_v38  ;;  %v5489_v21 = vld [vmem:[%s6712_s13 + $0x790] sm:$0xf] }
 0x284   : > { %3327 = vmatpush.bf16.msrb.mxu2 %v5262_v22  ;;  %3302 = vmatpush.bf16.msrb.mxu0 %v4718_v36  ;;  %v4587_v5 = vld [vmem:[%s6712_s13 + $0xa8] sm:$0xf0]  ;;  %v6052_v38 = vld [vmem:[%s6712_s13 + $0x7ac] sm:$0xf0] }
 0x285   : > { %3296 = vmatmul.bf16.vlgmr.msra.gmra.mxu3 %v7835_v14  ;;  %v5887_v58 = vld [vmem:[%s6712_s13 + $0x28c] sm:$0xf]  ;;  %v4590_v49 = vor.u32 %v5823_v46, %v4587_v5  ;;  %v4689_v46 = vld [vmem:[%s6712_s13 + $0x150] sm:$0xf] }
 0x286   : > { %3340 = vmatpush.bf16.msrb.mxu3 %v5518_v47  ;;  %3315 = vmatpush.bf16.msrb.mxu1 %v4974_v16  ;;  %v4843_v53 = vld [vmem:[%s6712_s13 + $0x2a8] sm:$0xf0]  ;;  %v5852_v5 = vld [vmem:[%s6712_s13 + $0x16c] sm:$0xf0] }
 0x287   : > { %v5951_v40 = vld [vmem:[%s6712_s13 + $0x48c] sm:$0xf]  ;;  %v4846_v33 = vor.u32 %v5887_v58, %v4843_v53  ;;  %v4945_v58 = vld [vmem:[%s6712_s13 + $0x350] sm:$0xf] }
 0x288   : > { %3328 = vmatpush.bf16.msrb.mxu2 %v5230_v25  ;;  %3303 = vmatpush.bf16.msrb.mxu0 %v4686_v18  ;;  %v5099_v34 = vld [vmem:[%s6712_s13 + $0x4a8] sm:$0xf0]  ;;  %v4753_v18 = vld [vmem:[%s6712_s13 + $0x1d0] sm:$0xf] }
 0x289   : > { %v6015_v20 = vld [vmem:[%s6712_s13 + $0x68c] sm:$0xf]  ;;  %v5102_v22 = vor.u32 %v5951_v40, %v5099_v34  ;;  %v5916_v53 = vld [vmem:[%s6712_s13 + $0x36c] sm:$0xf0] }
 0x28a   : > { %3341 = vmatpush.bf16.msrb.mxu3 %v5486_v27  ;;  %3316 = vmatpush.bf16.msrb.mxu1 %v4942_v31  ;;  %v5355_v59 = vld [vmem:[%s6712_s13 + $0x6a8] sm:$0xf0]  ;;  %v5868_v31 = vld [vmem:[%s6712_s13 + $0x1ec] sm:$0xf0] }
 0x28b   : > { %v5815_v43 = vld [vmem:[%s6712_s13 + $0x4c] sm:$0xf]  ;;  %v5358_v47 = vor.u32 %v6015_v20, %v5355_v59  ;;  %v5201_v40 = vld [vmem:[%s6712_s13 + $0x550] sm:$0xf] }
 0x28c   : > { %3329 = vmatpush.bf16.msrb.mxu2 %v5198_v63  ;;  %3304 = vmatpush.bf16.msrb.mxu0 %v4654_v24  ;;  %v4555_v10 = vld [vmem:[%s6712_s13 + $0x68] sm:$0xf0]  ;;  %v5009_v63 = vld [vmem:[%s6712_s13 + $0x3d0] sm:$0xf]  ;;  %v4754_v24 = vor.u32 %v5868_v31, %v4753_v18 }
 0x28d   : > { %v5879_v9 = vld [vmem:[%s6712_s13 + $0x24c] sm:$0xf]  ;;  %v4558_v36 = vor.u32 %v5815_v43, %v4555_v10  ;;  %v5980_v34 = vld [vmem:[%s6712_s13 + $0x56c] sm:$0xf0] }
 0x28e   : > { %3342 = vmatpush.bf16.msrb.mxu3 %v5454_v42  ;;  %3317 = vmatpush.bf16.msrb.mxu1 %v4910_v56  ;;  %v4811_v17 = vld [vmem:[%s6712_s13 + $0x268] sm:$0xf0]  ;;  %v5996_v42 = vld [vmem:[%s6712_s13 + $0x5ec] sm:$0xf0]  ;;  %v5010_v56 = vor.u32 %v5932_v60, %v5009_v63 }
 0x28f   : > { %v5943_v54 = vld [vmem:[%s6712_s13 + $0x44c] sm:$0xf]  ;;  %v4814_v45 = vor.u32 %v5879_v9, %v4811_v17  ;;  %v5457_v20 = vld [vmem:[%s6712_s13 + $0x750] sm:$0xf] }
 0x290   : > { %3330 = vmatpush.bf16.msrb.mxu2 %v5166_v19  ;;  %3305 = vmatpush.bf16.msrb.mxu0 %v4622_v55  ;;  %v5067_v2 = vld [vmem:[%s6712_s13 + $0x468] sm:$0xf0]  ;;  %v5266_v19 = vor.u32 %v5996_v42, %v5265_v52  ;;  %v4722_v55 = vor.u32 %v5860_v28, %v4721_v39  ;;  %v6044_v59 = vld [vmem:[%s6712_s13 + $0x76c] sm:$0xf0] }
 0x291   : > { %v6007_v51 = vld [vmem:[%s6712_s13 + $0x64c] sm:$0xf]  ;;  %v5070_v50 = vor.u32 %v5943_v54, %v5067_v2  ;;  %v4657_v43 = vld [vmem:[%s6712_s13 + $0x110] sm:$0xf] }
 0x292   : > { %3343 = vmatpush.bf16.msrb.mxu3 %v5422_v15  ;;  %3318 = vmatpush.bf16.msrb.mxu1 %v4878_v23  ;;  %v5323_v7 = vld [vmem:[%s6712_s13 + $0x668] sm:$0xf0]  ;;  %v5522_v15 = vor.u32 %v6060_v13, %v5521_v12  ;;  %v4978_v23 = vor.u32 %v5924_v57, %v4977_v30  ;;  %v5844_v10 = vld [vmem:[%s6712_s13 + $0x12c] sm:$0xf0] }
 0x293   : > { %v5807_v16 = vld [vmem:[%s6712_s13 + $0xc] sm:$0xf]  ;;  %v5326_v32 = vor.u32 %v6007_v51, %v5323_v7  ;;  %v4913_v9 = vld [vmem:[%s6712_s13 + $0x310] sm:$0xf] }
 0x294   : > { %3331 = vmatpush.bf16.msrb.mxu2 %v5134_v0  ;;  %3306 = vmatpush.bf16.msrb.mxu0 %v4590_v49  ;;  %v4523_v25 = vld [vmem:[%s6712_s13 + $0x28] sm:$0xf0]  ;;  %v5234_v0 = vor.u32 %v5988_v44, %v5233_v6  ;;  %v4690_v49 = vor.u32 %v5852_v5, %v4689_v46  ;;  %v5908_v17 = vld [vmem:[%s6712_s13 + $0x32c] sm:$0xf0] }
 0x295   : > { %v5871_v26 = vld [vmem:[%s6712_s13 + $0x20c] sm:$0xf]  ;;  %v4526_v29 = vor.u32 %v5807_v16, %v4523_v25  ;;  %v5169_v54 = vld [vmem:[%s6712_s13 + $0x510] sm:$0xf]  ;;  %v4914_v16 = vor.u32 %v5908_v17, %v4913_v9  ;;  %v5992_v9 = vld [vmem:[%s6712_s13 + $0x5d4] sm:$0xf] }
 0x296   : > { %3344 = vmatpush.bf16.msrb.mxu3 %v5390_v41  ;;  %3319 = vmatpush.bf16.msrb.mxu1 %v4846_v33  ;;  %v4779_v27 = vld [vmem:[%s6712_s13 + $0x228] sm:$0xf0]  ;;  %v5490_v41 = vor.u32 %v6052_v38, %v5489_v21  ;;  %v4946_v33 = vor.u32 %v5916_v53, %v4945_v58  ;;  %v5972_v2 = vld [vmem:[%s6712_s13 + $0x52c] sm:$0xf0] }
 0x297   : > { %v5935_v11 = vld [vmem:[%s6712_s13 + $0x40c] sm:$0xf]  ;;  %v4782_v4 = vor.u32 %v5871_v26, %v4779_v27  ;;  %v5425_v51 = vld [vmem:[%s6712_s13 + $0x710] sm:$0xf]  ;;  %v5170_v25 = vor.u32 %v5972_v2, %v5169_v54  ;;  %v6056_v2 = vld [vmem:[%s6712_s13 + $0x7d4] sm:$0xf] }
 0x298   : > { %3332 = vmatpush.bf16.msrb.mxu2 %v5102_v22  ;;  %v5035_v1 = vld [vmem:[%s6712_s13 + $0x428] sm:$0xf0]  ;;  %3307 = vmatpush.bf16.msrb.mxu0 %v4558_v36  ;;  %v5202_v22 = vor.u32 %v5980_v34, %v5201_v40  ;;  %v6036_v7 = vld [vmem:[%s6712_s13 + $0x72c] sm:$0xf0]  ;;  %v4658_v36 = vor.u32 %v5844_v10, %v4657_v43  ;;  %v5011_v10 = vld [vmem:[%s6712_s13 + $0x3f0] sm:$0xf0] }
 0x299   : > { %v5999_v37 = vld [vmem:[%s6712_s13 + $0x60c] sm:$0xf]  ;;  %v5038_v61 = vor.u32 %v5935_v11, %v5035_v1  ;;  %v4881_v26 = vld [vmem:[%s6712_s13 + $0x2d0] sm:$0xf]  ;;  %v5426_v27 = vor.u32 %v6036_v7, %v5425_v51  ;;  %v5523_v51 = vld [vmem:[%s6712_s13 + $0x7f0] sm:$0xf0] }
 0x29a   : > { %3345 = vmatpush.bf16.msrb.mxu3 %v5358_v47  ;;  %v5291_v3 = vld [vmem:[%s6712_s13 + $0x628] sm:$0xf0]  ;;  %3320 = vmatpush.bf16.msrb.mxu1 %v4814_v45  ;;  %v5458_v47 = vor.u32 %v6044_v59, %v5457_v20  ;;  %v4625_v45 = vld [vmem:[%s6712_s13 + $0xd0] sm:$0xf] }
 0x29b   : > { %v5294_v35 = vor.u32 %v5999_v37, %v5291_v3  ;;  %v5900_v11 = vld [vmem:[%s6712_s13 + $0x2ec] sm:$0xf0] }
 0x29c   : > { %3333 = vmatpush.bf16.msrb.mxu2 %v5070_v50  ;;  %3308 = vmatpush.bf16.msrb.mxu0 %v4526_v29  ;;  %v5836_v50 = vld [vmem:[%s6712_s13 + $0xec] sm:$0xf0]  ;;  %v4882_v31 = vor.u32 %v5900_v11, %v4881_v26  ;;  %v5920_v26 = vld [vmem:[%s6712_s13 + $0x394] sm:$0xf] }
 0x29d   : > { %v5964_v1 = vld [vmem:[%s6712_s13 + $0x4ec] sm:$0xf0]  ;;  %v4626_v18 = vor.u32 %v5836_v50, %v4625_v45  ;;  %v5856_v45 = vld [vmem:[%s6712_s13 + $0x194] sm:$0xf] }
 0x29e   : > { %3346 = vmatpush.bf16.msrb.mxu3 %v5326_v32  ;;  %3321 = vmatpush.bf16.msrb.mxu1 %v4782_v4  ;;  %v5137_v32 = vld [vmem:[%s6712_s13 + $0x4d0] sm:$0xf]  ;;  %v4723_v50 = vld [vmem:[%s6712_s13 + $0x1b0] sm:$0xf0] }
 0x29f   : > { %3309 = vmatmul.bf16.vlgmr.msrb.gmra.mxu0 %v7844_v62  ;;  %v5393_v37 = vld [vmem:[%s6712_s13 + $0x6d0] sm:$0xf]  ;;  %v5138_v63 = vor.u32 %v5964_v1, %v5137_v32  ;;  %v4979_v11 = vld [vmem:[%s6712_s13 + $0x3b0] sm:$0xf0] }
 0x2a0   : > { %3334 = vmatpush.bf16.msrb.mxu2 %v5038_v61  ;;  %3353 = vmatpush.bf16.msra.mxu0 %v4754_v24  ;;  %v6028_v3 = vld [vmem:[%s6712_s13 + $0x6ec] sm:$0xf0]  ;;  %v5984_v32 = vld [vmem:[%s6712_s13 + $0x594] sm:$0xf] }
 0x2a1   : > { %3322 = vmatmul.bf16.vlgmr.msrb.gmra.mxu1 %v7846_v48  ;;  %v4593_v29 = vld [vmem:[%s6712_s13 + $0x90] sm:$0xf]  ;;  %v5394_v42 = vor.u32 %v6028_v3, %v5393_v37  ;;  %v5235_v1 = vld [vmem:[%s6712_s13 + $0x5b0] sm:$0xf0] }
 0x2a2   : > { %3347 = vmatpush.bf16.msrb.mxu3 %v5294_v35  ;;  %3366 = vmatpush.bf16.msra.mxu1 %v5010_v56  ;;  %v5828_v60 = vld [vmem:[%s6712_s13 + $0xac] sm:$0xf0]  ;;  %v6048_v37 = vld [vmem:[%s6712_s13 + $0x794] sm:$0xf] }
 0x2a3   : > { %3335 = vmatmul.bf16.vlgmr.msrb.gmra.mxu2 %v7833_v8  ;;  %v4849_v52 = vld [vmem:[%s6712_s13 + $0x290] sm:$0xf]  ;;  %v4594_v24 = vor.u32 %v5828_v60, %v4593_v29  ;;  %v5491_v3 = vld [vmem:[%s6712_s13 + $0x7b0] sm:$0xf0] }
 0x2a4   : > { %3379 = vmatpush.bf16.msra.mxu2 %v5266_v19  ;;  %3354 = vmatpush.bf16.msra.mxu0 %v4722_v55  ;;  %v5892_v4 = vld [vmem:[%s6712_s13 + $0x2ac] sm:$0xf0]  ;;  %v5848_v29 = vld [vmem:[%s6712_s13 + $0x154] sm:$0xf] }
 0x2a5   : > { %3348 = vmatmul.bf16.vlgmr.msrb.gmra.mxu3 %v7835_v14  ;;  %v5105_v61 = vld [vmem:[%s6712_s13 + $0x490] sm:$0xf]  ;;  %v4850_v56 = vor.u32 %v5892_v4, %v4849_v52  ;;  %v4691_v60 = vld [vmem:[%s6712_s13 + $0x170] sm:$0xf0] }
 0x2a6   : > { %3392 = vmatpush.bf16.msra.mxu3 %v5522_v15  ;;  %3367 = vmatpush.bf16.msra.mxu1 %v4978_v23  ;;  %v5956_v12 = vld [vmem:[%s6712_s13 + $0x4ac] sm:$0xf0]  ;;  %v5912_v52 = vld [vmem:[%s6712_s13 + $0x354] sm:$0xf] }
 0x2a7   : > { %v5361_v13 = vld [vmem:[%s6712_s13 + $0x690] sm:$0xf]  ;;  %v5106_v19 = vor.u32 %v5956_v12, %v5105_v61  ;;  %v4947_v4 = vld [vmem:[%s6712_s13 + $0x370] sm:$0xf0] }
 0x2a8   : > { %3380 = vmatpush.bf16.msra.mxu2 %v5234_v0  ;;  %3355 = vmatpush.bf16.msra.mxu0 %v4690_v49  ;;  %v6020_v35 = vld [vmem:[%s6712_s13 + $0x6ac] sm:$0xf0]  ;;  %v5864_v49 = vld [vmem:[%s6712_s13 + $0x1d4] sm:$0xf] }
 0x2a9   : > { %v4561_v39 = vld [vmem:[%s6712_s13 + $0x50] sm:$0xf]  ;;  %v5362_v15 = vor.u32 %v6020_v35, %v5361_v13  ;;  %v5976_v61 = vld [vmem:[%s6712_s13 + $0x554] sm:$0xf] }
 0x2aa   : > { %3393 = vmatpush.bf16.msra.mxu3 %v5490_v41  ;;  %3368 = vmatpush.bf16.msra.mxu1 %v4946_v33  ;;  %v5820_v28 = vld [vmem:[%s6712_s13 + $0x6c] sm:$0xf0]  ;;  %v4755_v33 = vld [vmem:[%s6712_s13 + $0x1f0] sm:$0xf0] }
 0x2ab   : > { %v4817_v30 = vld [vmem:[%s6712_s13 + $0x250] sm:$0xf]  ;;  %v4562_v55 = vor.u32 %v5820_v28, %v4561_v39  ;;  %v5203_v12 = vld [vmem:[%s6712_s13 + $0x570] sm:$0xf0] }
 0x2ac   : > { %3381 = vmatpush.bf16.msra.mxu2 %v5202_v22  ;;  %3356 = vmatpush.bf16.msra.mxu0 %v4658_v36  ;;  %v5884_v57 = vld [vmem:[%s6712_s13 + $0x26c] sm:$0xf0]  ;;  %v5928_v22 = vld [vmem:[%s6712_s13 + $0x3d4] sm:$0xf]  ;;  %v4758_v36 = vor.u32 %v5864_v49, %v4755_v33 }
 0x2ad   : > { %v5073_v6 = vld [vmem:[%s6712_s13 + $0x450] sm:$0xf]  ;;  %v4818_v46 = vor.u32 %v5884_v57, %v4817_v30  ;;  %v6040_v13 = vld [vmem:[%s6712_s13 + $0x754] sm:$0xf] }
 0x2ae   : > { %3394 = vmatpush.bf16.msra.mxu3 %v5458_v47  ;;  %3369 = vmatpush.bf16.msra.mxu1 %v4914_v16  ;;  %v5948_v44 = vld [vmem:[%s6712_s13 + $0x46c] sm:$0xf0]  ;;  %v5267_v47 = vld [vmem:[%s6712_s13 + $0x5f0] sm:$0xf0]  ;;  %v5014_v16 = vor.u32 %v5928_v22, %v5011_v10 }
 0x2af   : > { %v5329_v21 = vld [vmem:[%s6712_s13 + $0x650] sm:$0xf]  ;;  %v5074_v5 = vor.u32 %v5948_v44, %v5073_v6  ;;  %v5459_v35 = vld [vmem:[%s6712_s13 + $0x770] sm:$0xf0] }
 0x2b0   : > { %3382 = vmatpush.bf16.msra.mxu2 %v5170_v25  ;;  %3357 = vmatpush.bf16.msra.mxu0 %v4626_v18  ;;  %v6012_v38 = vld [vmem:[%s6712_s13 + $0x66c] sm:$0xf0]  ;;  %v5270_v25 = vor.u32 %v5992_v9, %v5267_v47  ;;  %v4726_v18 = vor.u32 %v5856_v45, %v4723_v50  ;;  %v5840_v39 = vld [vmem:[%s6712_s13 + $0x114] sm:$0xf] }
 0x2b1   : > { %v4529_v23 = vld [vmem:[%s6712_s13 + $0x10] sm:$0xf]  ;;  %v5330_v40 = vor.u32 %v6012_v38, %v5329_v21  ;;  %v4659_v28 = vld [vmem:[%s6712_s13 + $0x130] sm:$0xf0] }
 0x2b2   : > { %3395 = vmatpush.bf16.msra.mxu3 %v5426_v27  ;;  %3370 = vmatpush.bf16.msra.mxu1 %v4882_v31  ;;  %v5812_v0 = vld [vmem:[%s6712_s13 + $0x2c] sm:$0xf0]  ;;  %v5526_v27 = vor.u32 %v6056_v2, %v5523_v51  ;;  %v4982_v31 = vor.u32 %v5920_v26, %v4979_v11  ;;  %v5904_v30 = vld [vmem:[%s6712_s13 + $0x314] sm:$0xf] }
 0x2b3   : > { %v4785_v58 = vld [vmem:[%s6712_s13 + $0x210] sm:$0xf]  ;;  %v4530_v43 = vor.u32 %v5812_v0, %v4529_v23  ;;  %v4915_v57 = vld [vmem:[%s6712_s13 + $0x330] sm:$0xf0] }
 0x2b4   : > { %3383 = vmatpush.bf16.msra.mxu2 %v5138_v63  ;;  %3358 = vmatpush.bf16.msra.mxu0 %v4594_v24  ;;  %v5876_v41 = vld [vmem:[%s6712_s13 + $0x22c] sm:$0xf0]  ;;  %v5238_v63 = vor.u32 %v5984_v32, %v5235_v1  ;;  %v4694_v24 = vor.u32 %v5848_v29, %v4691_v60  ;;  %v5968_v6 = vld [vmem:[%s6712_s13 + $0x514] sm:$0xf]  ;;  %v4918_v23 = vor.u32 %v5904_v30, %v4915_v57  ;;  %v5017_v57 = vld [vmem:[%s6712_s13 + $0x3d8] sm:$0xf] }
 0x2b5   : > { %v5041_v53 = vld [vmem:[%s6712_s13 + $0x410] sm:$0xf]  ;;  %v4786_v17 = vor.u32 %v5876_v41, %v4785_v58  ;;  %v5171_v44 = vld [vmem:[%s6712_s13 + $0x530] sm:$0xf0] }
 0x2b6   : > { %3396 = vmatpush.bf16.msra.mxu3 %v5394_v42  ;;  %3371 = vmatpush.bf16.msra.mxu1 %v4850_v56  ;;  %v5940_v34 = vld [vmem:[%s6712_s13 + $0x42c] sm:$0xf0]  ;;  %v5494_v42 = vor.u32 %v6048_v37, %v5491_v3  ;;  %v4950_v56 = vor.u32 %v5912_v52, %v4947_v4  ;;  %v6032_v21 = vld [vmem:[%s6712_s13 + $0x714] sm:$0xf]  ;;  %v5174_v0 = vor.u32 %v5968_v6, %v5171_v44  ;;  %v5933_v6 = vld [vmem:[%s6712_s13 + $0x3f4] sm:$0xf0] }
 0x2b7   : > { %v5297_v20 = vld [vmem:[%s6712_s13 + $0x610] sm:$0xf]  ;;  %v5042_v54 = vor.u32 %v5940_v34, %v5041_v53  ;;  %v5427_v38 = vld [vmem:[%s6712_s13 + $0x730] sm:$0xf0] }
 0x2b8   : > { %3384 = vmatpush.bf16.msra.mxu2 %v5106_v19  ;;  %v6004_v59 = vld [vmem:[%s6712_s13 + $0x62c] sm:$0xf0]  ;;  %3359 = vmatpush.bf16.msra.mxu0 %v4562_v55  ;;  %v5206_v19 = vor.u32 %v5976_v61, %v5203_v12  ;;  %v4662_v55 = vor.u32 %v5840_v39, %v4659_v28  ;;  %v5896_v58 = vld [vmem:[%s6712_s13 + $0x2d4] sm:$0xf]  ;;  %v5430_v41 = vor.u32 %v6032_v21, %v5427_v38  ;;  %v4761_v39 = vld [vmem:[%s6712_s13 + $0x1d8] sm:$0xf] }
 0x2b9   : > { %v5298_v7 = vor.u32 %v6004_v59, %v5297_v20  ;;  %v4883_v53 = vld [vmem:[%s6712_s13 + $0x2f0] sm:$0xf0]  ;;  %v5273_v38 = vld [vmem:[%s6712_s13 + $0x5d8] sm:$0xf] }
 0x2ba   : > { %3397 = vmatpush.bf16.msra.mxu3 %v5362_v15  ;;  %3372 = vmatpush.bf16.msra.mxu1 %v4818_v46  ;;  %v5462_v15 = vor.u32 %v6040_v13, %v5459_v35  ;;  %v5832_v46 = vld [vmem:[%s6712_s13 + $0xd4] sm:$0xf]  ;;  %v4886_v33 = vor.u32 %v5896_v58, %v4883_v53  ;;  %v6061_v58 = vld [vmem:[%s6712_s13 + $0x7f4] sm:$0xf0] }
 0x2bb   : > { %v5139_v34 = vld [vmem:[%s6712_s13 + $0x4f0] sm:$0xf0] }
 0x2bc   : > { %3385 = vmatpush.bf16.msra.mxu2 %v5074_v5  ;;  %3360 = vmatpush.bf16.msra.mxu0 %v4530_v43  ;;  %v4627_v5 = vld [vmem:[%s6712_s13 + $0xf0] sm:$0xf0] }
 0x2bd   : > { %v6024_v20 = vld [vmem:[%s6712_s13 + $0x6d4] sm:$0xf]  ;;  %v4630_v49 = vor.u32 %v5832_v46, %v4627_v5  ;;  %v5529_v5 = vld [vmem:[%s6712_s13 + $0x7d8] sm:$0xf] }
 0x2be   : > { %3398 = vmatpush.bf16.msra.mxu3 %v5330_v40  ;;  %3373 = vmatpush.bf16.msra.mxu1 %v4786_v17  ;;  %v5960_v40 = vld [vmem:[%s6712_s13 + $0x4d4] sm:$0xf] }
 0x2bf   : > { %3361 = vmatmul.bf16.vlgmr.msra.gmra.mxu0 %v7844_v62  ;;  %v5395_v59 = vld [vmem:[%s6712_s13 + $0x6f0] sm:$0xf0]  ;;  %v5142_v22 = vor.u32 %v5960_v40, %v5139_v34  ;;  %v5018_v34 = vor.u32 %v5933_v6, %v5017_v57  ;;  %v4889_v57 = vld [vmem:[%s6712_s13 + $0x2d8] sm:$0xf] }
 0x2c0   : > { %3386 = vmatpush.bf16.msra.mxu2 %v5042_v54  ;;  %3405 = vmatpush.bf16.msrb.mxu0 %v4758_v36  ;;  %v5824_v43 = vld [vmem:[%s6712_s13 + $0x94] sm:$0xf]  ;;  %v5398_v47 = vor.u32 %v6024_v20, %v5395_v59  ;;  %v3167_v52 = vpop.f32.mrf.mxu1  ;;  %v4729_v59 = vld [vmem:[%s6712_s13 + $0x198] sm:$0xf] }
 0x2c1   : > { %3374 = vmatmul.bf16.vlgmr.msra.gmra.mxu1 %v7846_v48  ;;  %v4595_v10 = vld [vmem:[%s6712_s13 + $0xb0] sm:$0xf0] }
 0x2c2   : > { %3399 = vmatpush.bf16.msra.mxu3 %v5298_v7  ;;  %3418 = vmatpush.bf16.msrb.mxu1 %v5014_v16  ;;  %v5888_v9 = vld [vmem:[%s6712_s13 + $0x294] sm:$0xf]  ;;  %v4598_v36 = vor.u32 %v5824_v43, %v4595_v10  ;;  %v5530_v10 = vor.u32 %v6061_v58, %v5529_v5 }
 0x2c3   : > { %3387 = vmatmul.bf16.vlgmr.msra.gmra.mxu2 %v7833_v8  ;;  %v4851_v17 = vld [vmem:[%s6712_s13 + $0x2b0] sm:$0xf0] }
 0x2c4   : > { %3431 = vmatpush.bf16.msrb.mxu2 %v5270_v25  ;;  %3406 = vmatpush.bf16.msrb.mxu0 %v4726_v18  ;;  %v5952_v54 = vld [vmem:[%s6712_s13 + $0x494] sm:$0xf]  ;;  %v4854_v16 = vor.u32 %v5888_v9, %v4851_v17  ;;  %v3154_v18 = vpop.f32.mrf.mxu0  ;;  %v5925_v9 = vld [vmem:[%s6712_s13 + $0x3b4] sm:$0xf0] }
 0x2c5   : > { %3400 = vmatmul.bf16.vlgmr.msra.gmra.mxu3 %v7835_v14  ;;  %v5107_v2 = vld [vmem:[%s6712_s13 + $0x4b0] sm:$0xf0]  ;;  %v3168_v35 = vadd.f32 %v3167_v52, %v3154_v18  ;;  %v5989_v17 = vld [vmem:[%s6712_s13 + $0x5b4] sm:$0xf0] }
 0x2c6   : > { %3444 = vmatpush.bf16.msrb.mxu3 %v5526_v27  ;;  %3419 = vmatpush.bf16.msrb.mxu1 %v4982_v31  ;;  %v6016_v51 = vld [vmem:[%s6712_s13 + $0x694] sm:$0xf]  ;;  %v5110_v25 = vor.u32 %v5952_v54, %v5107_v2  ;;  %v5497_v2 = vld [vmem:[%s6712_s13 + $0x798] sm:$0xf] }
 0x2c7   : > { %v5363_v7 = vld [vmem:[%s6712_s13 + $0x6b0] sm:$0xf0]  ;;  %v6045_v18 = vld [vmem:[%s6712_s13 + $0x774] sm:$0xf0] }
 0x2c8   : > { %3432 = vmatpush.bf16.msrb.mxu2 %v5238_v63  ;;  %3407 = vmatpush.bf16.msrb.mxu0 %v4694_v24  ;;  %v5816_v45 = vld [vmem:[%s6712_s13 + $0x54] sm:$0xf]  ;;  %v5366_v27 = vor.u32 %v6016_v51, %v5363_v7  ;;  %v3180_v28 = vpop.f32.mrf.mxu2  ;;  %v3193_v30 = vpop.f32.mrf.mxu3  ;;  %v6053_v51 = vld [vmem:[%s6712_s13 + $0x7b4] sm:$0xf0] }
 0x2c9   : > { %v4563_v50 = vld [vmem:[%s6712_s13 + $0x70] sm:$0xf0]  ;;  %v3181_v44 = vadd.f32 %v3180_v28, %v3168_v35  ;;  %v3169_v54 = vpop.f32.mrf.mxu1  ;;  %v5845_v52 = vld [vmem:[%s6712_s13 + $0x134] sm:$0xf0] }
 0x2ca   : > { %3445 = vmatpush.bf16.msrb.mxu3 %v5494_v42  ;;  %3420 = vmatpush.bf16.msrb.mxu1 %v4950_v56  ;;  %v5880_v26 = vld [vmem:[%s6712_s13 + $0x254] sm:$0xf]  ;;  %v4566_v31 = vor.u32 %v5816_v45, %v4563_v50  ;;  %v4697_v50 = vld [vmem:[%s6712_s13 + $0x158] sm:$0xf] }
 0x2cb   : > { %v4819_v11 = vld [vmem:[%s6712_s13 + $0x270] sm:$0xf0]  ;;  %v5433_v35 = vld [vmem:[%s6712_s13 + $0x718] sm:$0xf] }
 0x2cc   : > { %3433 = vmatpush.bf16.msrb.mxu2 %v5206_v19  ;;  %3408 = vmatpush.bf16.msrb.mxu0 %v4662_v55  ;;  %v5944_v32 = vld [vmem:[%s6712_s13 + $0x454] sm:$0xf]  ;;  %v4822_v42 = vor.u32 %v5880_v26, %v4819_v11  ;;  %v5997_v55 = vld [vmem:[%s6712_s13 + $0x5f4] sm:$0xf0]  ;;  %v3156_v43 = vpop.f32.mrf.mxu0  ;;  %v5498_v11 = vor.u32 %v6053_v51, %v5497_v2 }
 0x2cd   : > { %v5075_v1 = vld [vmem:[%s6712_s13 + $0x470] sm:$0xf0]  ;;  %v5274_v20 = vor.u32 %v5997_v55, %v5273_v38  ;;  %v5853_v26 = vld [vmem:[%s6712_s13 + $0x174] sm:$0xf0] }
 0x2ce   : > { %3446 = vmatpush.bf16.msrb.mxu3 %v5462_v15  ;;  %3421 = vmatpush.bf16.msrb.mxu1 %v4918_v23  ;;  %v6008_v37 = vld [vmem:[%s6712_s13 + $0x654] sm:$0xf]  ;;  %v5078_v4 = vor.u32 %v5944_v32, %v5075_v1  ;;  %v5869_v15 = vld [vmem:[%s6712_s13 + $0x1f4] sm:$0xf0]  ;;  %v1582_v23 = vld [vmem:[#allocation3 + $0x30] sm:$0xff] }
 0x2cf   : > { %v5331_v3 = vld [vmem:[%s6712_s13 + $0x670] sm:$0xf0]  ;;  %v4762_v40 = vor.u32 %v5869_v15, %v4761_v39  ;;  %v5917_v32 = vld [vmem:[%s6712_s13 + $0x374] sm:$0xf0] }
 0x2d0   : > { %3434 = vmatpush.bf16.msrb.mxu2 %v5174_v0  ;;  %3409 = vmatpush.bf16.msrb.mxu0 %v4630_v49  ;;  %v5808_v63 = vld [vmem:[%s6712_s13 + $0x14] sm:$0xf]  ;;  %v5334_v24 = vor.u32 %v6008_v37, %v5331_v3  ;;  %v5861_v49 = vld [vmem:[%s6712_s13 + $0x1b4] sm:$0xf0] }
 0x2d1   : > { %v4531_v29 = vld [vmem:[%s6712_s13 + $0x30] sm:$0xf0]  ;;  %v4730_v7 = vor.u32 %v5861_v49, %v4729_v59  ;;  %v5209_v1 = vld [vmem:[%s6712_s13 + $0x558] sm:$0xf] }
 0x2d2   : > { %3447 = vmatpush.bf16.msrb.mxu3 %v5430_v41  ;;  %3422 = vmatpush.bf16.msrb.mxu1 %v4886_v33  ;;  %v5872_v60 = vld [vmem:[%s6712_s13 + $0x214] sm:$0xf]  ;;  %v4534_v21 = vor.u32 %v5808_v63, %v4531_v29  ;;  %v3194_v41 = vadd.f32 %v3193_v30, %v3181_v44  ;;  %v4985_v33 = vld [vmem:[%s6712_s13 + $0x398] sm:$0xf] }
 0x2d3   : > { %v4787_v61 = vld [vmem:[%s6712_s13 + $0x230] sm:$0xf0]  ;;  %v5981_v37 = vld [vmem:[%s6712_s13 + $0x574] sm:$0xf0] }
 0x2d4   : > { %3435 = vmatpush.bf16.msrb.mxu2 %v5142_v22  ;;  %3410 = vmatpush.bf16.msrb.mxu0 %v4598_v36  ;;  %v5936_v12 = vld [vmem:[%s6712_s13 + $0x414] sm:$0xf]  ;;  %v4790_v0 = vor.u32 %v5872_v60, %v4787_v61  ;;  %v3561_v22 = vadd.f32 %v3194_v41, %v1582_v23  ;;  %v3182_v36 = vpop.f32.mrf.mxu2  ;;  %v5465_v3 = vld [vmem:[%s6712_s13 + $0x758] sm:$0xf]  ;;  %v5210_v29 = vor.u32 %v5981_v37, %v5209_v1 }
 0x2d5   : > { %v5043_v13 = vld [vmem:[%s6712_s13 + $0x430] sm:$0xf0]  ;;  %v4665_v60 = vld [vmem:[%s6712_s13 + $0x118] sm:$0xf] }
 0x2d6   : > { %3448 = vmatpush.bf16.msrb.mxu3 %v5398_v47  ;;  %3423 = vmatpush.bf16.msrb.mxu1 %v4854_v16  ;;  %v6000_v56 = vld [vmem:[%s6712_s13 + $0x614] sm:$0xf]  ;;  %v5046_v46 = vor.u32 %v5936_v12, %v5043_v13  ;;  %v5241_v47 = vld [vmem:[%s6712_s13 + $0x598] sm:$0xf]  ;;  %3569 = vst [vmem:[#allocation3 + $0x30] sm:$0xff] %v3561_v22  ;;  %v3195_v16 = vpop.f32.mrf.mxu3 }
 0x2d7   : > { %v5299_v19 = vld [vmem:[%s6712_s13 + $0x630] sm:$0xf0]  ;;  %v5242_v45 = vor.u32 %v5989_v17, %v5241_v47  ;;  %v5909_v61 = vld [vmem:[%s6712_s13 + $0x334] sm:$0xf0] }
 0x2d8   : > { %3436 = vmatpush.bf16.msrb.mxu2 %v5110_v25  ;;  %3411 = vmatpush.bf16.msrb.mxu0 %v4566_v31  ;;  %v5302_v53 = vor.u32 %v6000_v56, %v5299_v19  ;;  %v4986_v25 = vor.u32 %v5925_v9, %v4985_v33  ;;  %v4698_v31 = vor.u32 %v5853_v26, %v4697_v50  ;;  %v5177_v12 = vld [vmem:[%s6712_s13 + $0x518] sm:$0xf] }
 0x2d9   : > { %v5973_v13 = vld [vmem:[%s6712_s13 + $0x534] sm:$0xf0]  ;;  %v4666_v56 = vor.u32 %v5845_v52, %v4665_v60 }
 0x2da   : > { %3449 = vmatpush.bf16.msrb.mxu3 %v5366_v27  ;;  %3424 = vmatpush.bf16.msrb.mxu1 %v4822_v42  ;;  %v4953_v27 = vld [vmem:[%s6712_s13 + $0x358] sm:$0xf]  ;;  %v5178_v28 = vor.u32 %v5973_v13, %v5177_v12 }
 0x2db   : > { %v4954_v63 = vor.u32 %v5917_v32, %v4953_v27  ;;  %v4921_v42 = vld [vmem:[%s6712_s13 + $0x318] sm:$0xf] }
 0x2dc   : > { %3437 = vmatpush.bf16.msrb.mxu2 %v5078_v4  ;;  %3412 = vmatpush.bf16.msrb.mxu0 %v4534_v21  ;;  %v5466_v4 = vor.u32 %v6045_v18, %v5465_v3  ;;  %v3206_v19 = vpop.f32.mrf.mxu0  ;;  %v4922_v39 = vor.u32 %v5909_v61, %v4921_v42  ;;  %v4633_v30 = vld [vmem:[%s6712_s13 + $0xd8] sm:$0xf] }
 0x2dd   : > { %v5837_v15 = vld [vmem:[%s6712_s13 + $0xf4] sm:$0xf0] }
 0x2de   : > { %3450 = vmatpush.bf16.msrb.mxu3 %v5334_v24  ;;  %3425 = vmatpush.bf16.msrb.mxu1 %v4790_v0  ;;  %v6037_v24 = vld [vmem:[%s6712_s13 + $0x734] sm:$0xf0]  ;;  %v3219_v6 = vpop.f32.mrf.mxu1  ;;  %v4634_v5 = vor.u32 %v5837_v15, %v4633_v30  ;;  %v5019_v15 = vld [vmem:[%s6712_s13 + $0x3f8] sm:$0xf0] }
 0x2df   : > { %3413 = vmatmul.bf16.vlgmr.msrb.gmra.mxu0 %v7844_v62  ;;  %v5434_v44 = vor.u32 %v6037_v24, %v5433_v35  ;;  %v5901_v21 = vld [vmem:[%s6712_s13 + $0x2f4] sm:$0xf0]  ;;  %v3220_v23 = vadd.f32 %v3219_v6, %v3206_v19  ;;  %v5865_v19 = vld [vmem:[%s6712_s13 + $0x1dc] sm:$0xf] }
 0x2e0   : > { %3438 = vmatpush.bf16.msrb.mxu2 %v5046_v46  ;;  %3457 = vmatpush.bf16.msra.mxu0 %v4762_v40  ;;  %v5145_v38 = vld [vmem:[%s6712_s13 + $0x4d8] sm:$0xf]  ;;  %v4890_v58 = vor.u32 %v5901_v21, %v4889_v57  ;;  %v5993_v57 = vld [vmem:[%s6712_s13 + $0x5dc] sm:$0xf] }
 0x2e1   : > { %3426 = vmatmul.bf16.vlgmr.msrb.gmra.mxu1 %v7846_v48  ;;  %v5965_v55 = vld [vmem:[%s6712_s13 + $0x4f4] sm:$0xf0]  ;;  %v5275_v6 = vld [vmem:[%s6712_s13 + $0x5f8] sm:$0xf0] }
 0x2e2   : > { %3451 = vmatpush.bf16.msrb.mxu3 %v5302_v53  ;;  %3470 = vmatpush.bf16.msra.mxu1 %v5018_v34  ;;  %v5401_v0 = vld [vmem:[%s6712_s13 + $0x6d8] sm:$0xf]  ;;  %v5146_v41 = vor.u32 %v5965_v55, %v5145_v38  ;;  %v6057_v38 = vld [vmem:[%s6712_s13 + $0x7dc] sm:$0xf] }
 0x2e3   : > { %3439 = vmatmul.bf16.vlgmr.msrb.gmra.mxu2 %v7833_v8  ;;  %v6029_v46 = vld [vmem:[%s6712_s13 + $0x6f4] sm:$0xf0]  ;;  %v5531_v55 = vld [vmem:[%s6712_s13 + $0x7f8] sm:$0xf0] }
 0x2e4   : > { %3483 = vmatpush.bf16.msra.mxu2 %v5274_v20  ;;  %3458 = vmatpush.bf16.msra.mxu0 %v4730_v7  ;;  %v4601_v53 = vld [vmem:[%s6712_s13 + $0x98] sm:$0xf]  ;;  %v5402_v59 = vor.u32 %v6029_v46, %v5401_v0  ;;  %v3208_v51 = vpop.f32.mrf.mxu0 }
 0x2e5   : > { %3452 = vmatmul.bf16.vlgmr.msrb.gmra.mxu3 %v7835_v14  ;;  %v5829_v40 = vld [vmem:[%s6712_s13 + $0xb4] sm:$0xf0]  ;;  %v5977_v51 = vld [vmem:[%s6712_s13 + $0x55c] sm:$0xf] }
 0x2e6   : > { %3496 = vmatpush.bf16.msra.mxu3 %v5530_v10  ;;  %3471 = vmatpush.bf16.msra.mxu1 %v4986_v25  ;;  %v4857_v34 = vld [vmem:[%s6712_s13 + $0x298] sm:$0xf]  ;;  %v3232_v20 = vpop.f32.mrf.mxu2  ;;  %v4602_v54 = vor.u32 %v5829_v40, %v4601_v53  ;;  %v3221_v50 = vpop.f32.mrf.mxu1  ;;  %v5921_v53 = vld [vmem:[%s6712_s13 + $0x39c] sm:$0xf]  ;;  %v5534_v40 = vor.u32 %v6057_v38, %v5531_v55 }
 0x2e7   : > { %v5893_v49 = vld [vmem:[%s6712_s13 + $0x2b4] sm:$0xf0]  ;;  %v3233_v43 = vadd.f32 %v3232_v20, %v3220_v23  ;;  %v5985_v20 = vld [vmem:[%s6712_s13 + $0x59c] sm:$0xf] }
 0x2e8   : > { %3484 = vmatpush.bf16.msra.mxu2 %v5242_v45  ;;  %3459 = vmatpush.bf16.msra.mxu0 %v4698_v31  ;;  %v5113_v33 = vld [vmem:[%s6712_s13 + $0x498] sm:$0xf]  ;;  %v3245_v10 = vpop.f32.mrf.mxu3  ;;  %v4858_v7 = vor.u32 %v5893_v49, %v4857_v34  ;;  %v4987_v34 = vld [vmem:[%s6712_s13 + $0x3b8] sm:$0xf0] }
 0x2e9   : > { %v5957_v22 = vld [vmem:[%s6712_s13 + $0x4b4] sm:$0xf0]  ;;  %v3246_v2 = vadd.f32 %v3245_v10, %v3233_v43  ;;  %v6049_v49 = vld [vmem:[%s6712_s13 + $0x79c] sm:$0xf]  ;;  %v4990_v43 = vor.u32 %v5921_v53, %v4987_v34 }
 0x2ea   : > { %3497 = vmatpush.bf16.msra.mxu3 %v5498_v11  ;;  %3472 = vmatpush.bf16.msra.mxu1 %v4954_v63  ;;  %v5369_v9 = vld [vmem:[%s6712_s13 + $0x698] sm:$0xf]  ;;  %v5114_v36 = vor.u32 %v5957_v22, %v5113_v33  ;;  %v5499_v33 = vld [vmem:[%s6712_s13 + $0x7b8] sm:$0xf0] }
 0x2eb   : > { %v6021_v47 = vld [vmem:[%s6712_s13 + $0x6b4] sm:$0xf0]  ;;  %v5371_v53 = vld [vmem:[%s6712_s13 + $0x6b8] sm:$0xf0] }
 0x2ec   : > { %3485 = vmatpush.bf16.msra.mxu2 %v5210_v29  ;;  %3460 = vmatpush.bf16.msra.mxu0 %v4666_v56  ;;  %v1583_v17 = vld [vmem:[#allocation3] sm:$0xff]  ;;  %v5370_v26 = vor.u32 %v6021_v47, %v5369_v9 }
 0x2ed   : > { %v4569_v16 = vld [vmem:[%s6712_s13 + $0x58] sm:$0xf]  ;;  %v3562_v1 = vadd.f32 %v3246_v2, %v1583_v17  ;;  %v5849_v9 = vld [vmem:[%s6712_s13 + $0x15c] sm:$0xf] }
 0x2ee   : > { %3498 = vmatpush.bf16.msra.mxu3 %v5466_v4  ;;  %3473 = vmatpush.bf16.msra.mxu1 %v4922_v39  ;;  %v5821_v25 = vld [vmem:[%s6712_s13 + $0x74] sm:$0xf0]  ;;  %v3234_v61 = vpop.f32.mrf.mxu2  ;;  %v4763_v39 = vld [vmem:[%s6712_s13 + $0x1f8] sm:$0xf0] }
 0x2ef   : > { %v4825_v45 = vld [vmem:[%s6712_s13 + $0x258] sm:$0xf]  ;;  %v4570_v18 = vor.u32 %v5821_v25, %v4569_v16  ;;  %3570 = vst [vmem:[#allocation3] sm:$0xff] %v3562_v1  ;;  %v4766_v0 = vor.u32 %v5865_v19, %v4763_v39  ;;  %v4699_v47 = vld [vmem:[%s6712_s13 + $0x178] sm:$0xf0] }
 0x2f0   : > { %3486 = vmatpush.bf16.msra.mxu2 %v5178_v28  ;;  %3461 = vmatpush.bf16.msra.mxu0 %v4634_v5  ;;  %v5885_v27 = vld [vmem:[%s6712_s13 + $0x274] sm:$0xf0]  ;;  %v3247_v56 = vpop.f32.mrf.mxu3  ;;  %v5929_v28 = vld [vmem:[%s6712_s13 + $0x3dc] sm:$0xf]  ;;  %v5278_v5 = vor.u32 %v5993_v57, %v5275_v6  ;;  %v4702_v25 = vor.u32 %v5849_v9, %v4699_v47 }
 0x2f1   : > { %v5081_v11 = vld [vmem:[%s6712_s13 + $0x458] sm:$0xf]  ;;  %v4826_v29 = vor.u32 %v5885_v27, %v4825_v45  ;;  %v5022_v46 = vor.u32 %v5929_v28, %v5019_v15  ;;  %v5913_v17 = vld [vmem:[%s6712_s13 + $0x35c] sm:$0xf] }
 0x2f2   : > { %3499 = vmatpush.bf16.msra.mxu3 %v5434_v44  ;;  %3474 = vmatpush.bf16.msra.mxu1 %v4890_v58  ;;  %v5949_v32 = vld [vmem:[%s6712_s13 + $0x474] sm:$0xf0]  ;;  %v5857_v58 = vld [vmem:[%s6712_s13 + $0x19c] sm:$0xf] }
 0x2f3   : > { %v5337_v37 = vld [vmem:[%s6712_s13 + $0x658] sm:$0xf]  ;;  %v5082_v60 = vor.u32 %v5949_v32, %v5081_v11  ;;  %v4955_v2 = vld [vmem:[%s6712_s13 + $0x378] sm:$0xf0] }
 0x2f4   : > { %3487 = vmatpush.bf16.msra.mxu2 %v5146_v41  ;;  %v6013_v3 = vld [vmem:[%s6712_s13 + $0x674] sm:$0xf0]  ;;  %3462 = vmatpush.bf16.msra.mxu0 %v4602_v54  ;;  %v4731_v41 = vld [vmem:[%s6712_s13 + $0x1b8] sm:$0xf0]  ;;  %v5502_v54 = vor.u32 %v6049_v49, %v5499_v33  ;;  %v4958_v45 = vor.u32 %v5913_v17, %v4955_v2 }
 0x2f5   : > { %v4537_v31 = vld [vmem:[%s6712_s13 + $0x18] sm:$0xf]  ;;  %v5338_v12 = vor.u32 %v6013_v3, %v5337_v37  ;;  %v4734_v22 = vor.u32 %v5857_v58, %v4731_v41  ;;  %v5467_v16 = vld [vmem:[%s6712_s13 + $0x778] sm:$0xf0] }
 0x2f6   : > { %3500 = vmatpush.bf16.msra.mxu3 %v5402_v59  ;;  %v5813_v63 = vld [vmem:[%s6712_s13 + $0x34] sm:$0xf0]  ;;  %3475 = vmatpush.bf16.msra.mxu1 %v4858_v7  ;;  %v5243_v59 = vld [vmem:[%s6712_s13 + $0x5b8] sm:$0xf0] }
 0x2f7   : > { %v4793_v52 = vld [vmem:[%s6712_s13 + $0x218] sm:$0xf]  ;;  %v4538_v30 = vor.u32 %v5813_v63, %v4537_v31  ;;  %v5246_v10 = vor.u32 %v5985_v20, %v5243_v59  ;;  %v5211_v7 = vld [vmem:[%s6712_s13 + $0x578] sm:$0xf0] }
 0x2f8   : > { %3488 = vmatpush.bf16.msra.mxu2 %v5114_v36  ;;  %v5877_v42 = vld [vmem:[%s6712_s13 + $0x234] sm:$0xf0]  ;;  %3463 = vmatpush.bf16.msra.mxu0 %v4570_v18  ;;  %v6041_v36 = vld [vmem:[%s6712_s13 + $0x75c] sm:$0xf]  ;;  %v5214_v50 = vor.u32 %v5977_v51, %v5211_v7 }
 0x2f9   : > { %v5049_v4 = vld [vmem:[%s6712_s13 + $0x418] sm:$0xf]  ;;  %v4794_v44 = vor.u32 %v5877_v42, %v4793_v52  ;;  %v4667_v27 = vld [vmem:[%s6712_s13 + $0x138] sm:$0xf0]  ;;  %v5470_v32 = vor.u32 %v6041_v36, %v5467_v16 }
 0x2fa   : > { %3501 = vmatpush.bf16.msra.mxu3 %v5370_v26  ;;  %v5941_v13 = vld [vmem:[%s6712_s13 + $0x434] sm:$0xf0]  ;;  %3476 = vmatpush.bf16.msra.mxu1 %v4826_v29  ;;  %v5841_v26 = vld [vmem:[%s6712_s13 + $0x11c] sm:$0xf] }
 0x2fb   : > { %v5305_v35 = vld [vmem:[%s6712_s13 + $0x618] sm:$0xf]  ;;  %v5050_v21 = vor.u32 %v5941_v13, %v5049_v4  ;;  %v5905_v11 = vld [vmem:[%s6712_s13 + $0x31c] sm:$0xf]  ;;  %v4670_v63 = vor.u32 %v5841_v26, %v4667_v27 }
 0x2fc   : > { %v6005_v24 = vld [vmem:[%s6712_s13 + $0x634] sm:$0xf0]  ;;  %3489 = vmatpush.bf16.msra.mxu2 %v5082_v60  ;;  %3464 = vmatpush.bf16.msra.mxu0 %v4538_v30  ;;  %v4923_v1 = vld [vmem:[%s6712_s13 + $0x338] sm:$0xf0]  ;;  %v3258_v29 = vpop.f32.mrf.mxu0 }
 0x2fd   : > { %v5306_v23 = vor.u32 %v6005_v24, %v5305_v35  ;;  %v5969_v37 = vld [vmem:[%s6712_s13 + $0x51c] sm:$0xf]  ;;  %v4926_v60 = vor.u32 %v5905_v11, %v4923_v1 }
 0x2fe   : > { %3502 = vmatpush.bf16.msra.mxu3 %v5338_v12  ;;  %3477 = vmatpush.bf16.msra.mxu1 %v4794_v44  ;;  %v5179_v3 = vld [vmem:[%s6712_s13 + $0x538] sm:$0xf0]  ;;  %v3271_v12 = vpop.f32.mrf.mxu1 }
 0x2ff   : > { %3465 = vmatmul.bf16.vlgmr.msra.gmra.mxu0 %v7844_v62  ;;  %v6033_v18 = vld [vmem:[%s6712_s13 + $0x71c] sm:$0xf]  ;;  %v5182_v52 = vor.u32 %v5969_v37, %v5179_v3  ;;  %v3272_v19 = vadd.f32 %v3271_v12, %v3258_v29 }
 0x300   : > { %3490 = vmatpush.bf16.msra.mxu2 %v5050_v21  ;;  %3509 = vmatpush.bf16.msrb.mxu0 %v4766_v0  ;;  %v5435_v31 = vld [vmem:[%s6712_s13 + $0x738] sm:$0xf0] }
 0x301   : > { %3478 = vmatmul.bf16.vlgmr.msra.gmra.mxu1 %v7846_v48  ;;  %v5833_v42 = vld [vmem:[%s6712_s13 + $0xdc] sm:$0xf]  ;;  %v5438_v13 = vor.u32 %v6033_v18, %v5435_v31 }
 0x302   : > { %3503 = vmatpush.bf16.msra.mxu3 %v5306_v23  ;;  %3522 = vmatpush.bf16.msrb.mxu1 %v5022_v46  ;;  %v4635_v4 = vld [vmem:[%s6712_s13 + $0xf8] sm:$0xf0] }
 0x303   : > { %3491 = vmatmul.bf16.vlgmr.msra.gmra.mxu2 %v7833_v8  ;;  %v5897_v61 = vld [vmem:[%s6712_s13 + $0x2dc] sm:$0xf]  ;;  %v4638_v30 = vor.u32 %v5833_v42, %v4635_v4 }
 0x304   : > { %3535 = vmatpush.bf16.msrb.mxu2 %v5278_v5  ;;  %3510 = vmatpush.bf16.msrb.mxu0 %v4734_v22  ;;  %v4891_v35 = vld [vmem:[%s6712_s13 + $0x2f8] sm:$0xf0]  ;;  %v3260_v59 = vpop.f32.mrf.mxu0 }
 0x305   : > { %3504 = vmatmul.bf16.vlgmr.msra.gmra.mxu3 %v7835_v14  ;;  %v5961_v24 = vld [vmem:[%s6712_s13 + $0x4dc] sm:$0xf]  ;;  %v4894_v15 = vor.u32 %v5897_v61, %v4891_v35 }
 0x306   : > { %3548 = vmatpush.bf16.msrb.mxu3 %v5534_v40  ;;  %3523 = vmatpush.bf16.msrb.mxu1 %v4990_v43  ;;  %v5147_v56 = vld [vmem:[%s6712_s13 + $0x4f8] sm:$0xf0]  ;;  %v3284_v38 = vpop.f32.mrf.mxu2  ;;  %v1584_v40 = vld [vmem:[#allocation3 + $0x18] sm:$0xff]  ;;  %v3273_v9 = vpop.f32.mrf.mxu1 }
 0x307   : > { %v6025_v39 = vld [vmem:[%s6712_s13 + $0x6dc] sm:$0xf]  ;;  %v5150_v57 = vor.u32 %v5961_v24, %v5147_v56  ;;  %v3285_v5 = vadd.f32 %v3284_v38, %v3272_v19  ;;  %v1585_v56 = vld [vmem:[#allocation3 + $0x10] sm:$0xff] }
 0x308   : > { %3536 = vmatpush.bf16.msrb.mxu2 %v5246_v10  ;;  %3511 = vmatpush.bf16.msrb.mxu0 %v4702_v25  ;;  %v5403_v28 = vld [vmem:[%s6712_s13 + $0x6f8] sm:$0xf0]  ;;  %v3297_v58 = vpop.f32.mrf.mxu3 }
 0x309   : > { %v5825_v6 = vld [vmem:[%s6712_s13 + $0x9c] sm:$0xf]  ;;  %v5406_v55 = vor.u32 %v6025_v39, %v5403_v28  ;;  %v3298_v20 = vadd.f32 %v3297_v58, %v3285_v5 }
 0x30a   : > { %3549 = vmatpush.bf16.msrb.mxu3 %v5502_v54  ;;  %3524 = vmatpush.bf16.msrb.mxu1 %v4958_v45  ;;  %v4603_v44 = vld [vmem:[%s6712_s13 + $0xb8] sm:$0xf0] }
 0x30b   : > { %v5889_v21 = vld [vmem:[%s6712_s13 + $0x29c] sm:$0xf]  ;;  %v4606_v34 = vor.u32 %v5825_v6, %v4603_v44  ;;  %v3563_v51 = vadd.f32 %v3298_v20, %v1584_v40 }
 0x30c   : > { %3537 = vmatpush.bf16.msrb.mxu2 %v5214_v50  ;;  %3512 = vmatpush.bf16.msrb.mxu0 %v4670_v63  ;;  %v4859_v23 = vld [vmem:[%s6712_s13 + $0x2b8] sm:$0xf0] }
 0x30d   : > { %v5953_v0 = vld [vmem:[%s6712_s13 + $0x49c] sm:$0xf]  ;;  %v4862_v49 = vor.u32 %v5889_v21, %v4859_v23  ;;  %3571 = vst [vmem:[#allocation3 + $0x18] sm:$0xff] %v3563_v51 }
 0x30e   : > { %3550 = vmatpush.bf16.msrb.mxu3 %v5470_v32  ;;  %3525 = vmatpush.bf16.msrb.mxu1 %v4926_v60  ;;  %v5115_v46 = vld [vmem:[%s6712_s13 + $0x4b8] sm:$0xf0]  ;;  %v3286_v11 = vpop.f32.mrf.mxu2 }
 0x30f   : > { %v6017_v41 = vld [vmem:[%s6712_s13 + $0x69c] sm:$0xf]  ;;  %v5118_v33 = vor.u32 %v5953_v0, %v5115_v46 }
 0x310   : > { %3538 = vmatpush.bf16.msrb.mxu2 %v5182_v52  ;;  %3513 = vmatpush.bf16.msrb.mxu0 %v4638_v30  ;;  %v5817_v22 = vld [vmem:[%s6712_s13 + $0x5c] sm:$0xf]  ;;  %v5374_v47 = vor.u32 %v6017_v41, %v5371_v53  ;;  %v3299_v18 = vpop.f32.mrf.mxu3 }
 0x311   : > { %v4571_v43 = vld [vmem:[%s6712_s13 + $0x78] sm:$0xf0] }
 0x312   : > { %3551 = vmatpush.bf16.msrb.mxu3 %v5438_v13  ;;  %3526 = vmatpush.bf16.msrb.mxu1 %v4894_v15  ;;  %v5881_v10 = vld [vmem:[%s6712_s13 + $0x25c] sm:$0xf]  ;;  %v4574_v16 = vor.u32 %v5817_v22, %v4571_v43 }
 0x313   : > { %v4827_v17 = vld [vmem:[%s6712_s13 + $0x278] sm:$0xf0] }
 0x314   : > { %3539 = vmatpush.bf16.msrb.mxu2 %v5150_v57  ;;  %v5945_v54 = vld [vmem:[%s6712_s13 + $0x45c] sm:$0xf]  ;;  %3514 = vmatpush.bf16.msrb.mxu0 %v4606_v34  ;;  %v4830_v25 = vor.u32 %v5881_v10, %v4827_v17 }
 0x315   : > { %v5083_v2 = vld [vmem:[%s6712_s13 + $0x478] sm:$0xf0] }
 0x316   : > { %3552 = vmatpush.bf16.msrb.mxu3 %v5406_v55  ;;  %v6009_v7 = vld [vmem:[%s6712_s13 + $0x65c] sm:$0xf]  ;;  %3527 = vmatpush.bf16.msrb.mxu1 %v4862_v49  ;;  %v5086_v45 = vor.u32 %v5945_v54, %v5083_v2 }
 0x317   : > { %v5339_v36 = vld [vmem:[%s6712_s13 + $0x678] sm:$0xf0] }
 0x318   : > { %3540 = vmatpush.bf16.msrb.mxu2 %v5118_v33  ;;  %v5809_v50 = vld [vmem:[%s6712_s13 + $0x1c] sm:$0xf]  ;;  %v5342_v32 = vor.u32 %v6009_v7, %v5339_v36  ;;  %3515 = vmatpush.bf16.msrb.mxu0 %v4574_v16 }
 0x319   : > { %v4539_v26 = vld [vmem:[%s6712_s13 + $0x38] sm:$0xf0] }
 0x31a   : > { %v5873_v27 = vld [vmem:[%s6712_s13 + $0x21c] sm:$0xf]  ;;  %3553 = vmatpush.bf16.msrb.mxu3 %v5374_v47  ;;  %v4542_v29 = vor.u32 %v5809_v50, %v4539_v26  ;;  %3528 = vmatpush.bf16.msrb.mxu1 %v4830_v25 }
 0x31b   : > { %v4795_v1 = vld [vmem:[%s6712_s13 + $0x238] sm:$0xf0] }
 0x31c   : > { %v5937_v37 = vld [vmem:[%s6712_s13 + $0x41c] sm:$0xf]  ;;  %3541 = vmatpush.bf16.msrb.mxu2 %v5086_v45  ;;  %v4798_v60 = vor.u32 %v5873_v27, %v4795_v1  ;;  %3516 = vmatpush.bf16.msrb.mxu0 %v4542_v29  ;;  %v3310_v4 = vpop.f32.mrf.mxu0 }
 0x31d   : > { %v5051_v3 = vld [vmem:[%s6712_s13 + $0x438] sm:$0xf0] }
 0x31e   : > { %v6001_v31 = vld [vmem:[%s6712_s13 + $0x61c] sm:$0xf]  ;;  %v5054_v52 = vor.u32 %v5937_v37, %v5051_v3  ;;  %3554 = vmatpush.bf16.msrb.mxu3 %v5342_v32  ;;  %3529 = vmatpush.bf16.msrb.mxu1 %v4798_v60  ;;  %v3323_v61 = vpop.f32.mrf.mxu1 }
 0x31f   : > { %v5307_v63 = vld [vmem:[%s6712_s13 + $0x638] sm:$0xf0]  ;;  %3517 = vmatmul.bf16.vlgmr.msrb.gmra.mxu0 %v7844_v62  ;;  %v3324_v12 = vadd.f32 %v3323_v61, %v3310_v4 }
 0x320   : > { %v5310_v42 = vor.u32 %v6001_v31, %v5307_v63  ;;  %3542 = vmatpush.bf16.msrb.mxu2 %v5054_v52  ;;  %v1586_v21 = vld [vmem:[#allocation3 + $0x8] sm:$0xff]  ;;  %v1587_v59 = vld [vmem:[#allocation3 + $0x20] sm:$0xff]  ;;  %v1589_v63 = vld [vmem:[#allocation3 + $0x38] sm:$0xff] }
 0x321   : > { %3530 = vmatmul.bf16.vlgmr.msrb.gmra.mxu1 %v7846_v48  ;;  %v1588_v36 = vld [vmem:[#allocation3 + $0x28] sm:$0xff] }
 0x322   : > { %3555 = vmatpush.bf16.msrb.mxu3 %v5310_v42 }
 0x323   : > { %3543 = vmatmul.bf16.vlgmr.msrb.gmra.mxu2 %v7833_v8 }
 0x324   : > { %v3312_v39 = vpop.f32.mrf.mxu0 }
 0x325   : > { %3556 = vmatmul.bf16.vlgmr.msrb.gmra.mxu3 %v7835_v14 }
 0x326   : > { %v3336_v13 = vpop.f32.mrf.mxu2  ;;  %v3325_v28 = vpop.f32.mrf.mxu1 }
 0x327   : > { %v3337_v35 = vadd.f32 %v3336_v13, %v3324_v12 }
 0x328   : > { %v3349_v24 = vpop.f32.mrf.mxu3 }
 0x329   : > { %v3350_v19 = vadd.f32 %v3349_v24, %v3337_v35 }
 0x32b   : > { %v3564_v30 = vadd.f32 %v3350_v19, %v1585_v56 }
 0x32d   : > { %3572 = vst [vmem:[#allocation3 + $0x10] sm:$0xff] %v3564_v30 }
 0x32e   : > { %v3338_v15 = vpop.f32.mrf.mxu2 }
 0x330   : > { %v3351_v62 = vpop.f32.mrf.mxu3 }
 0x33c   : > { %v3362_v57 = vpop.f32.mrf.mxu0 }
 0x33e   : > { %v3375_v48 = vpop.f32.mrf.mxu1 }
 0x33f   : > { %v3376_v6 = vadd.f32 %v3375_v48, %v3362_v57 }
 0x344   : > { %v3364_v55 = vpop.f32.mrf.mxu0 }
 0x346   : > { %v3388_v8 = vpop.f32.mrf.mxu2  ;;  %v3377_v23 = vpop.f32.mrf.mxu1 }
 0x347   : > { %v3389_v44 = vadd.f32 %v3388_v8, %v3376_v6 }
 0x348   : > { %v3401_v14 = vpop.f32.mrf.mxu3 }
 0x349   : > { %v3402_v38 = vadd.f32 %v3401_v14, %v3389_v44 }
 0x34b   : > { %v3565_v0 = vadd.f32 %v3402_v38, %v1586_v21 }
 0x34d   : > { %3573 = vst [vmem:[#allocation3 + $0x8] sm:$0xff] %v3565_v0 }
 0x34e   : > { %v3390_v46 = vpop.f32.mrf.mxu2 }
 0x350   : > { %v3403_v5 = vpop.f32.mrf.mxu3 }
 0x35c   : > { %v3414_v58 = vpop.f32.mrf.mxu0 }
 0x35e   : > { %v3427_v41 = vpop.f32.mrf.mxu1 }
 0x35f   : > { %v3428_v53 = vadd.f32 %v3427_v41, %v3414_v58 }
 0x364   : > { %v3416_v33 = vpop.f32.mrf.mxu0 }
 0x366   : > { %v3440_v40 = vpop.f32.mrf.mxu2  ;;  %v3429_v22 = vpop.f32.mrf.mxu1 }
 0x367   : > { %v3441_v34 = vadd.f32 %v3440_v40, %v3428_v53 }
 0x368   : > { %v3453_v20 = vpop.f32.mrf.mxu3 }
 0x369   : > { %v3454_v49 = vadd.f32 %v3453_v20, %v3441_v34 }
 0x36b   : > { %v3566_v43 = vadd.f32 %v3454_v49, %v1587_v59 }
 0x36d   : > { %3574 = vst [vmem:[#allocation3 + $0x20] sm:$0xff] %v3566_v43 }
 0x36e   : > { %v3442_v10 = vpop.f32.mrf.mxu2 }
 0x370   : > { %v3455_v9 = vpop.f32.mrf.mxu3 }
 0x37c   : > { %v3466_v47 = vpop.f32.mrf.mxu0 }
 0x37e   : > { %v3479_v17 = vpop.f32.mrf.mxu1 }
 0x37f   : > { %v3480_v54 = vadd.f32 %v3479_v17, %v3466_v47 }
 0x384   : > { %v3468_v25 = vpop.f32.mrf.mxu0 }
 0x386   : > { %v3492_v2 = vpop.f32.mrf.mxu2  ;;  %v3481_v45 = vpop.f32.mrf.mxu1 }
 0x387   : > { %v3493_v51 = vadd.f32 %v3492_v2, %v3480_v54 }
 0x388   : > { %v3505_v7 = vpop.f32.mrf.mxu3 }
 0x389   : > { %v3506_v16 = vadd.f32 %v3505_v7, %v3493_v51 }
 0x38b   : > { %v3567_v50 = vadd.f32 %v3506_v16, %v1588_v36 }
 0x38d   : > { %3575 = vst [vmem:[#allocation3 + $0x28] sm:$0xff] %v3567_v50 }
 0x38e   : > { %v3494_v26 = vpop.f32.mrf.mxu2 }
 0x390   : > { %v3507_v27 = vpop.f32.mrf.mxu3 }
 0x39c   : > { %v3518_v11 = vpop.f32.mrf.mxu0 }
 0x39e   : > { %v3531_v32 = vpop.f32.mrf.mxu1 }
 0x39f   : > { %v3532_v1 = vadd.f32 %v3531_v32, %v3518_v11 }
 0x3a4   : > { %v3520_v31 = vpop.f32.mrf.mxu0 }
 0x3a6   : > { %v3544_v37 = vpop.f32.mrf.mxu2  ;;  %v3533_v29 = vpop.f32.mrf.mxu1 }
 0x3a7   : > { %v3545_v3 = vadd.f32 %v3544_v37, %v3532_v1 }
 0x3a8   : > { %v3557_v18 = vpop.f32.mrf.mxu3 }
 0x3a9   : > { %v3558_v60 = vadd.f32 %v3557_v18, %v3545_v3 }
 0x3ab   : > { %v3568_v52 = vadd.f32 %v3558_v60, %v1589_v63 }
 0x3ac   : > { %3580 = sbr.rel (%p5535_p1) target bundleno = 1152 (0x480), region = 88 }
 0x3ad   : > { %3576 = vst [vmem:[#allocation3 + $0x38] sm:$0xff] %v3568_v52 }
 0x3ae   : > { %v3546_v42 = vpop.f32.mrf.mxu2 }
 0x3b0   : > { %v3559_v4 = vpop.f32.mrf.mxu3 }
 0x3b1   : > { %v6069_v61 = vld [vmem:[#allocation12 + $0x38] sm:$0xff]  ;;  %v6068_v24 = vld [vmem:[#allocation12 + $0x30] sm:$0xff]  ;;  %v6067_v28 = vld [vmem:[#allocation12 + $0x28] sm:$0xff] }
 0x3b2   : > { %v6077_v12 = vld [vmem:[#allocation12 + $0x78] sm:$0xff]  ;;  %4219 = vmatpush.bf16.msra.mxu0 %v6069_v61  ;;  %v6076_v56 = vld [vmem:[#allocation12 + $0x70] sm:$0xff]  ;;  %v6075_v30 = vld [vmem:[#allocation12 + $0x68] sm:$0xff] }
 0x3b3   : > { %v6085_v13 = vld [vmem:[#allocation12 + $0xb8] sm:$0xff]  ;;  %4232 = vmatpush.bf16.msra.mxu1 %v6077_v12  ;;  %v6084_v19 = vld [vmem:[#allocation12 + $0xb0] sm:$0xff]  ;;  %v6083_v15 = vld [vmem:[#allocation12 + $0xa8] sm:$0xff] }
 0x3b4   : > { %v6093_v35 = vld [vmem:[#allocation12 + $0xf8] sm:$0xff]  ;;  %4245 = vmatpush.bf16.msra.mxu2 %v6085_v13  ;;  %v6092_v39 = vld [vmem:[#allocation12 + $0xf0] sm:$0xff]  ;;  %v6091_v62 = vld [vmem:[#allocation12 + $0xe8] sm:$0xff] }
 0x3b5   : > { %4258 = vmatpush.bf16.msra.mxu3 %v6093_v35  ;;  %v6066_v57 = vld [vmem:[#allocation12 + $0x20] sm:$0xff]  ;;  %v8287_v14 = vld [vmem:[#allocation11] sm:$0xff]  ;;  %v6064_v20 = vld [vmem:[#allocation12 + $0x10] sm:$0xff] }
 0x3b6   : > { %4220 = vmatpush.bf16.msra.mxu0 %v6068_v24  ;;  %v6074_v48 = vld [vmem:[#allocation12 + $0x60] sm:$0xff]  ;;  %v6065_v21 = vld [vmem:[#allocation12 + $0x18] sm:$0xff]  ;;  %v3593_v55 = vperm.slane %v8287_v14, 2  ;;  %v3594_v0 = vperm.slane %v8287_v14, 3  ;;  %v3591_v46 = vperm.slane %v8287_v14, 0  ;;  %v6072_v59 = vld [vmem:[#allocation12 + $0x50] sm:$0xff] }
 0x3b7   : > { %4233 = vmatpush.bf16.msra.mxu1 %v6076_v56  ;;  %v6082_v6 = vld [vmem:[#allocation12 + $0xa0] sm:$0xff]  ;;  %v6073_v38 = vld [vmem:[#allocation12 + $0x58] sm:$0xff]  ;;  %v3592_v49 = vperm.slane %v8287_v14, 1  ;;  %v6080_v33 = vld [vmem:[#allocation12 + $0x90] sm:$0xff]  ;;  %v3595_v47 = vperm.slane %v8287_v14, 4  ;;  %v3596_v17 = vperm.slane %v8287_v14, 5 }
 0x3b8   : > { %4246 = vmatpush.bf16.msra.mxu2 %v6084_v19  ;;  %v6090_v8 = vld [vmem:[#allocation12 + $0xe0] sm:$0xff]  ;;  %v6081_v5 = vld [vmem:[#allocation12 + $0x98] sm:$0xff]  ;;  %v6088_v22 = vld [vmem:[#allocation12 + $0xd0] sm:$0xff]  ;;  %v3597_v7 = vperm.slane %v8287_v14, 6 }
 0x3b9   : > { %4259 = vmatpush.bf16.msra.mxu3 %v6092_v39  ;;  %v3583_v44 = vld [vmem:[#allocation3 + $0x18] sm:$0xff]  ;;  %v3584_v23 = vld [vmem:[#allocation3 + $0x10] sm:$0xff]  ;;  %v3582_v10 = vld [vmem:[#allocation3] sm:$0xff] }
 0x3ba   : > { %4221 = vmatpush.bf16.msra.mxu0 %v6067_v28  ;;  %v6089_v58 = vld [vmem:[#allocation12 + $0xd8] sm:$0xff]  ;;  %v8292_v53 = vadd.f32 %v3593_v55, %v3583_v44  ;;  %v8294_v40 = vadd.f32 %v3594_v0, %v3584_v23  ;;  %v6063_v54 = vld [vmem:[#allocation12 + $0x8] sm:$0xff]  ;;  %v8311_v50 = vadd.f32 %v3592_v49, %v3582_v10  ;;  %v6062_v31 = vld [vmem:[#allocation12] sm:$0xff] }
 0x3bb   : > { %4234 = vmatpush.bf16.msra.mxu1 %v6075_v30  ;;  %v3581_v41 = vld [vmem:[#allocation3 + $0x30] sm:$0xff]  ;;  %v6071_v36 = vld [vmem:[#allocation12 + $0x48] sm:$0xff]  ;;  %v3585_v23 = vld [vmem:[#allocation3 + $0x8] sm:$0xff] }
 0x3bc   : > { %4247 = vmatpush.bf16.msra.mxu2 %v6083_v15  ;;  %v8296_v34 = vadd.f32 %v3591_v46, %v3581_v41  ;;  %v3649_v43 = vmul.f32 %v8292_v53, %v8292_v53  ;;  %v3650_v9 = vmul.f32 %v8294_v40, %v8294_v40  ;;  %vm3617_vm8 = vcmp.le.f32.partialorder %v8292_v53, -1.0  ;;  %v6079_v16 = vld [vmem:[#allocation12 + $0x88] sm:$0xff]  ;;  %v6070_v63 = vld [vmem:[#allocation12 + $0x40] sm:$0xff]  ;;  %v6101_v56 = vld [vmem:[#allocation12 + $0x138] sm:$0xff] }
 0x3bd   : > { %4260 = vmatpush.bf16.msra.mxu3 %v6091_v62  ;;  %v3625_v25 = vadd.f32 0.33333334, %v8292_v53  ;;  %vm3633_vm9 = vcmp.ge.f32.partialorder %v8292_v53, 1.0  ;;  %v6087_v26 = vld [vmem:[#allocation12 + $0xc8] sm:$0xff]  ;;  %v5538_v27 = vadd.f32 -0.33333334, %v8292_v53  ;;  %v3648_v42 = vmul.f32 %v8311_v50, %v8311_v50 }
 0x3be   : > { %4222 = vmatpush.bf16.msra.mxu0 %v6066_v57  ;;  %v3657_v2 = vadd.f32 3.0, %v3649_v43  ;;  %v3647_v51 = vmul.f32 %v8296_v34, %v8296_v34  ;;  %v3658_v45 = vadd.f32 3.0, %v3650_v9  ;;  %v3626_v32 = vadd.f32 0.33333334, %v8294_v40  ;;  %v6078_v61 = vld [vmem:[#allocation12 + $0x80] sm:$0xff]  ;;  %v6109_v19 = vld [vmem:[#allocation12 + $0x178] sm:$0xff] }
 0x3bf   : > { %4235 = vmatpush.bf16.msra.mxu1 %v6074_v48  ;;  %vm3634_vm10 = vcmp.ge.f32.partialorder %v8294_v40, 1.0  ;;  %v5539_v37 = vadd.f32 -0.33333334, %v8294_v40  ;;  %v3623_v18 = vadd.f32 0.33333334, %v8296_v34  ;;  %vm3618_vm11 = vcmp.le.f32.partialorder %v8294_v40, -1.0 }
 0x3c0   : > { %4248 = vmatpush.bf16.msra.mxu2 %v6082_v6  ;;  %v3665_v11 = vmul.f32 %v3657_v2, %v8292_v53  ;;  %v3655_v1 = vadd.f32 3.0, %v3647_v51  ;;  %v3666_v3 = vmul.f32 %v3658_v45, %v8294_v40  ;;  %v5536_v60 = vadd.f32 -0.33333334, %v8296_v34  ;;  %v6086_v12 = vld [vmem:[#allocation12 + $0xc0] sm:$0xff]  ;;  %v6117_v62 = vld [vmem:[#allocation12 + $0x1b8] sm:$0xff]  ;;  %v3586_v0 = vld [vmem:[#allocation3 + $0x20] sm:$0xff] }
 0x3c1   : > { %4261 = vmatpush.bf16.msra.mxu3 %v6090_v8  ;;  %vm3631_vm12 = vcmp.ge.f32.partialorder %v8296_v34, 1.0  ;;  %vm3615_vm13 = vcmp.le.f32.partialorder %v8296_v34, -1.0  ;;  %v3656_v24 = vadd.f32 3.0, %v3648_v42  ;;  %v3624_v30 = vadd.f32 0.33333334, %v8311_v50  ;;  %v6125_v57 = vld [vmem:[#allocation12 + $0x1f8] sm:$0xff] }
 0x3c2   : > { %4223 = vmatpush.bf16.msra.mxu0 %v6065_v21  ;;  %v3673_v29 = vmul.f32 0.16666667, %v3665_v11  ;;  %v3663_v52 = vmul.f32 %v3655_v1, %v8296_v34  ;;  %v3674_v4 = vmul.f32 0.16666667, %v3666_v3  ;;  %v3598_v15 = vperm.slane %v8287_v14, 7  ;;  %v3588_v41 = vld [vmem:[#allocation3 + $0x38] sm:$0xff] }
 0x3c3   : > { %4236 = vmatpush.bf16.msra.mxu1 %v6073_v38  ;;  %v5537_v8 = vadd.f32 -0.33333334, %v8311_v50  ;;  %v3664_v44 = vmul.f32 %v3656_v24, %v8311_v50  ;;  %vm3632_vm14 = vcmp.ge.f32.partialorder %v8311_v50, 1.0  ;;  %vm3616_vm15 = vcmp.le.f32.partialorder %v8311_v50, -1.0  ;;  %v6100_v53 = vld [vmem:[#allocation12 + $0x130] sm:$0xff]  ;;  %v6123_v2 = vld [vmem:[#allocation12 + $0x1e8] sm:$0xff] }
 0x3c4   : > { %4249 = vmatpush.bf16.msra.mxu2 %v6081_v5  ;;  %v3681_v13 = vsel %vm3633_vm9, %v5538_v27, %v3673_v29  ;;  %v3671_v35 = vmul.f32 0.16666667, %v3663_v52  ;;  %v3682_v28 = vsel %vm3634_vm10, %v5539_v37, %v3674_v4  ;;  %v6108_v40 = vld [vmem:[#allocation12 + $0x170] sm:$0xff]  ;;  %v8349_v49 = vadd.f32 %v3595_v47, %v3585_v23  ;;  %v6099_v47 = vld [vmem:[#allocation12 + $0x128] sm:$0xff]  ;;  %v6114_v45 = vld [vmem:[#allocation12 + $0x1a0] sm:$0xff] }
 0x3c5   : > { %4262 = vmatpush.bf16.msra.mxu3 %v6089_v58  ;;  %v3689_v39 = vsel %vm3617_vm8, %v3625_v25, %v3681_v13  ;;  %v3690_v48 = vsel %vm3618_vm11, %v3626_v32, %v3682_v28  ;;  %v3672_v5 = vmul.f32 0.16666667, %v3664_v44  ;;  %v3587_v58 = vld [vmem:[#allocation3 + $0x28] sm:$0xff]  ;;  %v8361_v10 = vadd.f32 %v3598_v15, %v3588_v41  ;;  %v6106_v25 = vld [vmem:[#allocation12 + $0x160] sm:$0xff]  ;;  %v6103_v15 = vld [vmem:[#allocation12 + $0x148] sm:$0xff] }
 0x3c6   : > { %4224 = vmatpush.bf16.msra.mxu0 %v6064_v20  ;;  %v3679_v6 = vsel %vm3631_vm12, %v5536_v60, %v3671_v35  ;;  %v3697_v21 = vpack.c.bf16 %v3689_v39, %v3689_v39  ;;  %v3698_v38 = vpack.c.bf16 %v3690_v48, %v3690_v48  ;;  %v6116_v34 = vld [vmem:[#allocation12 + $0x1b0] sm:$0xff]  ;;  %v8359_v43 = vadd.f32 %v3597_v7, %v3587_v58  ;;  %v6122_v50 = vld [vmem:[#allocation12 + $0x1e0] sm:$0xff]  ;;  %v6097_v1 = vld [vmem:[#allocation12 + $0x118] sm:$0xff] }
 0x3c7   : > { %4237 = vmatpush.bf16.msra.mxu1 %v6072_v59  ;;  %v3687_v55 = vsel %vm3615_vm13, %v3623_v18, %v3679_v6  ;;  %v6124_v20 = vld [vmem:[#allocation12 + $0x1f0] sm:$0xff]  ;;  %v3680_v59 = vsel %vm3632_vm14, %v5537_v8, %v3672_v5  ;;  %v3651_v51 = vmul.f32 %v8349_v49, %v8349_v49  ;;  %v6105_v37 = vld [vmem:[#allocation12 + $0x158] sm:$0xff]  ;;  %vm3635_vm0 = vcmp.ge.f32.partialorder %v8349_v49, 1.0  ;;  %v6111_v48 = vld [vmem:[#allocation12 + $0x188] sm:$0xff] }
 0x3c8   : > { %4250 = vmatpush.bf16.msra.mxu2 %v6080_v33  ;;  %v3695_v46 = vpack.c.bf16 %v3687_v55, %v3687_v55  ;;  %v8353_v33 = vadd.f32 %v3596_v17, %v3586_v0  ;;  %v6115_v17 = vld [vmem:[#allocation12 + $0x1a8] sm:$0xff]  ;;  %v3653_v7 = vmul.f32 %v8359_v43, %v8359_v43  ;;  %v6113_v3 = vld [vmem:[#allocation12 + $0x198] sm:$0xff]  ;;  %v6096_v29 = vld [vmem:[#allocation12 + $0x110] sm:$0xff]  ;;  %v5543_v39 = vadd.f32 -0.33333334, %v8361_v10 }
 0x3c9   : > { %4263 = vmatpush.bf16.msra.mxu3 %v6088_v22  ;;  %v3688_v22 = vsel %vm3616_vm15, %v3624_v30, %v3680_v59  ;;  %v6121_v18 = vld [vmem:[#allocation12 + $0x1d8] sm:$0xff]  ;;  %v6104_v42 = vld [vmem:[#allocation12 + $0x150] sm:$0xff]  ;;  %v6095_v30 = vld [vmem:[#allocation12 + $0x108] sm:$0xff]  ;;  %vm3637_vm2 = vcmp.ge.f32.partialorder %v8359_v43, 1.0  ;;  %vm3638_vm3 = vcmp.ge.f32.partialorder %v8361_v10, 1.0  ;;  %vm3619_vm4 = vcmp.le.f32.partialorder %v8349_v49, -1.0 }
 0x3ca   : > { %4225 = vmatpush.bf16.msra.mxu0 %v6063_v54  ;;  %v3696_v9 = vpack.c.bf16 %v3688_v22, %v3688_v22  ;;  %v6107_v54 = vld [vmem:[#allocation12 + $0x168] sm:$0xff]  ;;  %v3652_v14 = vmul.f32 %v8353_v33, %v8353_v33  ;;  %v3661_v11 = vadd.f32 3.0, %v3653_v7  ;;  %v6112_v4 = vld [vmem:[#allocation12 + $0x190] sm:$0xff]  ;;  %vm3636_vm1 = vcmp.ge.f32.partialorder %v8353_v33, 1.0  ;;  %v6094_v0 = vld [vmem:[#allocation12 + $0x100] sm:$0xff] }
 0x3cb   : > { %4238 = vmatpush.bf16.msra.mxu1 %v6071_v36  ;;  %v3654_v36 = vmul.f32 %v8361_v10, %v8361_v10  ;;  %v5541_v13 = vadd.f32 -0.33333334, %v8353_v33  ;;  %vm3620_vm5 = vcmp.le.f32.partialorder %v8353_v33, -1.0  ;;  %v6119_v6 = vld [vmem:[#allocation12 + $0x1c8] sm:$0xff]  ;;  %vm3621_vm6 = vcmp.le.f32.partialorder %v8359_v43, -1.0  ;;  %v6110_v41 = vld [vmem:[#allocation12 + $0x180] sm:$0xff] }
 0x3cc   : > { %4251 = vmatpush.bf16.msra.mxu2 %v6079_v16  ;;  %v6098_v16 = vld [vmem:[#allocation12 + $0x120] sm:$0xff]  ;;  %v3660_v27 = vadd.f32 3.0, %v3652_v14  ;;  %v3669_v60 = vmul.f32 %v3661_v11, %v8359_v43  ;;  %vm3622_vm7 = vcmp.le.f32.partialorder %v8361_v10, -1.0 }
 0x3cd   : > { %4264 = vmatpush.bf16.msra.mxu3 %v6087_v26  ;;  %v3659_v26 = vadd.f32 3.0, %v3651_v51  ;;  %v3662_v32 = vadd.f32 3.0, %v3654_v36 }
 0x3ce   : > { %4226 = vmatpush.bf16.msra.mxu0 %v6062_v31 }
 0x3cf   : > { %4239 = vmatpush.bf16.msra.mxu1 %v6070_v63  ;;  %v3667_v31 = vmul.f32 %v3659_v26, %v8349_v49  ;;  %v3668_v63 = vmul.f32 %v3660_v27, %v8353_v33  ;;  %v3670_v52 = vmul.f32 %v3662_v32, %v8361_v10 }
 0x3d0   : > { %4252 = vmatpush.bf16.msra.mxu2 %v6078_v61  ;;  %v6120_v61 = vld [vmem:[#allocation12 + $0x1d0] sm:$0xff] }
 0x3d1   : > { %4265 = vmatpush.bf16.msra.mxu3 %v6086_v12  ;;  %4227 = vmatmul.bf16.vlgmr.msra.gmra.mxu0 %v3695_v46  ;;  %v5540_v12 = vadd.f32 -0.33333334, %v8349_v49  ;;  %v3675_v35 = vmul.f32 0.16666667, %v3667_v31  ;;  %v3676_v24 = vmul.f32 0.16666667, %v3668_v63 }
 0x3d2   : > { %4271 = vmatpush.bf16.msrb.mxu0 %v6101_v56  ;;  %4240 = vmatmul.bf16.vlgmr.msra.gmra.mxu1 %v3696_v9  ;;  %v5542_v56 = vadd.f32 -0.33333334, %v8359_v43  ;;  %v3678_v28 = vmul.f32 0.16666667, %v3670_v52  ;;  %v6102_v46 = vld [vmem:[#allocation12 + $0x140] sm:$0xff] }
 0x3d3   : > { %4284 = vmatpush.bf16.msrb.mxu1 %v6109_v19  ;;  %4253 = vmatmul.bf16.vlgmr.msra.gmra.mxu2 %v3697_v21  ;;  %v3677_v19 = vmul.f32 0.16666667, %v3669_v60  ;;  %v3683_v8 = vsel %vm3635_vm0, %v5540_v12, %v3675_v35  ;;  %v3684_v44 = vsel %vm3636_vm1, %v5541_v13, %v3676_v24  ;;  %v3629_v21 = vadd.f32 0.33333334, %v8359_v43 }
 0x3d4   : > { %4297 = vmatpush.bf16.msrb.mxu2 %v6117_v62  ;;  %4266 = vmatmul.bf16.vlgmr.msra.gmra.mxu3 %v3698_v38  ;;  %v3627_v62 = vadd.f32 0.33333334, %v8349_v49  ;;  %v3630_v38 = vadd.f32 0.33333334, %v8361_v10  ;;  %v3686_v23 = vsel %vm3638_vm3, %v5543_v39, %v3678_v28 }
 0x3d5   : > { %4310 = vmatpush.bf16.msrb.mxu3 %v6125_v57  ;;  %v3628_v57 = vadd.f32 0.33333334, %v8353_v33  ;;  %v3685_v55 = vsel %vm3637_vm2, %v5542_v56, %v3677_v19 }
 0x3d6   : > { %4272 = vmatpush.bf16.msrb.mxu0 %v6100_v53  ;;  %v3691_v5 = vsel %vm3619_vm4, %v3627_v62, %v3683_v8  ;;  %v6118_v53 = vld [vmem:[#allocation12 + $0x1c0] sm:$0xff] }
 0x3d7   : > { %4285 = vmatpush.bf16.msrb.mxu1 %v6108_v40  ;;  %v3692_v58 = vsel %vm3620_vm5, %v3628_v57, %v3684_v44  ;;  %v3693_v40 = vsel %vm3621_vm6, %v3629_v21, %v3685_v55 }
 0x3d8   : > { %4298 = vmatpush.bf16.msrb.mxu2 %v6116_v34  ;;  %v3694_v34 = vsel %vm3622_vm7, %v3630_v38, %v3686_v23  ;;  %v3700_v59 = vpack.c.bf16 %v3692_v58, %v3692_v58  ;;  %v3701_v22 = vpack.c.bf16 %v3693_v40, %v3693_v40 }
 0x3d9   : > { %4311 = vmatpush.bf16.msrb.mxu3 %v6124_v20  ;;  %v3699_v20 = vpack.c.bf16 %v3691_v5, %v3691_v5  ;;  %v3702_v43 = vpack.c.bf16 %v3694_v34, %v3694_v34 }
 0x3da   : > { %4273 = vmatpush.bf16.msrb.mxu0 %v6099_v47 }
 0x3db   : > { %4286 = vmatpush.bf16.msrb.mxu1 %v6107_v54 }
 0x3dc   : > { %4299 = vmatpush.bf16.msrb.mxu2 %v6115_v17  ;;  %v6248_v17 = vld [vmem:[#allocation14] ss:$0 sm:$0xff] }
 0x3dd   : > { %4312 = vmatpush.bf16.msrb.mxu3 %v6123_v2 }
 0x3de   : > { %4274 = vmatpush.bf16.msrb.mxu0 %v6098_v16 }
 0x3df   : > { %4287 = vmatpush.bf16.msrb.mxu1 %v6106_v25 }
 0x3e0   : > { %4300 = vmatpush.bf16.msrb.mxu2 %v6114_v45 }
 0x3e1   : > { %4313 = vmatpush.bf16.msrb.mxu3 %v6122_v50 }
 0x3e2   : > { %4275 = vmatpush.bf16.msrb.mxu0 %v6097_v1 }
 0x3e3   : > { %4288 = vmatpush.bf16.msrb.mxu1 %v6105_v37 }
 0x3e4   : > { %4301 = vmatpush.bf16.msrb.mxu2 %v6113_v3 }
 0x3e5   : > { %4314 = vmatpush.bf16.msrb.mxu3 %v6121_v18 }
 0x3e6   : > { %4276 = vmatpush.bf16.msrb.mxu0 %v6096_v29 }
 0x3e7   : > { %4289 = vmatpush.bf16.msrb.mxu1 %v6104_v42 }
 0x3e8   : > { %4302 = vmatpush.bf16.msrb.mxu2 %v6112_v4 }
 0x3e9   : > { %4315 = vmatpush.bf16.msrb.mxu3 %v6120_v61 }
 0x3ea   : > { %4277 = vmatpush.bf16.msrb.mxu0 %v6095_v30 }
 0x3eb   : > { %4290 = vmatpush.bf16.msrb.mxu1 %v6103_v15 }
 0x3ec   : > { %4303 = vmatpush.bf16.msrb.mxu2 %v6111_v48 }
 0x3ed   : > { %4316 = vmatpush.bf16.msrb.mxu3 %v6119_v6 }
 0x3ee   : > { %4278 = vmatpush.bf16.msrb.mxu0 %v6094_v0 }
 0x3ef   : > { %4291 = vmatpush.bf16.msrb.mxu1 %v6102_v46 }
 0x3f0   : > { %4304 = vmatpush.bf16.msrb.mxu2 %v6110_v41 }
 0x3f1   : > { %4317 = vmatpush.bf16.msrb.mxu3 %v6118_v53  ;;  %4279 = vmatmul.bf16.vlgmr.msrb.gmra.mxu0 %v3699_v20 }
 0x3f2   : > { %4292 = vmatmul.bf16.vlgmr.msrb.gmra.mxu1 %v3700_v59 }
 0x3f3   : > { %4305 = vmatmul.bf16.vlgmr.msrb.gmra.mxu2 %v3701_v22 }
 0x3f4   : > { %4318 = vmatmul.bf16.vlgmr.msrb.gmra.mxu3 %v3702_v43 }
 0x44e   : > { %v4228_v49 = vpop.f32.mrf.mxu0 }
 0x44f   : > { %v4241_v33 = vpop.f32.mrf.mxu1  ;;  %v4229_v14 = vadd.f32 %v6248_v17, %v4228_v49 }
 0x451   : > { %v4242_v7 = vadd.f32 %v4241_v33, %v4229_v14 }
 0x456   : > { %v4254_v10 = vpop.f32.mrf.mxu2  ;;  %v4230_v47 = vpop.f32.mrf.mxu0 }
 0x457   : > { %v4267_v9 = vpop.f32.mrf.mxu3  ;;  %v4243_v54 = vpop.f32.mrf.mxu1  ;;  %v4255_v36 = vadd.f32 %v4254_v10, %v4242_v7 }
 0x459   : > { %v4268_v16 = vadd.f32 %v4267_v9, %v4255_v36 }
 0x45e   : > { %v4256_v2 = vpop.f32.mrf.mxu2 }
 0x45f   : > { %v4269_v51 = vpop.f32.mrf.mxu3 }
 0x46e   : > { %v4280_v25 = vpop.f32.mrf.mxu0 }
 0x46f   : > { %v4293_v45 = vpop.f32.mrf.mxu1  ;;  %v4281_v50 = vadd.f32 %v4280_v25, %v4268_v16 }
 0x471   : > { %v4294_v26 = vadd.f32 %v4293_v45, %v4281_v50 }
 0x476   : > { %v4306_v27 = vpop.f32.mrf.mxu2  ;;  %v4282_v1 = vpop.f32.mrf.mxu0 }
 0x477   : > { %v4319_v11 = vpop.f32.mrf.mxu3  ;;  %v4307_v32 = vadd.f32 %v4306_v27, %v4294_v26  ;;  %v4295_v37 = vpop.f32.mrf.mxu1 }
 0x479   : > { %v4320_v3 = vadd.f32 %v4319_v11, %v4307_v32 }
 0x47b   : > { %4323 = vst [vmem:[%s8432_s8] sm:$0xff] %v4320_v3 }
 0x47e   : > { %v4308_v18 = vpop.f32.mrf.mxu2 }
 0x47f   : > { %v4321_v31 = vpop.f32.mrf.mxu3 }
 0x480 PF: > { %s24_s10 = sadd.s32 1, %s6525_s10   ;;  %s8518_s16 = smov %s6689_s27 }
 0x481   : > { %p21_p3 = scmp.ge.s32.totalorder %s24_s10, 4   ;;  %s8519_s27 = smov %s6509_s28 }
 0x482   : > { %s8520_s28 = smov %s6513_s29  ;;  %s8521_s29 = smov %s8518_s16 }
 0x483   : > { %s8522_s30 = smov %s6521_s9  ;;  %s8523_s9 = smov %s8525_s2 }
 0x484   :  { %23 = sbr.rel (!%p21_p3) target bundleno = 11 (0xb), region = 130 }
 0x489   :  { %4343 = vsyncpa [#allocation5], 1 }
 0x48a   :  { %4345 = vsyncpa [#allocation5 + $0x1], 1 }
 0x48b   :  { %4346 = vsyncpa [#allocation7], 1 }
 0x48c   :  { %4347 = vsyncpa [#allocation10], 1 }
 0x48d   :  { %4349 = vsyncpa [#allocation10 + $0x1], 1 }
 0x48e   :  { %4350 = vsyncpa [#allocation13], 1 }

</bundles_post_ra>
